<compile_context>
chip_gen: v6e
topology: v6e:2x2x1
jax: 0.10.0
libtpu: 0.0.40
codegen_flags: <defaults>
</compile_context>

<pallas_src>
import math

import jax
import jax.numpy as jnp
from jax import lax
from jax.experimental import pallas as pl
from jax.experimental.pallas import tpu as pltpu

PAD_IDX = 0  # constants.PAD_IDX


def _round_up(x, m):
    return ((x + m - 1) // m) * m


def scaled_dot_attn_kernel(
    word_emb_ref,   # (Bb, E)       f32
    ctx_emb_ref,    # (S, Bb, E)    f32
    lens_ref,       # (Bb, 1)       i32   valid lengths per batch element
    wih_f_ref,      # (3, E, H)     fwd GRU input weights per gate (r,z,n), transposed
    whh_f_ref,      # (3, H, H)
    bih_f_ref,      # (3, 1, H)
    bhh_f_ref,      # (3, 1, H)
    wih_b_ref,      # (3, E, H)     backward direction
    whh_b_ref,      # (3, H, H)
    bih_b_ref,      # (3, 1, H)
    bhh_b_ref,      # (3, 1, H)
    wq_ref,         # (E, E)        linear_q.weight^T
    bq_ref,         # (1, E)
    wk_f_ref,       # (H, E)        linear_k.weight^T rows for the fwd half
    wk_b_ref,       # (H, E)        ... bwd half
    bk_ref,         # (1, E)
    out_ref,        # (Bb, OUT_W)   [c (2H) | emb (2H) | att (S) | zero pad]
    gi_f_scr,       # scratch (3, S, Bb, H) precomputed fwd input projections per gate
    gi_b_scr,       # scratch (3, S, Bb, H)
    fwd_scr,        # scratch (S, Bb, H)    fwd GRU outputs (zero past length)
    bwd_scr,        # scratch (S, Bb, H)    bwd GRU outputs (zero past length)
):
    S, B, E = ctx_emb_ref.shape
    H = whh_f_ref.shape[-1]
    OUT_W = out_ref.shape[-1]

    lens = lens_ref[...]                                   # (B, 1) int32

    # ---- hoisted input projections: one (S*B,E)x(E,H) matmul per gate/direction ----
    ctx_flat = ctx_emb_ref[...].reshape(S * B, E)
    for g in range(3):
        gi_f_scr[g] = (
            jnp.dot(ctx_flat, wih_f_ref[g], preferred_element_type=jnp.float32)
            + bih_f_ref[g]).reshape(S, B, H)
        gi_b_scr[g] = (
            jnp.dot(ctx_flat, wih_b_ref[g], preferred_element_type=jnp.float32)
            + bih_b_ref[g]).reshape(S, B, H)

    whh_f = [whh_f_ref[g] for g in range(3)]
    bhh_f = [bhh_f_ref[g] for g in range(3)]
    whh_b = [whh_b_ref[g] for g in range(3)]
    bhh_b = [bhh_b_ref[g] for g in range(3)]

    h0 = jnp.zeros((B, H), jnp.float32)

    # ---- forward GRU recurrence (state in loop carry; only h @ W_hh on the path) ----
    def fwd_body(t, h):
        gh_r = jnp.dot(h, whh_f[0], preferred_element_type=jnp.float32) + bhh_f[0]
        gh_z = jnp.dot(h, whh_f[1], preferred_element_type=jnp.float32) + bhh_f[1]
        gh_n = jnp.dot(h, whh_f[2], preferred_element_type=jnp.float32) + bhh_f[2]
        r = jax.nn.sigmoid(gi_f_scr[0, t] + gh_r)
        z = jax.nn.sigmoid(gi_f_scr[1, t] + gh_z)
        n = jnp.tanh(gi_f_scr[2, t] + r * gh_n)
        h_new = (1.0 - z) * n + z * h
        valid = t < lens                                   # (B, 1) bool
        fwd_scr[t] = jnp.where(valid, h_new, 0.0)
        return jnp.where(valid, h_new, h)

    lax.fori_loop(0, S, fwd_body, h0, unroll=True)

    # ---- backward GRU recurrence (packed-sequence semantics via length mask) ----
    def bwd_body(s, h):
        t = S - 1 - s
        gh_r = jnp.dot(h, whh_b[0], preferred_element_type=jnp.float32) + bhh_b[0]
        gh_z = jnp.dot(h, whh_b[1], preferred_element_type=jnp.float32) + bhh_b[1]
        gh_n = jnp.dot(h, whh_b[2], preferred_element_type=jnp.float32) + bhh_b[2]
        r = jax.nn.sigmoid(gi_b_scr[0, t] + gh_r)
        z = jax.nn.sigmoid(gi_b_scr[1, t] + gh_z)
        n = jnp.tanh(gi_b_scr[2, t] + r * gh_n)
        h_new = (1.0 - z) * n + z * h
        valid = t < lens
        bwd_scr[t] = jnp.where(valid, h_new, 0.0)
        return jnp.where(valid, h_new, h)

    lax.fori_loop(0, S, bwd_body, h0, unroll=True)

    # ---- V = relu(linear_q(word_emb)) ----
    V = jax.nn.relu(
        jnp.dot(word_emb_ref[...], wq_ref[...], preferred_element_type=jnp.float32)
        + bq_ref[...])                                     # (B, E)

    # ---- linear_k batched over all timesteps; split weights avoid lane concat ----
    fwd_all = fwd_scr[...]                                 # (S, B, H)
    bwd_all = bwd_scr[...]
    K = jax.nn.relu(
        jnp.dot(fwd_all.reshape(S * B, H), wk_f_ref[...],
                preferred_element_type=jnp.float32)
        + jnp.dot(bwd_all.reshape(S * B, H), wk_b_ref[...],
                  preferred_element_type=jnp.float32)
        + bk_ref[...])                                     # (S*B, E)

    scale = 1.0 / math.sqrt(E)                             # C.size(-1) ** -0.5
    # (B, S) logit matrix: one lane-reduce per timestep row-block + one concat.
    logit_cols = [
        jnp.sum(K[s * B:(s + 1) * B] * V, axis=-1, keepdims=True) * scale
        for s in range(S)]
    logits = jnp.concatenate(logit_cols, axis=-1)          # (B, S)

    # ---- vectorized softmax (padded timesteps included, matching PyTorch) ----
    m = jnp.max(logits, axis=-1, keepdims=True)
    p = jnp.exp(logits - m)
    denom = jnp.sum(p, axis=-1, keepdims=True)
    att = p * pl.reciprocal(denom, approx=True)            # (B, S)
    # TODO(synk): attention dropout is identity at inference (model.eval()).

    # ---- max pool over time (torch.max(context_vec, 0)[0]) ----
    emb_f = jnp.max(fwd_all, axis=0)                       # (B, H)
    emb_b = jnp.max(bwd_all, axis=0)

    # ---- attention-weighted context sum  c = att @ context_vec ----
    c_f = jnp.zeros((B, H), jnp.float32)
    c_b = jnp.zeros((B, H), jnp.float32)
    for s in range(S):                                     # S small & static
        a_s = att[:, s:s + 1]                              # (B, 1)
        c_f = c_f + a_s * fwd_all[s]
        c_b = c_b + a_s * bwd_all[s]

    # ---- single lane-dense output slab: [c | emb | att | zero pad] ----
    pieces = [c_f, c_b, emb_f, emb_b, att]
    used = 4 * H + S
    if OUT_W > used:
        pieces.append(jnp.zeros((B, OUT_W - used), jnp.float32))
    out_ref[...] = jnp.concatenate(pieces, axis=-1)


def build_pallas_forward(E, H, S, B_pad, B_BLK):
    assert B_pad % B_BLK == 0 and B_BLK % 8 == 0
    out_w = _round_up(4 * H + S, 128)

    def rep(shape):
        nd = len(shape)
        return pl.BlockSpec(shape, lambda i, _nd=nd: (0,) * _nd)

    in_specs = [
        pl.BlockSpec((B_BLK, E), lambda i: (i, 0)),          # word_emb
        pl.BlockSpec((S, B_BLK, E), lambda i: (0, i, 0)),    # ctx_emb
        pl.BlockSpec((B_BLK, 1), lambda i: (i, 0)),          # lengths
        rep((3, E, H)), rep((3, H, H)), rep((3, 1, H)), rep((3, 1, H)),   # fwd GRU
        rep((3, E, H)), rep((3, H, H)), rep((3, 1, H)), rep((3, 1, H)),   # bwd GRU
        rep((E, E)), rep((1, E)),                            # linear_q
        rep((H, E)), rep((H, E)), rep((1, E)),               # linear_k (split fwd/bwd)
    ]

    return pl.pallas_call(
        scaled_dot_attn_kernel,
        out_shape=jax.ShapeDtypeStruct((B_pad, out_w), jnp.float32),
        grid=(B_pad // B_BLK,),
        in_specs=in_specs,
        out_specs=pl.BlockSpec((B_BLK, out_w), lambda i: (i, 0)),
        scratch_shapes=[
            pltpu.VMEM((3, S, B_BLK, H), jnp.float32),       # fwd per-gate input proj
            pltpu.VMEM((3, S, B_BLK, H), jnp.float32),       # bwd per-gate input proj
            pltpu.VMEM((S, B_BLK, H), jnp.float32),          # fwd GRU outputs
            pltpu.VMEM((S, B_BLK, H), jnp.float32),          # bwd GRU outputs
        ],
        compiler_params=pltpu.CompilerParams(
            dimension_semantics=("parallel",)),              # megacore batch sharding
    )


def init_params(key, vocab, E, H):
    ks = jax.random.split(key, 7)

    def xavier_normal(k, out_dim, in_dim):
        std = math.sqrt(2.0 / (in_dim + out_dim))
        return (std * jax.random.normal(k, (out_dim, in_dim))).astype(jnp.float32)

    # random_embedding: uniform(-sqrt(3/E), sqrt(3/E)); PyTorch copies it over
    # the whole table (the padding row is overwritten too).
    emb_scale = math.sqrt(3.0 / E)
    emb_table = jax.random.uniform(
        ks[0], (vocab, E), jnp.float32, -emb_scale, emb_scale)

    def split_ih(w):   # (3H, E) -> (3, E, H), per-gate transposed (gate order r,z,n)
        return jnp.transpose(w.reshape(3, H, E), (0, 2, 1))

    def split_hh(w):   # (3H, H) -> (3, H, H), per-gate transposed
        return jnp.transpose(w.reshape(3, H, H), (0, 2, 1))

    w_ih_f = xavier_normal(ks[1], 3 * H, E)
    w_hh_f = xavier_normal(ks[2], 3 * H, H)
    w_ih_b = xavier_normal(ks[3], 3 * H, E)
    w_hh_b = xavier_normal(ks[4], 3 * H, H)
    wq = xavier_normal(ks[5], E, E)           # linear_q: (E, E)
    wk = xavier_normal(ks[6], E, 2 * H)       # linear_k: (E, 2H)
    wk_t = wk.T                               # (2H, E)

    zeros_gate = jnp.zeros((3, 1, H), jnp.float32)
    return dict(
        embedding=emb_table,
        w_ih_f=split_ih(w_ih_f), w_hh_f=split_hh(w_hh_f),
        b_ih_f=zeros_gate, b_hh_f=zeros_gate,
        w_ih_b=split_ih(w_ih_b), w_hh_b=split_hh(w_hh_b),
        b_ih_b=zeros_gate, b_hh_b=zeros_gate,
        wq_t=wq.T, bq=jnp.zeros((1, E), jnp.float32),
        wk_f_t=wk_t[:H], wk_b_t=wk_t[H:], bk=jnp.zeros((1, E), jnp.float32),
    )


def scaled_dot_attention_forward(word, context, params, *, b_blk=8):
    """word: (B,) int32; context: (S, B) int32 (seq-major, PAD_IDX padded)."""
    emb_table = params["embedding"]
    word_emb = emb_table[word].astype(jnp.float32)                 # (B, E) glue gather
    ctx_emb = emb_table[context].astype(jnp.float32)               # (S, B, E)
    lengths = jnp.sum((context != PAD_IDX).astype(jnp.int32), axis=0)   # (B,)

    S, B = context.shape
    E = emb_table.shape[1]
    H = params["w_hh_f"].shape[-1]

    # Pad batch to a multiple of 8 sublanes (padded rows have length 0 -> zeros).
    b_pad = max(b_blk, ((B + b_blk - 1) // b_blk) * b_blk)
    pad = b_pad - B
    if pad:
        word_emb = jnp.pad(word_emb, ((0, pad), (0, 0)))
        ctx_emb = jnp.pad(ctx_emb, ((0, 0), (0, pad), (0, 0)))
        lengths = jnp.pad(lengths, ((0, pad),))
    lens2d = lengths[:, None].astype(jnp.int32)

    kernel_fn = build_pallas_forward(E, H, S, b_pad, b_blk)
    out = kernel_fn(
        word_emb, ctx_emb, lens2d,
        params["w_ih_f"], params["w_hh_f"], params["b_ih_f"], params["b_hh_f"],
        params["w_ih_b"], params["w_hh_b"], params["b_ih_b"], params["b_hh_b"],
        params["wq_t"], params["bq"],
        params["wk_f_t"], params["wk_b_t"], params["bk"],
    )
    out = out[:B]
    c = out[:, :2 * H]
    emb = out[:, 2 * H:4 * H]
    att = out[:, 4 * H:4 * H + S][:, None, :]   # (B, 1, S), like torch.bmm(V, C^T)
    return c, emb, att


if __name__ == "__main__":
    VOCAB, E, H, S, B = 50, 32, 16, 8, 2

    key = jax.random.PRNGKey(0)
    k_params, k_word, k_ctx = jax.random.split(key, 3)

    params = init_params(k_params, VOCAB, E, H)

    word = jax.random.randint(k_word, (B,), 1, VOCAB, dtype=jnp.int32)
    ctx_tokens = jax.random.randint(k_ctx, (S, B), 1, VOCAB, dtype=jnp.int32)
    lengths = jnp.array([S, 5], dtype=jnp.int32)          # batch 1 has trailing padding
    context = jnp.where(jnp.arange(S)[:, None] < lengths[None, :], ctx_tokens, PAD_IDX)

    c, emb, att = scaled_dot_attention_forward(word, context, params)
    jax.block_until_ready((c, emb, att))

    assert c.shape == (B, 2 * H)
    assert emb.shape == (B, 2 * H)
    assert att.shape == (B, 1, S)
    assert bool(jnp.all(jnp.isfinite(c)))
    assert bool(jnp.all(jnp.isfinite(emb)))
    assert bool(jnp.all(jnp.isfinite(att)))
    print("KERNEL_OK")
</pallas_src>

<mosaic_0001>
module attributes {stable_mosaic.version = 11 : i64} {
  func.func @scaled_dot_attn_kernel(%arg0: i32, %arg1: memref<8x32xf32, #tpu.memory_space<vmem>>, %arg2: memref<8x8x32xf32, #tpu.memory_space<vmem>>, %arg3: memref<8x1xi32, #tpu.memory_space<vmem>>, %arg4: memref<3x32x16xf32, #tpu.memory_space<vmem>>, %arg5: memref<3x16x16xf32, #tpu.memory_space<vmem>>, %arg6: memref<3x1x16xf32, #tpu.memory_space<vmem>>, %arg7: memref<3x1x16xf32, #tpu.memory_space<vmem>>, %arg8: memref<3x32x16xf32, #tpu.memory_space<vmem>>, %arg9: memref<3x16x16xf32, #tpu.memory_space<vmem>>, %arg10: memref<3x1x16xf32, #tpu.memory_space<vmem>>, %arg11: memref<3x1x16xf32, #tpu.memory_space<vmem>>, %arg12: memref<32x32xf32, #tpu.memory_space<vmem>>, %arg13: memref<1x32xf32, #tpu.memory_space<vmem>>, %arg14: memref<16x32xf32, #tpu.memory_space<vmem>>, %arg15: memref<16x32xf32, #tpu.memory_space<vmem>>, %arg16: memref<1x32xf32, #tpu.memory_space<vmem>>, %arg17: memref<8x128xf32, #tpu.memory_space<vmem>>, %arg18: memref<3x8x8x16xf32, #tpu.memory_space<vmem>>, %arg19: memref<3x8x8x16xf32, #tpu.memory_space<vmem>>, %arg20: memref<8x8x16xf32, #tpu.memory_space<vmem>>, %arg21: memref<8x8x16xf32, #tpu.memory_space<vmem>>) attributes {dimension_semantics = [#tpu.dimension_semantics<parallel>], iteration_bounds = array<i64: 1>, scalar_prefetch = 0 : i64, scratch_operands = 4 : i64, tpu.core_type = #tpu.core_type<tc>, window_params = [{transform_indices = @transform_0, window_bounds = array<i64: 8, 32>}, {transform_indices = @transform_1, window_bounds = array<i64: 8, 8, 32>}, {transform_indices = @transform_2, window_bounds = array<i64: 8, 1>}, {pipeline_mode = #tpu.pipeline_mode<synchronous>, transform_indices = @transform_3, window_bounds = array<i64: 3, 32, 16>}, {pipeline_mode = #tpu.pipeline_mode<synchronous>, transform_indices = @transform_4, window_bounds = array<i64: 3, 16, 16>}, {pipeline_mode = #tpu.pipeline_mode<synchronous>, transform_indices = @transform_5, window_bounds = array<i64: 3, 1, 16>}, {pipeline_mode = #tpu.pipeline_mode<synchronous>, transform_indices = @transform_6, window_bounds = array<i64: 3, 1, 16>}, {pipeline_mode = #tpu.pipeline_mode<synchronous>, transform_indices = @transform_7, window_bounds = array<i64: 3, 32, 16>}, {pipeline_mode = #tpu.pipeline_mode<synchronous>, transform_indices = @transform_8, window_bounds = array<i64: 3, 16, 16>}, {pipeline_mode = #tpu.pipeline_mode<synchronous>, transform_indices = @transform_9, window_bounds = array<i64: 3, 1, 16>}, {pipeline_mode = #tpu.pipeline_mode<synchronous>, transform_indices = @transform_10, window_bounds = array<i64: 3, 1, 16>}, {pipeline_mode = #tpu.pipeline_mode<synchronous>, transform_indices = @transform_11, window_bounds = array<i64: 32, 32>}, {pipeline_mode = #tpu.pipeline_mode<synchronous>, transform_indices = @transform_12, window_bounds = array<i64: 1, 32>}, {pipeline_mode = #tpu.pipeline_mode<synchronous>, transform_indices = @transform_13, window_bounds = array<i64: 16, 32>}, {pipeline_mode = #tpu.pipeline_mode<synchronous>, transform_indices = @transform_14, window_bounds = array<i64: 16, 32>}, {pipeline_mode = #tpu.pipeline_mode<synchronous>, transform_indices = @transform_15, window_bounds = array<i64: 1, 32>}, {transform_indices = @transform_16, window_bounds = array<i64: 8, 128>}]} {
    %c0 = arith.constant 0 : index
    %c0_0 = arith.constant 0 : index
    %0 = vector.load %arg3[%c0, %c0_0] : memref<8x1xi32, #tpu.memory_space<vmem>>, vector<8x1xi32>
    %c0_1 = arith.constant 0 : index
    %c0_2 = arith.constant 0 : index
    %c0_3 = arith.constant 0 : index
    %1 = vector.load %arg2[%c0_1, %c0_2, %c0_3] : memref<8x8x32xf32, #tpu.memory_space<vmem>>, vector<8x8x32xf32>
    %2 = vector.shape_cast %1 : vector<8x8x32xf32> to vector<64x32xf32>
    %c0_4 = arith.constant 0 : index
    %c0_5 = arith.constant 0 : index
    %c0_6 = arith.constant 0 : index
    %3 = vector.load %arg4[%c0_4, %c0_5, %c0_6] : memref<3x32x16xf32, #tpu.memory_space<vmem>>, vector<1x32x16xf32>
    %4 = vector.shape_cast %3 : vector<1x32x16xf32> to vector<32x16xf32>
    %cst = arith.constant dense<0.000000e+00> : vector<64x16xf32>
    %5 = tpu.matmul %2, %4, %cst {dimension_numbers = #tpu.dot_dimension_numbers<[1], [0], [0], [1], [0, 0, 1, 1], [], []>} : vector<64x32xf32>, vector<32x16xf32>, vector<64x16xf32> -> vector<64x16xf32>
    %c0_7 = arith.constant 0 : index
    %c0_8 = arith.constant 0 : index
    %c0_9 = arith.constant 0 : index
    %6 = vector.load %arg6[%c0_7, %c0_8, %c0_9] : memref<3x1x16xf32, #tpu.memory_space<vmem>>, vector<1x1x16xf32>
    %7 = vector.shape_cast %6 : vector<1x1x16xf32> to vector<1x16xf32>
    %8 = vector.broadcast %7 : vector<1x16xf32> to vector<64x16xf32>
    %9 = arith.addf %5, %8 : vector<64x16xf32>
    %10 = vector.shape_cast %9 : vector<64x16xf32> to vector<8x8x16xf32>
    %c0_10 = arith.constant 0 : index
    %c0_11 = arith.constant 0 : index
    %c0_12 = arith.constant 0 : index
    %c0_13 = arith.constant 0 : index
    %11 = vector.load %arg18[%c0_10, %c0_11, %c0_12, %c0_13] : memref<3x8x8x16xf32, #tpu.memory_space<vmem>>, vector<1x8x8x16xf32>
    %12 = vector.shape_cast %11 : vector<1x8x8x16xf32> to vector<8x8x16xf32>
    %13 = vector.shape_cast %10 : vector<8x8x16xf32> to vector<1x8x8x16xf32>
    tpu.vector_store %arg18[%c0_10, %c0_11, %c0_12, %c0_13], %13 {strides = array<i32>} : memref<3x8x8x16xf32, #tpu.memory_space<vmem>>, vector<1x8x8x16xf32>,
    %c0_14 = arith.constant 0 : index
    %c0_15 = arith.constant 0 : index
    %c0_16 = arith.constant 0 : index
    %14 = vector.load %arg8[%c0_14, %c0_15, %c0_16] : memref<3x32x16xf32, #tpu.memory_space<vmem>>, vector<1x32x16xf32>
    %15 = vector.shape_cast %14 : vector<1x32x16xf32> to vector<32x16xf32>
    %cst_17 = arith.constant dense<0.000000e+00> : vector<64x16xf32>
    %16 = tpu.matmul %2, %15, %cst_17 {dimension_numbers = #tpu.dot_dimension_numbers<[1], [0], [0], [1], [0, 0, 1, 1], [], []>} : vector<64x32xf32>, vector<32x16xf32>, vector<64x16xf32> -> vector<64x16xf32>
    %c0_18 = arith.constant 0 : index
    %c0_19 = arith.constant 0 : index
    %c0_20 = arith.constant 0 : index
    %17 = vector.load %arg10[%c0_18, %c0_19, %c0_20] : memref<3x1x16xf32, #tpu.memory_space<vmem>>, vector<1x1x16xf32>
    %18 = vector.shape_cast %17 : vector<1x1x16xf32> to vector<1x16xf32>
    %19 = vector.broadcast %18 : vector<1x16xf32> to vector<64x16xf32>
    %20 = arith.addf %16, %19 : vector<64x16xf32>
    %21 = vector.shape_cast %20 : vector<64x16xf32> to vector<8x8x16xf32>
    %c0_21 = arith.constant 0 : index
    %c0_22 = arith.constant 0 : index
    %c0_23 = arith.constant 0 : index
    %c0_24 = arith.constant 0 : index
    %22 = vector.load %arg19[%c0_21, %c0_22, %c0_23, %c0_24] : memref<3x8x8x16xf32, #tpu.memory_space<vmem>>, vector<1x8x8x16xf32>
    %23 = vector.shape_cast %22 : vector<1x8x8x16xf32> to vector<8x8x16xf32>
    %24 = vector.shape_cast %21 : vector<8x8x16xf32> to vector<1x8x8x16xf32>
    tpu.vector_store %arg19[%c0_21, %c0_22, %c0_23, %c0_24], %24 {strides = array<i32>} : memref<3x8x8x16xf32, #tpu.memory_space<vmem>>, vector<1x8x8x16xf32>,
    %c1 = arith.constant 1 : index
    %c0_25 = arith.constant 0 : index
    %c0_26 = arith.constant 0 : index
    %25 = vector.load %arg4[%c1, %c0_25, %c0_26] : memref<3x32x16xf32, #tpu.memory_space<vmem>>, vector<1x32x16xf32>
    %26 = vector.shape_cast %25 : vector<1x32x16xf32> to vector<32x16xf32>
    %cst_27 = arith.constant dense<0.000000e+00> : vector<64x16xf32>
    %27 = tpu.matmul %2, %26, %cst_27 {dimension_numbers = #tpu.dot_dimension_numbers<[1], [0], [0], [1], [0, 0, 1, 1], [], []>} : vector<64x32xf32>, vector<32x16xf32>, vector<64x16xf32> -> vector<64x16xf32>
    %c1_28 = arith.constant 1 : index
    %c0_29 = arith.constant 0 : index
    %c0_30 = arith.constant 0 : index
    %28 = vector.load %arg6[%c1_28, %c0_29, %c0_30] : memref<3x1x16xf32, #tpu.memory_space<vmem>>, vector<1x1x16xf32>
    %29 = vector.shape_cast %28 : vector<1x1x16xf32> to vector<1x16xf32>
    %30 = vector.broadcast %29 : vector<1x16xf32> to vector<64x16xf32>
    %31 = arith.addf %27, %30 : vector<64x16xf32>
    %32 = vector.shape_cast %31 : vector<64x16xf32> to vector<8x8x16xf32>
    %c1_31 = arith.constant 1 : index
    %c0_32 = arith.constant 0 : index
    %c0_33 = arith.constant 0 : index
    %c0_34 = arith.constant 0 : index
    %33 = vector.load %arg18[%c1_31, %c0_32, %c0_33, %c0_34] : memref<3x8x8x16xf32, #tpu.memory_space<vmem>>, vector<1x8x8x16xf32>
    %34 = vector.shape_cast %33 : vector<1x8x8x16xf32> to vector<8x8x16xf32>
    %35 = vector.shape_cast %32 : vector<8x8x16xf32> to vector<1x8x8x16xf32>
    tpu.vector_store %arg18[%c1_31, %c0_32, %c0_33, %c0_34], %35 {strides = array<i32>} : memref<3x8x8x16xf32, #tpu.memory_space<vmem>>, vector<1x8x8x16xf32>,
    %c1_35 = arith.constant 1 : index
    %c0_36 = arith.constant 0 : index
    %c0_37 = arith.constant 0 : index
    %36 = vector.load %arg8[%c1_35, %c0_36, %c0_37] : memref<3x32x16xf32, #tpu.memory_space<vmem>>, vector<1x32x16xf32>
    %37 = vector.shape_cast %36 : vector<1x32x16xf32> to vector<32x16xf32>
    %cst_38 = arith.constant dense<0.000000e+00> : vector<64x16xf32>
    %38 = tpu.matmul %2, %37, %cst_38 {dimension_numbers = #tpu.dot_dimension_numbers<[1], [0], [0], [1], [0, 0, 1, 1], [], []>} : vector<64x32xf32>, vector<32x16xf32>, vector<64x16xf32> -> vector<64x16xf32>
    %c1_39 = arith.constant 1 : index
    %c0_40 = arith.constant 0 : index
    %c0_41 = arith.constant 0 : index
    %39 = vector.load %arg10[%c1_39, %c0_40, %c0_41] : memref<3x1x16xf32, #tpu.memory_space<vmem>>, vector<1x1x16xf32>
    %40 = vector.shape_cast %39 : vector<1x1x16xf32> to vector<1x16xf32>
    %41 = vector.broadcast %40 : vector<1x16xf32> to vector<64x16xf32>
    %42 = arith.addf %38, %41 : vector<64x16xf32>
    %43 = vector.shape_cast %42 : vector<64x16xf32> to vector<8x8x16xf32>
    %c1_42 = arith.constant 1 : index
    %c0_43 = arith.constant 0 : index
    %c0_44 = arith.constant 0 : index
    %c0_45 = arith.constant 0 : index
    %44 = vector.load %arg19[%c1_42, %c0_43, %c0_44, %c0_45] : memref<3x8x8x16xf32, #tpu.memory_space<vmem>>, vector<1x8x8x16xf32>
    %45 = vector.shape_cast %44 : vector<1x8x8x16xf32> to vector<8x8x16xf32>
    %46 = vector.shape_cast %43 : vector<8x8x16xf32> to vector<1x8x8x16xf32>
    tpu.vector_store %arg19[%c1_42, %c0_43, %c0_44, %c0_45], %46 {strides = array<i32>} : memref<3x8x8x16xf32, #tpu.memory_space<vmem>>, vector<1x8x8x16xf32>,
    %c2 = arith.constant 2 : index
    %c0_46 = arith.constant 0 : index
    %c0_47 = arith.constant 0 : index
    %47 = vector.load %arg4[%c2, %c0_46, %c0_47] : memref<3x32x16xf32, #tpu.memory_space<vmem>>, vector<1x32x16xf32>
    %48 = vector.shape_cast %47 : vector<1x32x16xf32> to vector<32x16xf32>
    %cst_48 = arith.constant dense<0.000000e+00> : vector<64x16xf32>
    %49 = tpu.matmul %2, %48, %cst_48 {dimension_numbers = #tpu.dot_dimension_numbers<[1], [0], [0], [1], [0, 0, 1, 1], [], []>} : vector<64x32xf32>, vector<32x16xf32>, vector<64x16xf32> -> vector<64x16xf32>
    %c2_49 = arith.constant 2 : index
    %c0_50 = arith.constant 0 : index
    %c0_51 = arith.constant 0 : index
    %50 = vector.load %arg6[%c2_49, %c0_50, %c0_51] : memref<3x1x16xf32, #tpu.memory_space<vmem>>, vector<1x1x16xf32>
    %51 = vector.shape_cast %50 : vector<1x1x16xf32> to vector<1x16xf32>
    %52 = vector.broadcast %51 : vector<1x16xf32> to vector<64x16xf32>
    %53 = arith.addf %49, %52 : vector<64x16xf32>
    %54 = vector.shape_cast %53 : vector<64x16xf32> to vector<8x8x16xf32>
    %c2_52 = arith.constant 2 : index
    %c0_53 = arith.constant 0 : index
    %c0_54 = arith.constant 0 : index
    %c0_55 = arith.constant 0 : index
    %55 = vector.load %arg18[%c2_52, %c0_53, %c0_54, %c0_55] : memref<3x8x8x16xf32, #tpu.memory_space<vmem>>, vector<1x8x8x16xf32>
    %56 = vector.shape_cast %55 : vector<1x8x8x16xf32> to vector<8x8x16xf32>
    %57 = vector.shape_cast %54 : vector<8x8x16xf32> to vector<1x8x8x16xf32>
    tpu.vector_store %arg18[%c2_52, %c0_53, %c0_54, %c0_55], %57 {strides = array<i32>} : memref<3x8x8x16xf32, #tpu.memory_space<vmem>>, vector<1x8x8x16xf32>,
    %c2_56 = arith.constant 2 : index
    %c0_57 = arith.constant 0 : index
    %c0_58 = arith.constant 0 : index
    %58 = vector.load %arg8[%c2_56, %c0_57, %c0_58] : memref<3x32x16xf32, #tpu.memory_space<vmem>>, vector<1x32x16xf32>
    %59 = vector.shape_cast %58 : vector<1x32x16xf32> to vector<32x16xf32>
    %cst_59 = arith.constant dense<0.000000e+00> : vector<64x16xf32>
    %60 = tpu.matmul %2, %59, %cst_59 {dimension_numbers = #tpu.dot_dimension_numbers<[1], [0], [0], [1], [0, 0, 1, 1], [], []>} : vector<64x32xf32>, vector<32x16xf32>, vector<64x16xf32> -> vector<64x16xf32>
    %c2_60 = arith.constant 2 : index
    %c0_61 = arith.constant 0 : index
    %c0_62 = arith.constant 0 : index
    %61 = vector.load %arg10[%c2_60, %c0_61, %c0_62] : memref<3x1x16xf32, #tpu.memory_space<vmem>>, vector<1x1x16xf32>
    %62 = vector.shape_cast %61 : vector<1x1x16xf32> to vector<1x16xf32>
    %63 = vector.broadcast %62 : vector<1x16xf32> to vector<64x16xf32>
    %64 = arith.addf %60, %63 : vector<64x16xf32>
    %65 = vector.shape_cast %64 : vector<64x16xf32> to vector<8x8x16xf32>
    %c2_63 = arith.constant 2 : index
    %c0_64 = arith.constant 0 : index
    %c0_65 = arith.constant 0 : index
    %c0_66 = arith.constant 0 : index
    %66 = vector.load %arg19[%c2_63, %c0_64, %c0_65, %c0_66] : memref<3x8x8x16xf32, #tpu.memory_space<vmem>>, vector<1x8x8x16xf32>
    %67 = vector.shape_cast %66 : vector<1x8x8x16xf32> to vector<8x8x16xf32>
    %68 = vector.shape_cast %65 : vector<8x8x16xf32> to vector<1x8x8x16xf32>
    tpu.vector_store %arg19[%c2_63, %c0_64, %c0_65, %c0_66], %68 {strides = array<i32>} : memref<3x8x8x16xf32, #tpu.memory_space<vmem>>, vector<1x8x8x16xf32>,
    %c0_67 = arith.constant 0 : index
    %c0_68 = arith.constant 0 : index
    %c0_69 = arith.constant 0 : index
    %69 = vector.load %arg5[%c0_67, %c0_68, %c0_69] : memref<3x16x16xf32, #tpu.memory_space<vmem>>, vector<1x16x16xf32>
    %70 = vector.shape_cast %69 : vector<1x16x16xf32> to vector<16x16xf32>
    %c1_70 = arith.constant 1 : index
    %c0_71 = arith.constant 0 : index
    %c0_72 = arith.constant 0 : index
    %71 = vector.load %arg5[%c1_70, %c0_71, %c0_72] : memref<3x16x16xf32, #tpu.memory_space<vmem>>, vector<1x16x16xf32>
    %72 = vector.shape_cast %71 : vector<1x16x16xf32> to vector<16x16xf32>
    %c2_73 = arith.constant 2 : index
    %c0_74 = arith.constant 0 : index
    %c0_75 = arith.constant 0 : index
    %73 = vector.load %arg5[%c2_73, %c0_74, %c0_75] : memref<3x16x16xf32, #tpu.memory_space<vmem>>, vector<1x16x16xf32>
    %74 = vector.shape_cast %73 : vector<1x16x16xf32> to vector<16x16xf32>
    %c0_76 = arith.constant 0 : index
    %c0_77 = arith.constant 0 : index
    %c0_78 = arith.constant 0 : index
    %75 = vector.load %arg7[%c0_76, %c0_77, %c0_78] : memref<3x1x16xf32, #tpu.memory_space<vmem>>, vector<1x1x16xf32>
    %76 = vector.shape_cast %75 : vector<1x1x16xf32> to vector<1x16xf32>
    %c1_79 = arith.constant 1 : index
    %c0_80 = arith.constant 0 : index
    %c0_81 = arith.constant 0 : index
    %77 = vector.load %arg7[%c1_79, %c0_80, %c0_81] : memref<3x1x16xf32, #tpu.memory_space<vmem>>, vector<1x1x16xf32>
    %78 = vector.shape_cast %77 : vector<1x1x16xf32> to vector<1x16xf32>
    %c2_82 = arith.constant 2 : index
    %c0_83 = arith.constant 0 : index
    %c0_84 = arith.constant 0 : index
    %79 = vector.load %arg7[%c2_82, %c0_83, %c0_84] : memref<3x1x16xf32, #tpu.memory_space<vmem>>, vector<1x1x16xf32>
    %80 = vector.shape_cast %79 : vector<1x1x16xf32> to vector<1x16xf32>
    %c0_85 = arith.constant 0 : index
    %c0_86 = arith.constant 0 : index
    %c0_87 = arith.constant 0 : index
    %81 = vector.load %arg9[%c0_85, %c0_86, %c0_87] : memref<3x16x16xf32, #tpu.memory_space<vmem>>, vector<1x16x16xf32>
    %82 = vector.shape_cast %81 : vector<1x16x16xf32> to vector<16x16xf32>
    %c1_88 = arith.constant 1 : index
    %c0_89 = arith.constant 0 : index
    %c0_90 = arith.constant 0 : index
    %83 = vector.load %arg9[%c1_88, %c0_89, %c0_90] : memref<3x16x16xf32, #tpu.memory_space<vmem>>, vector<1x16x16xf32>
    %84 = vector.shape_cast %83 : vector<1x16x16xf32> to vector<16x16xf32>
    %c2_91 = arith.constant 2 : index
    %c0_92 = arith.constant 0 : index
    %c0_93 = arith.constant 0 : index
    %85 = vector.load %arg9[%c2_91, %c0_92, %c0_93] : memref<3x16x16xf32, #tpu.memory_space<vmem>>, vector<1x16x16xf32>
    %86 = vector.shape_cast %85 : vector<1x16x16xf32> to vector<16x16xf32>
    %c0_94 = arith.constant 0 : index
    %c0_95 = arith.constant 0 : index
    %c0_96 = arith.constant 0 : index
    %87 = vector.load %arg11[%c0_94, %c0_95, %c0_96] : memref<3x1x16xf32, #tpu.memory_space<vmem>>, vector<1x1x16xf32>
    %88 = vector.shape_cast %87 : vector<1x1x16xf32> to vector<1x16xf32>
    %c1_97 = arith.constant 1 : index
    %c0_98 = arith.constant 0 : index
    %c0_99 = arith.constant 0 : index
    %89 = vector.load %arg11[%c1_97, %c0_98, %c0_99] : memref<3x1x16xf32, #tpu.memory_space<vmem>>, vector<1x1x16xf32>
    %90 = vector.shape_cast %89 : vector<1x1x16xf32> to vector<1x16xf32>
    %c2_100 = arith.constant 2 : index
    %c0_101 = arith.constant 0 : index
    %c0_102 = arith.constant 0 : index
    %91 = vector.load %arg11[%c2_100, %c0_101, %c0_102] : memref<3x1x16xf32, #tpu.memory_space<vmem>>, vector<1x1x16xf32>
    %92 = vector.shape_cast %91 : vector<1x1x16xf32> to vector<1x16xf32>
    %cst_103 = arith.constant 0.000000e+00 : f32
    %93 = vector.broadcast %cst_103 : f32 to vector<8x16xf32>
    %c0_i32 = arith.constant 0 : i32
    %cst_104 = arith.constant dense<0.000000e+00> : vector<8x16xf32>
    %94 = tpu.matmul %93, %70, %cst_104 {dimension_numbers = #tpu.dot_dimension_numbers<[1], [0], [0], [1], [0, 0, 1, 1], [], []>} : vector<8x16xf32>, vector<16x16xf32>, vector<8x16xf32> -> vector<8x16xf32>
    %95 = vector.broadcast %76 : vector<1x16xf32> to vector<8x16xf32>
    %96 = arith.addf %94, %95 : vector<8x16xf32>
    %cst_105 = arith.constant dense<0.000000e+00> : vector<8x16xf32>
    %97 = tpu.matmul %93, %72, %cst_105 {dimension_numbers = #tpu.dot_dimension_numbers<[1], [0], [0], [1], [0, 0, 1, 1], [], []>} : vector<8x16xf32>, vector<16x16xf32>, vector<8x16xf32> -> vector<8x16xf32>
    %98 = vector.broadcast %78 : vector<1x16xf32> to vector<8x16xf32>
    %99 = arith.addf %97, %98 : vector<8x16xf32>
    %cst_106 = arith.constant dense<0.000000e+00> : vector<8x16xf32>
    %100 = tpu.matmul %93, %74, %cst_106 {dimension_numbers = #tpu.dot_dimension_numbers<[1], [0], [0], [1], [0, 0, 1, 1], [], []>} : vector<8x16xf32>, vector<16x16xf32>, vector<8x16xf32> -> vector<8x16xf32>
    %101 = vector.broadcast %80 : vector<1x16xf32> to vector<8x16xf32>
    %102 = arith.addf %100, %101 : vector<8x16xf32>
    %c0_107 = arith.constant 0 : index
    %103 = arith.index_cast %c0_i32 : i32 to index
    %c0_108 = arith.constant 0 : index
    %c0_109 = arith.constant 0 : index
    %104 = vector.load %arg18[%c0_107, %103, %c0_108, %c0_109] : memref<3x8x8x16xf32, #tpu.memory_space<vmem>>, vector<1x1x8x16xf32>
    %105 = vector.shape_cast %104 : vector<1x1x8x16xf32> to vector<8x16xf32>
    %106 = arith.addf %105, %96 : vector<8x16xf32>
    %107 = arith.negf %106 : vector<8x16xf32>
    %108 = math.exp %107 : vector<8x16xf32>
    %cst_110 = arith.constant 1.000000e+00 : f32
    %109 = vector.broadcast %cst_110 : f32 to vector<8x16xf32>
    %110 = arith.addf %109, %108 : vector<8x16xf32>
    %111 = arith.divf %109, %110 : vector<8x16xf32>
    %c1_111 = arith.constant 1 : index
    %112 = arith.index_cast %c0_i32 : i32 to index
    %c0_112 = arith.constant 0 : index
    %c0_113 = arith.constant 0 : index
    %113 = vector.load %arg18[%c1_111, %112, %c0_112, %c0_113] : memref<3x8x8x16xf32, #tpu.memory_space<vmem>>, vector<1x1x8x16xf32>
    %114 = vector.shape_cast %113 : vector<1x1x8x16xf32> to vector<8x16xf32>
    %115 = arith.addf %114, %99 : vector<8x16xf32>
    %116 = arith.negf %115 : vector<8x16xf32>
    %117 = math.exp %116 : vector<8x16xf32>
    %cst_114 = arith.constant 1.000000e+00 : f32
    %118 = vector.broadcast %cst_114 : f32 to vector<8x16xf32>
    %119 = arith.addf %118, %117 : vector<8x16xf32>
    %120 = arith.divf %118, %119 : vector<8x16xf32>
    %c2_115 = arith.constant 2 : index
    %121 = arith.index_cast %c0_i32 : i32 to index
    %c0_116 = arith.constant 0 : index
    %c0_117 = arith.constant 0 : index
    %122 = vector.load %arg18[%c2_115, %121, %c0_116, %c0_117] : memref<3x8x8x16xf32, #tpu.memory_space<vmem>>, vector<1x1x8x16xf32>
    %123 = vector.shape_cast %122 : vector<1x1x8x16xf32> to vector<8x16xf32>
    %124 = arith.mulf %111, %102 : vector<8x16xf32>
    %125 = arith.addf %123, %124 : vector<8x16xf32>
    %126 = math.tanh %125 : vector<8x16xf32>
    %cst_118 = arith.constant 1.000000e+00 : f32
    %127 = vector.broadcast %cst_118 : f32 to vector<8x16xf32>
    %128 = arith.subf %127, %120 : vector<8x16xf32>
    %129 = arith.mulf %128, %126 : vector<8x16xf32>
    %130 = arith.mulf %120, %93 : vector<8x16xf32>
    %131 = arith.addf %129, %130 : vector<8x16xf32>
    %132 = vector.broadcast %c0_i32 : i32 to vector<8x1xi32>
    %133 = arith.cmpi slt, %132, %0 : vector<8x1xi32>
    %cst_119 = arith.constant 0.000000e+00 : f32
    %134 = vector.shape_cast %133 : vector<8x1xi1> to vector<8x1xi1>
    %135 = vector.broadcast %134 : vector<8x1xi1> to vector<8x16xi1>
    %136 = vector.broadcast %cst_119 : f32 to vector<8x16xf32>
    %137 = arith.select %135, %131, %136 : vector<8x16xi1>, vector<8x16xf32>
    %138 = arith.index_cast %c0_i32 : i32 to index
    %c0_120 = arith.constant 0 : index
    %c0_121 = arith.constant 0 : index
    %139 = vector.load %arg20[%138, %c0_120, %c0_121] : memref<8x8x16xf32, #tpu.memory_space<vmem>>, vector<1x8x16xf32>
    %140 = vector.shape_cast %139 : vector<1x8x16xf32> to vector<8x16xf32>
    %141 = vector.shape_cast %137 : vector<8x16xf32> to vector<1x8x16xf32>
    tpu.vector_store %arg20[%138, %c0_120, %c0_121], %141 {strides = array<i32>} : memref<8x8x16xf32, #tpu.memory_space<vmem>>, vector<1x8x16xf32>,
    %142 = vector.shape_cast %133 : vector<8x1xi1> to vector<8x1xi1>
    %143 = vector.broadcast %142 : vector<8x1xi1> to vector<8x16xi1>
    %144 = arith.select %143, %131, %93 : vector<8x16xi1>, vector<8x16xf32>
    %c1_i32 = arith.constant 1 : i32
    %cst_122 = arith.constant dense<0.000000e+00> : vector<8x16xf32>
    %145 = tpu.matmul %144, %70, %cst_122 {dimension_numbers = #tpu.dot_dimension_numbers<[1], [0], [0], [1], [0, 0, 1, 1], [], []>} : vector<8x16xf32>, vector<16x16xf32>, vector<8x16xf32> -> vector<8x16xf32>
    %146 = vector.broadcast %76 : vector<1x16xf32> to vector<8x16xf32>
    %147 = arith.addf %145, %146 : vector<8x16xf32>
    %cst_123 = arith.constant dense<0.000000e+00> : vector<8x16xf32>
    %148 = tpu.matmul %144, %72, %cst_123 {dimension_numbers = #tpu.dot_dimension_numbers<[1], [0], [0], [1], [0, 0, 1, 1], [], []>} : vector<8x16xf32>, vector<16x16xf32>, vector<8x16xf32> -> vector<8x16xf32>
    %149 = vector.broadcast %78 : vector<1x16xf32> to vector<8x16xf32>
    %150 = arith.addf %148, %149 : vector<8x16xf32>
    %cst_124 = arith.constant dense<0.000000e+00> : vector<8x16xf32>
    %151 = tpu.matmul %144, %74, %cst_124 {dimension_numbers = #tpu.dot_dimension_numbers<[1], [0], [0], [1], [0, 0, 1, 1], [], []>} : vector<8x16xf32>, vector<16x16xf32>, vector<8x16xf32> -> vector<8x16xf32>
    %152 = vector.broadcast %80 : vector<1x16xf32> to vector<8x16xf32>
    %153 = arith.addf %151, %152 : vector<8x16xf32>
    %c0_125 = arith.constant 0 : index
    %154 = arith.index_cast %c1_i32 : i32 to index
    %c0_126 = arith.constant 0 : index
    %c0_127 = arith.constant 0 : index
    %155 = vector.load %arg18[%c0_125, %154, %c0_126, %c0_127] : memref<3x8x8x16xf32, #tpu.memory_space<vmem>>, vector<1x1x8x16xf32>
    %156 = vector.shape_cast %155 : vector<1x1x8x16xf32> to vector<8x16xf32>
    %157 = arith.addf %156, %147 : vector<8x16xf32>
    %158 = arith.negf %157 : vector<8x16xf32>
    %159 = math.exp %158 : vector<8x16xf32>
    %cst_128 = arith.constant 1.000000e+00 : f32
    %160 = vector.broadcast %cst_128 : f32 to vector<8x16xf32>
    %161 = arith.addf %160, %159 : vector<8x16xf32>
    %162 = arith.divf %160, %161 : vector<8x16xf32>
    %c1_129 = arith.constant 1 : index
    %163 = arith.index_cast %c1_i32 : i32 to index
    %c0_130 = arith.constant 0 : index
    %c0_131 = arith.constant 0 : index
    %164 = vector.load %arg18[%c1_129, %163, %c0_130, %c0_131] : memref<3x8x8x16xf32, #tpu.memory_space<vmem>>, vector<1x1x8x16xf32>
    %165 = vector.shape_cast %164 : vector<1x1x8x16xf32> to vector<8x16xf32>
    %166 = arith.addf %165, %150 : vector<8x16xf32>
    %167 = arith.negf %166 : vector<8x16xf32>
    %168 = math.exp %167 : vector<8x16xf32>
    %cst_132 = arith.constant 1.000000e+00 : f32
    %169 = vector.broadcast %cst_132 : f32 to vector<8x16xf32>
    %170 = arith.addf %169, %168 : vector<8x16xf32>
    %171 = arith.divf %169, %170 : vector<8x16xf32>
    %c2_133 = arith.constant 2 : index
    %172 = arith.index_cast %c1_i32 : i32 to index
    %c0_134 = arith.constant 0 : index
    %c0_135 = arith.constant 0 : index
    %173 = vector.load %arg18[%c2_133, %172, %c0_134, %c0_135] : memref<3x8x8x16xf32, #tpu.memory_space<vmem>>, vector<1x1x8x16xf32>
    %174 = vector.shape_cast %173 : vector<1x1x8x16xf32> to vector<8x16xf32>
    %175 = arith.mulf %162, %153 : vector<8x16xf32>
    %176 = arith.addf %174, %175 : vector<8x16xf32>
    %177 = math.tanh %176 : vector<8x16xf32>
    %cst_136 = arith.constant 1.000000e+00 : f32
    %178 = vector.broadcast %cst_136 : f32 to vector<8x16xf32>
    %179 = arith.subf %178, %171 : vector<8x16xf32>
    %180 = arith.mulf %179, %177 : vector<8x16xf32>
    %181 = arith.mulf %171, %144 : vector<8x16xf32>
    %182 = arith.addf %180, %181 : vector<8x16xf32>
    %183 = vector.broadcast %c1_i32 : i32 to vector<8x1xi32>
    %184 = arith.cmpi slt, %183, %0 : vector<8x1xi32>
    %cst_137 = arith.constant 0.000000e+00 : f32
    %185 = vector.shape_cast %184 : vector<8x1xi1> to vector<8x1xi1>
    %186 = vector.broadcast %185 : vector<8x1xi1> to vector<8x16xi1>
    %187 = vector.broadcast %cst_137 : f32 to vector<8x16xf32>
    %188 = arith.select %186, %182, %187 : vector<8x16xi1>, vector<8x16xf32>
    %189 = arith.index_cast %c1_i32 : i32 to index
    %c0_138 = arith.constant 0 : index
    %c0_139 = arith.constant 0 : index
    %190 = vector.load %arg20[%189, %c0_138, %c0_139] : memref<8x8x16xf32, #tpu.memory_space<vmem>>, vector<1x8x16xf32>
    %191 = vector.shape_cast %190 : vector<1x8x16xf32> to vector<8x16xf32>
    %192 = vector.shape_cast %188 : vector<8x16xf32> to vector<1x8x16xf32>
    tpu.vector_store %arg20[%189, %c0_138, %c0_139], %192 {strides = array<i32>} : memref<8x8x16xf32, #tpu.memory_space<vmem>>, vector<1x8x16xf32>,
    %193 = vector.shape_cast %184 : vector<8x1xi1> to vector<8x1xi1>
    %194 = vector.broadcast %193 : vector<8x1xi1> to vector<8x16xi1>
    %195 = arith.select %194, %182, %144 : vector<8x16xi1>, vector<8x16xf32>
    %c2_i32 = arith.constant 2 : i32
    %cst_140 = arith.constant dense<0.000000e+00> : vector<8x16xf32>
    %196 = tpu.matmul %195, %70, %cst_140 {dimension_numbers = #tpu.dot_dimension_numbers<[1], [0], [0], [1], [0, 0, 1, 1], [], []>} : vector<8x16xf32>, vector<16x16xf32>, vector<8x16xf32> -> vector<8x16xf32>
    %197 = vector.broadcast %76 : vector<1x16xf32> to vector<8x16xf32>
    %198 = arith.addf %196, %197 : vector<8x16xf32>
    %cst_141 = arith.constant dense<0.000000e+00> : vector<8x16xf32>
    %199 = tpu.matmul %195, %72, %cst_141 {dimension_numbers = #tpu.dot_dimension_numbers<[1], [0], [0], [1], [0, 0, 1, 1], [], []>} : vector<8x16xf32>, vector<16x16xf32>, vector<8x16xf32> -> vector<8x16xf32>
    %200 = vector.broadcast %78 : vector<1x16xf32> to vector<8x16xf32>
    %201 = arith.addf %199, %200 : vector<8x16xf32>
    %cst_142 = arith.constant dense<0.000000e+00> : vector<8x16xf32>
    %202 = tpu.matmul %195, %74, %cst_142 {dimension_numbers = #tpu.dot_dimension_numbers<[1], [0], [0], [1], [0, 0, 1, 1], [], []>} : vector<8x16xf32>, vector<16x16xf32>, vector<8x16xf32> -> vector<8x16xf32>
    %203 = vector.broadcast %80 : vector<1x16xf32> to vector<8x16xf32>
    %204 = arith.addf %202, %203 : vector<8x16xf32>
    %c0_143 = arith.constant 0 : index
    %205 = arith.index_cast %c2_i32 : i32 to index
    %c0_144 = arith.constant 0 : index
    %c0_145 = arith.constant 0 : index
    %206 = vector.load %arg18[%c0_143, %205, %c0_144, %c0_145] : memref<3x8x8x16xf32, #tpu.memory_space<vmem>>, vector<1x1x8x16xf32>
    %207 = vector.shape_cast %206 : vector<1x1x8x16xf32> to vector<8x16xf32>
    %208 = arith.addf %207, %198 : vector<8x16xf32>
    %209 = arith.negf %208 : vector<8x16xf32>
    %210 = math.exp %209 : vector<8x16xf32>
    %cst_146 = arith.constant 1.000000e+00 : f32
    %211 = vector.broadcast %cst_146 : f32 to vector<8x16xf32>
    %212 = arith.addf %211, %210 : vector<8x16xf32>
    %213 = arith.divf %211, %212 : vector<8x16xf32>
    %c1_147 = arith.constant 1 : index
    %214 = arith.index_cast %c2_i32 : i32 to index
    %c0_148 = arith.constant 0 : index
    %c0_149 = arith.constant 0 : index
    %215 = vector.load %arg18[%c1_147, %214, %c0_148, %c0_149] : memref<3x8x8x16xf32, #tpu.memory_space<vmem>>, vector<1x1x8x16xf32>
    %216 = vector.shape_cast %215 : vector<1x1x8x16xf32> to vector<8x16xf32>
    %217 = arith.addf %216, %201 : vector<8x16xf32>
    %218 = arith.negf %217 : vector<8x16xf32>
    %219 = math.exp %218 : vector<8x16xf32>
    %cst_150 = arith.constant 1.000000e+00 : f32
    %220 = vector.broadcast %cst_150 : f32 to vector<8x16xf32>
    %221 = arith.addf %220, %219 : vector<8x16xf32>
    %222 = arith.divf %220, %221 : vector<8x16xf32>
    %c2_151 = arith.constant 2 : index
    %223 = arith.index_cast %c2_i32 : i32 to index
    %c0_152 = arith.constant 0 : index
    %c0_153 = arith.constant 0 : index
    %224 = vector.load %arg18[%c2_151, %223, %c0_152, %c0_153] : memref<3x8x8x16xf32, #tpu.memory_space<vmem>>, vector<1x1x8x16xf32>
    %225 = vector.shape_cast %224 : vector<1x1x8x16xf32> to vector<8x16xf32>
    %226 = arith.mulf %213, %204 : vector<8x16xf32>
    %227 = arith.addf %225, %226 : vector<8x16xf32>
    %228 = math.tanh %227 : vector<8x16xf32>
    %cst_154 = arith.constant 1.000000e+00 : f32
    %229 = vector.broadcast %cst_154 : f32 to vector<8x16xf32>
    %230 = arith.subf %229, %222 : vector<8x16xf32>
    %231 = arith.mulf %230, %228 : vector<8x16xf32>
    %232 = arith.mulf %222, %195 : vector<8x16xf32>
    %233 = arith.addf %231, %232 : vector<8x16xf32>
    %234 = vector.broadcast %c2_i32 : i32 to vector<8x1xi32>
    %235 = arith.cmpi slt, %234, %0 : vector<8x1xi32>
    %cst_155 = arith.constant 0.000000e+00 : f32
    %236 = vector.shape_cast %235 : vector<8x1xi1> to vector<8x1xi1>
    %237 = vector.broadcast %236 : vector<8x1xi1> to vector<8x16xi1>
    %238 = vector.broadcast %cst_155 : f32 to vector<8x16xf32>
    %239 = arith.select %237, %233, %238 : vector<8x16xi1>, vector<8x16xf32>
    %240 = arith.index_cast %c2_i32 : i32 to index
    %c0_156 = arith.constant 0 : index
    %c0_157 = arith.constant 0 : index
    %241 = vector.load %arg20[%240, %c0_156, %c0_157] : memref<8x8x16xf32, #tpu.memory_space<vmem>>, vector<1x8x16xf32>
    %242 = vector.shape_cast %241 : vector<1x8x16xf32> to vector<8x16xf32>
    %243 = vector.shape_cast %239 : vector<8x16xf32> to vector<1x8x16xf32>
    tpu.vector_store %arg20[%240, %c0_156, %c0_157], %243 {strides = array<i32>} : memref<8x8x16xf32, #tpu.memory_space<vmem>>, vector<1x8x16xf32>,
    %244 = vector.shape_cast %235 : vector<8x1xi1> to vector<8x1xi1>
    %245 = vector.broadcast %244 : vector<8x1xi1> to vector<8x16xi1>
    %246 = arith.select %245, %233, %195 : vector<8x16xi1>, vector<8x16xf32>
    %c3_i32 = arith.constant 3 : i32
    %cst_158 = arith.constant dense<0.000000e+00> : vector<8x16xf32>
    %247 = tpu.matmul %246, %70, %cst_158 {dimension_numbers = #tpu.dot_dimension_numbers<[1], [0], [0], [1], [0, 0, 1, 1], [], []>} : vector<8x16xf32>, vector<16x16xf32>, vector<8x16xf32> -> vector<8x16xf32>
    %248 = vector.broadcast %76 : vector<1x16xf32> to vector<8x16xf32>
    %249 = arith.addf %247, %248 : vector<8x16xf32>
    %cst_159 = arith.constant dense<0.000000e+00> : vector<8x16xf32>
    %250 = tpu.matmul %246, %72, %cst_159 {dimension_numbers = #tpu.dot_dimension_numbers<[1], [0], [0], [1], [0, 0, 1, 1], [], []>} : vector<8x16xf32>, vector<16x16xf32>, vector<8x16xf32> -> vector<8x16xf32>
    %251 = vector.broadcast %78 : vector<1x16xf32> to vector<8x16xf32>
    %252 = arith.addf %250, %251 : vector<8x16xf32>
    %cst_160 = arith.constant dense<0.000000e+00> : vector<8x16xf32>
    %253 = tpu.matmul %246, %74, %cst_160 {dimension_numbers = #tpu.dot_dimension_numbers<[1], [0], [0], [1], [0, 0, 1, 1], [], []>} : vector<8x16xf32>, vector<16x16xf32>, vector<8x16xf32> -> vector<8x16xf32>
    %254 = vector.broadcast %80 : vector<1x16xf32> to vector<8x16xf32>
    %255 = arith.addf %253, %254 : vector<8x16xf32>
    %c0_161 = arith.constant 0 : index
    %256 = arith.index_cast %c3_i32 : i32 to index
    %c0_162 = arith.constant 0 : index
    %c0_163 = arith.constant 0 : index
    %257 = vector.load %arg18[%c0_161, %256, %c0_162, %c0_163] : memref<3x8x8x16xf32, #tpu.memory_space<vmem>>, vector<1x1x8x16xf32>
    %258 = vector.shape_cast %257 : vector<1x1x8x16xf32> to vector<8x16xf32>
    %259 = arith.addf %258, %249 : vector<8x16xf32>
    %260 = arith.negf %259 : vector<8x16xf32>
    %261 = math.exp %260 : vector<8x16xf32>
    %cst_164 = arith.constant 1.000000e+00 : f32
    %262 = vector.broadcast %cst_164 : f32 to vector<8x16xf32>
    %263 = arith.addf %262, %261 : vector<8x16xf32>
    %264 = arith.divf %262, %263 : vector<8x16xf32>
    %c1_165 = arith.constant 1 : index
    %265 = arith.index_cast %c3_i32 : i32 to index
    %c0_166 = arith.constant 0 : index
    %c0_167 = arith.constant 0 : index
    %266 = vector.load %arg18[%c1_165, %265, %c0_166, %c0_167] : memref<3x8x8x16xf32, #tpu.memory_space<vmem>>, vector<1x1x8x16xf32>
    %267 = vector.shape_cast %266 : vector<1x1x8x16xf32> to vector<8x16xf32>
    %268 = arith.addf %267, %252 : vector<8x16xf32>
    %269 = arith.negf %268 : vector<8x16xf32>
    %270 = math.exp %269 : vector<8x16xf32>
    %cst_168 = arith.constant 1.000000e+00 : f32
    %271 = vector.broadcast %cst_168 : f32 to vector<8x16xf32>
    %272 = arith.addf %271, %270 : vector<8x16xf32>
    %273 = arith.divf %271, %272 : vector<8x16xf32>
    %c2_169 = arith.constant 2 : index
    %274 = arith.index_cast %c3_i32 : i32 to index
    %c0_170 = arith.constant 0 : index
    %c0_171 = arith.constant 0 : index
    %275 = vector.load %arg18[%c2_169, %274, %c0_170, %c0_171] : memref<3x8x8x16xf32, #tpu.memory_space<vmem>>, vector<1x1x8x16xf32>
    %276 = vector.shape_cast %275 : vector<1x1x8x16xf32> to vector<8x16xf32>
    %277 = arith.mulf %264, %255 : vector<8x16xf32>
    %278 = arith.addf %276, %277 : vector<8x16xf32>
    %279 = math.tanh %278 : vector<8x16xf32>
    %cst_172 = arith.constant 1.000000e+00 : f32
    %280 = vector.broadcast %cst_172 : f32 to vector<8x16xf32>
    %281 = arith.subf %280, %273 : vector<8x16xf32>
    %282 = arith.mulf %281, %279 : vector<8x16xf32>
    %283 = arith.mulf %273, %246 : vector<8x16xf32>
    %284 = arith.addf %282, %283 : vector<8x16xf32>
    %285 = vector.broadcast %c3_i32 : i32 to vector<8x1xi32>
    %286 = arith.cmpi slt, %285, %0 : vector<8x1xi32>
    %cst_173 = arith.constant 0.000000e+00 : f32
    %287 = vector.shape_cast %286 : vector<8x1xi1> to vector<8x1xi1>
    %288 = vector.broadcast %287 : vector<8x1xi1> to vector<8x16xi1>
    %289 = vector.broadcast %cst_173 : f32 to vector<8x16xf32>
    %290 = arith.select %288, %284, %289 : vector<8x16xi1>, vector<8x16xf32>
    %291 = arith.index_cast %c3_i32 : i32 to index
    %c0_174 = arith.constant 0 : index
    %c0_175 = arith.constant 0 : index
    %292 = vector.load %arg20[%291, %c0_174, %c0_175] : memref<8x8x16xf32, #tpu.memory_space<vmem>>, vector<1x8x16xf32>
    %293 = vector.shape_cast %292 : vector<1x8x16xf32> to vector<8x16xf32>
    %294 = vector.shape_cast %290 : vector<8x16xf32> to vector<1x8x16xf32>
    tpu.vector_store %arg20[%291, %c0_174, %c0_175], %294 {strides = array<i32>} : memref<8x8x16xf32, #tpu.memory_space<vmem>>, vector<1x8x16xf32>,
    %295 = vector.shape_cast %286 : vector<8x1xi1> to vector<8x1xi1>
    %296 = vector.broadcast %295 : vector<8x1xi1> to vector<8x16xi1>
    %297 = arith.select %296, %284, %246 : vector<8x16xi1>, vector<8x16xf32>
    %c4_i32 = arith.constant 4 : i32
    %cst_176 = arith.constant dense<0.000000e+00> : vector<8x16xf32>
    %298 = tpu.matmul %297, %70, %cst_176 {dimension_numbers = #tpu.dot_dimension_numbers<[1], [0], [0], [1], [0, 0, 1, 1], [], []>} : vector<8x16xf32>, vector<16x16xf32>, vector<8x16xf32> -> vector<8x16xf32>
    %299 = vector.broadcast %76 : vector<1x16xf32> to vector<8x16xf32>
    %300 = arith.addf %298, %299 : vector<8x16xf32>
    %cst_177 = arith.constant dense<0.000000e+00> : vector<8x16xf32>
    %301 = tpu.matmul %297, %72, %cst_177 {dimension_numbers = #tpu.dot_dimension_numbers<[1], [0], [0], [1], [0, 0, 1, 1], [], []>} : vector<8x16xf32>, vector<16x16xf32>, vector<8x16xf32> -> vector<8x16xf32>
    %302 = vector.broadcast %78 : vector<1x16xf32> to vector<8x16xf32>
    %303 = arith.addf %301, %302 : vector<8x16xf32>
    %cst_178 = arith.constant dense<0.000000e+00> : vector<8x16xf32>
    %304 = tpu.matmul %297, %74, %cst_178 {dimension_numbers = #tpu.dot_dimension_numbers<[1], [0], [0], [1], [0, 0, 1, 1], [], []>} : vector<8x16xf32>, vector<16x16xf32>, vector<8x16xf32> -> vector<8x16xf32>
    %305 = vector.broadcast %80 : vector<1x16xf32> to vector<8x16xf32>
    %306 = arith.addf %304, %305 : vector<8x16xf32>
    %c0_179 = arith.constant 0 : index
    %307 = arith.index_cast %c4_i32 : i32 to index
    %c0_180 = arith.constant 0 : index
    %c0_181 = arith.constant 0 : index
    %308 = vector.load %arg18[%c0_179, %307, %c0_180, %c0_181] : memref<3x8x8x16xf32, #tpu.memory_space<vmem>>, vector<1x1x8x16xf32>
    %309 = vector.shape_cast %308 : vector<1x1x8x16xf32> to vector<8x16xf32>
    %310 = arith.addf %309, %300 : vector<8x16xf32>
    %311 = arith.negf %310 : vector<8x16xf32>
    %312 = math.exp %311 : vector<8x16xf32>
    %cst_182 = arith.constant 1.000000e+00 : f32
    %313 = vector.broadcast %cst_182 : f32 to vector<8x16xf32>
    %314 = arith.addf %313, %312 : vector<8x16xf32>
    %315 = arith.divf %313, %314 : vector<8x16xf32>
    %c1_183 = arith.constant 1 : index
    %316 = arith.index_cast %c4_i32 : i32 to index
    %c0_184 = arith.constant 0 : index
    %c0_185 = arith.constant 0 : index
    %317 = vector.load %arg18[%c1_183, %316, %c0_184, %c0_185] : memref<3x8x8x16xf32, #tpu.memory_space<vmem>>, vector<1x1x8x16xf32>
    %318 = vector.shape_cast %317 : vector<1x1x8x16xf32> to vector<8x16xf32>
    %319 = arith.addf %318, %303 : vector<8x16xf32>
    %320 = arith.negf %319 : vector<8x16xf32>
    %321 = math.exp %320 : vector<8x16xf32>
    %cst_186 = arith.constant 1.000000e+00 : f32
    %322 = vector.broadcast %cst_186 : f32 to vector<8x16xf32>
    %323 = arith.addf %322, %321 : vector<8x16xf32>
    %324 = arith.divf %322, %323 : vector<8x16xf32>
    %c2_187 = arith.constant 2 : index
    %325 = arith.index_cast %c4_i32 : i32 to index
    %c0_188 = arith.constant 0 : index
    %c0_189 = arith.constant 0 : index
    %326 = vector.load %arg18[%c2_187, %325, %c0_188, %c0_189] : memref<3x8x8x16xf32, #tpu.memory_space<vmem>>, vector<1x1x8x16xf32>
    %327 = vector.shape_cast %326 : vector<1x1x8x16xf32> to vector<8x16xf32>
    %328 = arith.mulf %315, %306 : vector<8x16xf32>
    %329 = arith.addf %327, %328 : vector<8x16xf32>
    %330 = math.tanh %329 : vector<8x16xf32>
    %cst_190 = arith.constant 1.000000e+00 : f32
    %331 = vector.broadcast %cst_190 : f32 to vector<8x16xf32>
    %332 = arith.subf %331, %324 : vector<8x16xf32>
    %333 = arith.mulf %332, %330 : vector<8x16xf32>
    %334 = arith.mulf %324, %297 : vector<8x16xf32>
    %335 = arith.addf %333, %334 : vector<8x16xf32>
    %336 = vector.broadcast %c4_i32 : i32 to vector<8x1xi32>
    %337 = arith.cmpi slt, %336, %0 : vector<8x1xi32>
    %cst_191 = arith.constant 0.000000e+00 : f32
    %338 = vector.shape_cast %337 : vector<8x1xi1> to vector<8x1xi1>
    %339 = vector.broadcast %338 : vector<8x1xi1> to vector<8x16xi1>
    %340 = vector.broadcast %cst_191 : f32 to vector<8x16xf32>
    %341 = arith.select %339, %335, %340 : vector<8x16xi1>, vector<8x16xf32>
    %342 = arith.index_cast %c4_i32 : i32 to index
    %c0_192 = arith.constant 0 : index
    %c0_193 = arith.constant 0 : index
    %343 = vector.load %arg20[%342, %c0_192, %c0_193] : memref<8x8x16xf32, #tpu.memory_space<vmem>>, vector<1x8x16xf32>
    %344 = vector.shape_cast %343 : vector<1x8x16xf32> to vector<8x16xf32>
    %345 = vector.shape_cast %341 : vector<8x16xf32> to vector<1x8x16xf32>
    tpu.vector_store %arg20[%342, %c0_192, %c0_193], %345 {strides = array<i32>} : memref<8x8x16xf32, #tpu.memory_space<vmem>>, vector<1x8x16xf32>,
    %346 = vector.shape_cast %337 : vector<8x1xi1> to vector<8x1xi1>
    %347 = vector.broadcast %346 : vector<8x1xi1> to vector<8x16xi1>
    %348 = arith.select %347, %335, %297 : vector<8x16xi1>, vector<8x16xf32>
    %c5_i32 = arith.constant 5 : i32
    %cst_194 = arith.constant dense<0.000000e+00> : vector<8x16xf32>
    %349 = tpu.matmul %348, %70, %cst_194 {dimension_numbers = #tpu.dot_dimension_numbers<[1], [0], [0], [1], [0, 0, 1, 1], [], []>} : vector<8x16xf32>, vector<16x16xf32>, vector<8x16xf32> -> vector<8x16xf32>
    %350 = vector.broadcast %76 : vector<1x16xf32> to vector<8x16xf32>
    %351 = arith.addf %349, %350 : vector<8x16xf32>
    %cst_195 = arith.constant dense<0.000000e+00> : vector<8x16xf32>
    %352 = tpu.matmul %348, %72, %cst_195 {dimension_numbers = #tpu.dot_dimension_numbers<[1], [0], [0], [1], [0, 0, 1, 1], [], []>} : vector<8x16xf32>, vector<16x16xf32>, vector<8x16xf32> -> vector<8x16xf32>
    %353 = vector.broadcast %78 : vector<1x16xf32> to vector<8x16xf32>
    %354 = arith.addf %352, %353 : vector<8x16xf32>
    %cst_196 = arith.constant dense<0.000000e+00> : vector<8x16xf32>
    %355 = tpu.matmul %348, %74, %cst_196 {dimension_numbers = #tpu.dot_dimension_numbers<[1], [0], [0], [1], [0, 0, 1, 1], [], []>} : vector<8x16xf32>, vector<16x16xf32>, vector<8x16xf32> -> vector<8x16xf32>
    %356 = vector.broadcast %80 : vector<1x16xf32> to vector<8x16xf32>
    %357 = arith.addf %355, %356 : vector<8x16xf32>
    %c0_197 = arith.constant 0 : index
    %358 = arith.index_cast %c5_i32 : i32 to index
    %c0_198 = arith.constant 0 : index
    %c0_199 = arith.constant 0 : index
    %359 = vector.load %arg18[%c0_197, %358, %c0_198, %c0_199] : memref<3x8x8x16xf32, #tpu.memory_space<vmem>>, vector<1x1x8x16xf32>
    %360 = vector.shape_cast %359 : vector<1x1x8x16xf32> to vector<8x16xf32>
    %361 = arith.addf %360, %351 : vector<8x16xf32>
    %362 = arith.negf %361 : vector<8x16xf32>
    %363 = math.exp %362 : vector<8x16xf32>
    %cst_200 = arith.constant 1.000000e+00 : f32
    %364 = vector.broadcast %cst_200 : f32 to vector<8x16xf32>
    %365 = arith.addf %364, %363 : vector<8x16xf32>
    %366 = arith.divf %364, %365 : vector<8x16xf32>
    %c1_201 = arith.constant 1 : index
    %367 = arith.index_cast %c5_i32 : i32 to index
    %c0_202 = arith.constant 0 : index
    %c0_203 = arith.constant 0 : index
    %368 = vector.load %arg18[%c1_201, %367, %c0_202, %c0_203] : memref<3x8x8x16xf32, #tpu.memory_space<vmem>>, vector<1x1x8x16xf32>
    %369 = vector.shape_cast %368 : vector<1x1x8x16xf32> to vector<8x16xf32>
    %370 = arith.addf %369, %354 : vector<8x16xf32>
    %371 = arith.negf %370 : vector<8x16xf32>
    %372 = math.exp %371 : vector<8x16xf32>
    %cst_204 = arith.constant 1.000000e+00 : f32
    %373 = vector.broadcast %cst_204 : f32 to vector<8x16xf32>
    %374 = arith.addf %373, %372 : vector<8x16xf32>
    %375 = arith.divf %373, %374 : vector<8x16xf32>
    %c2_205 = arith.constant 2 : index
    %376 = arith.index_cast %c5_i32 : i32 to index
    %c0_206 = arith.constant 0 : index
    %c0_207 = arith.constant 0 : index
    %377 = vector.load %arg18[%c2_205, %376, %c0_206, %c0_207] : memref<3x8x8x16xf32, #tpu.memory_space<vmem>>, vector<1x1x8x16xf32>
    %378 = vector.shape_cast %377 : vector<1x1x8x16xf32> to vector<8x16xf32>
    %379 = arith.mulf %366, %357 : vector<8x16xf32>
    %380 = arith.addf %378, %379 : vector<8x16xf32>
    %381 = math.tanh %380 : vector<8x16xf32>
    %cst_208 = arith.constant 1.000000e+00 : f32
    %382 = vector.broadcast %cst_208 : f32 to vector<8x16xf32>
    %383 = arith.subf %382, %375 : vector<8x16xf32>
    %384 = arith.mulf %383, %381 : vector<8x16xf32>
    %385 = arith.mulf %375, %348 : vector<8x16xf32>
    %386 = arith.addf %384, %385 : vector<8x16xf32>
    %387 = vector.broadcast %c5_i32 : i32 to vector<8x1xi32>
    %388 = arith.cmpi slt, %387, %0 : vector<8x1xi32>
    %cst_209 = arith.constant 0.000000e+00 : f32
    %389 = vector.shape_cast %388 : vector<8x1xi1> to vector<8x1xi1>
    %390 = vector.broadcast %389 : vector<8x1xi1> to vector<8x16xi1>
    %391 = vector.broadcast %cst_209 : f32 to vector<8x16xf32>
    %392 = arith.select %390, %386, %391 : vector<8x16xi1>, vector<8x16xf32>
    %393 = arith.index_cast %c5_i32 : i32 to index
    %c0_210 = arith.constant 0 : index
    %c0_211 = arith.constant 0 : index
    %394 = vector.load %arg20[%393, %c0_210, %c0_211] : memref<8x8x16xf32, #tpu.memory_space<vmem>>, vector<1x8x16xf32>
    %395 = vector.shape_cast %394 : vector<1x8x16xf32> to vector<8x16xf32>
    %396 = vector.shape_cast %392 : vector<8x16xf32> to vector<1x8x16xf32>
    tpu.vector_store %arg20[%393, %c0_210, %c0_211], %396 {strides = array<i32>} : memref<8x8x16xf32, #tpu.memory_space<vmem>>, vector<1x8x16xf32>,
    %397 = vector.shape_cast %388 : vector<8x1xi1> to vector<8x1xi1>
    %398 = vector.broadcast %397 : vector<8x1xi1> to vector<8x16xi1>
    %399 = arith.select %398, %386, %348 : vector<8x16xi1>, vector<8x16xf32>
    %c6_i32 = arith.constant 6 : i32
    %cst_212 = arith.constant dense<0.000000e+00> : vector<8x16xf32>
    %400 = tpu.matmul %399, %70, %cst_212 {dimension_numbers = #tpu.dot_dimension_numbers<[1], [0], [0], [1], [0, 0, 1, 1], [], []>} : vector<8x16xf32>, vector<16x16xf32>, vector<8x16xf32> -> vector<8x16xf32>
    %401 = vector.broadcast %76 : vector<1x16xf32> to vector<8x16xf32>
    %402 = arith.addf %400, %401 : vector<8x16xf32>
    %cst_213 = arith.constant dense<0.000000e+00> : vector<8x16xf32>
    %403 = tpu.matmul %399, %72, %cst_213 {dimension_numbers = #tpu.dot_dimension_numbers<[1], [0], [0], [1], [0, 0, 1, 1], [], []>} : vector<8x16xf32>, vector<16x16xf32>, vector<8x16xf32> -> vector<8x16xf32>
    %404 = vector.broadcast %78 : vector<1x16xf32> to vector<8x16xf32>
    %405 = arith.addf %403, %404 : vector<8x16xf32>
    %cst_214 = arith.constant dense<0.000000e+00> : vector<8x16xf32>
    %406 = tpu.matmul %399, %74, %cst_214 {dimension_numbers = #tpu.dot_dimension_numbers<[1], [0], [0], [1], [0, 0, 1, 1], [], []>} : vector<8x16xf32>, vector<16x16xf32>, vector<8x16xf32> -> vector<8x16xf32>
    %407 = vector.broadcast %80 : vector<1x16xf32> to vector<8x16xf32>
    %408 = arith.addf %406, %407 : vector<8x16xf32>
    %c0_215 = arith.constant 0 : index
    %409 = arith.index_cast %c6_i32 : i32 to index
    %c0_216 = arith.constant 0 : index
    %c0_217 = arith.constant 0 : index
    %410 = vector.load %arg18[%c0_215, %409, %c0_216, %c0_217] : memref<3x8x8x16xf32, #tpu.memory_space<vmem>>, vector<1x1x8x16xf32>
    %411 = vector.shape_cast %410 : vector<1x1x8x16xf32> to vector<8x16xf32>
    %412 = arith.addf %411, %402 : vector<8x16xf32>
    %413 = arith.negf %412 : vector<8x16xf32>
    %414 = math.exp %413 : vector<8x16xf32>
    %cst_218 = arith.constant 1.000000e+00 : f32
    %415 = vector.broadcast %cst_218 : f32 to vector<8x16xf32>
    %416 = arith.addf %415, %414 : vector<8x16xf32>
    %417 = arith.divf %415, %416 : vector<8x16xf32>
    %c1_219 = arith.constant 1 : index
    %418 = arith.index_cast %c6_i32 : i32 to index
    %c0_220 = arith.constant 0 : index
    %c0_221 = arith.constant 0 : index
    %419 = vector.load %arg18[%c1_219, %418, %c0_220, %c0_221] : memref<3x8x8x16xf32, #tpu.memory_space<vmem>>, vector<1x1x8x16xf32>
    %420 = vector.shape_cast %419 : vector<1x1x8x16xf32> to vector<8x16xf32>
    %421 = arith.addf %420, %405 : vector<8x16xf32>
    %422 = arith.negf %421 : vector<8x16xf32>
    %423 = math.exp %422 : vector<8x16xf32>
    %cst_222 = arith.constant 1.000000e+00 : f32
    %424 = vector.broadcast %cst_222 : f32 to vector<8x16xf32>
    %425 = arith.addf %424, %423 : vector<8x16xf32>
    %426 = arith.divf %424, %425 : vector<8x16xf32>
    %c2_223 = arith.constant 2 : index
    %427 = arith.index_cast %c6_i32 : i32 to index
    %c0_224 = arith.constant 0 : index
    %c0_225 = arith.constant 0 : index
    %428 = vector.load %arg18[%c2_223, %427, %c0_224, %c0_225] : memref<3x8x8x16xf32, #tpu.memory_space<vmem>>, vector<1x1x8x16xf32>
    %429 = vector.shape_cast %428 : vector<1x1x8x16xf32> to vector<8x16xf32>
    %430 = arith.mulf %417, %408 : vector<8x16xf32>
    %431 = arith.addf %429, %430 : vector<8x16xf32>
    %432 = math.tanh %431 : vector<8x16xf32>
    %cst_226 = arith.constant 1.000000e+00 : f32
    %433 = vector.broadcast %cst_226 : f32 to vector<8x16xf32>
    %434 = arith.subf %433, %426 : vector<8x16xf32>
    %435 = arith.mulf %434, %432 : vector<8x16xf32>
    %436 = arith.mulf %426, %399 : vector<8x16xf32>
    %437 = arith.addf %435, %436 : vector<8x16xf32>
    %438 = vector.broadcast %c6_i32 : i32 to vector<8x1xi32>
    %439 = arith.cmpi slt, %438, %0 : vector<8x1xi32>
    %cst_227 = arith.constant 0.000000e+00 : f32
    %440 = vector.shape_cast %439 : vector<8x1xi1> to vector<8x1xi1>
    %441 = vector.broadcast %440 : vector<8x1xi1> to vector<8x16xi1>
    %442 = vector.broadcast %cst_227 : f32 to vector<8x16xf32>
    %443 = arith.select %441, %437, %442 : vector<8x16xi1>, vector<8x16xf32>
    %444 = arith.index_cast %c6_i32 : i32 to index
    %c0_228 = arith.constant 0 : index
    %c0_229 = arith.constant 0 : index
    %445 = vector.load %arg20[%444, %c0_228, %c0_229] : memref<8x8x16xf32, #tpu.memory_space<vmem>>, vector<1x8x16xf32>
    %446 = vector.shape_cast %445 : vector<1x8x16xf32> to vector<8x16xf32>
    %447 = vector.shape_cast %443 : vector<8x16xf32> to vector<1x8x16xf32>
    tpu.vector_store %arg20[%444, %c0_228, %c0_229], %447 {strides = array<i32>} : memref<8x8x16xf32, #tpu.memory_space<vmem>>, vector<1x8x16xf32>,
    %448 = vector.shape_cast %439 : vector<8x1xi1> to vector<8x1xi1>
    %449 = vector.broadcast %448 : vector<8x1xi1> to vector<8x16xi1>
    %450 = arith.select %449, %437, %399 : vector<8x16xi1>, vector<8x16xf32>
    %c7_i32 = arith.constant 7 : i32
    %cst_230 = arith.constant dense<0.000000e+00> : vector<8x16xf32>
    %451 = tpu.matmul %450, %70, %cst_230 {dimension_numbers = #tpu.dot_dimension_numbers<[1], [0], [0], [1], [0, 0, 1, 1], [], []>} : vector<8x16xf32>, vector<16x16xf32>, vector<8x16xf32> -> vector<8x16xf32>
    %452 = vector.broadcast %76 : vector<1x16xf32> to vector<8x16xf32>
    %453 = arith.addf %451, %452 : vector<8x16xf32>
    %cst_231 = arith.constant dense<0.000000e+00> : vector<8x16xf32>
    %454 = tpu.matmul %450, %72, %cst_231 {dimension_numbers = #tpu.dot_dimension_numbers<[1], [0], [0], [1], [0, 0, 1, 1], [], []>} : vector<8x16xf32>, vector<16x16xf32>, vector<8x16xf32> -> vector<8x16xf32>
    %455 = vector.broadcast %78 : vector<1x16xf32> to vector<8x16xf32>
    %456 = arith.addf %454, %455 : vector<8x16xf32>
    %cst_232 = arith.constant dense<0.000000e+00> : vector<8x16xf32>
    %457 = tpu.matmul %450, %74, %cst_232 {dimension_numbers = #tpu.dot_dimension_numbers<[1], [0], [0], [1], [0, 0, 1, 1], [], []>} : vector<8x16xf32>, vector<16x16xf32>, vector<8x16xf32> -> vector<8x16xf32>
    %458 = vector.broadcast %80 : vector<1x16xf32> to vector<8x16xf32>
    %459 = arith.addf %457, %458 : vector<8x16xf32>
    %c0_233 = arith.constant 0 : index
    %460 = arith.index_cast %c7_i32 : i32 to index
    %c0_234 = arith.constant 0 : index
    %c0_235 = arith.constant 0 : index
    %461 = vector.load %arg18[%c0_233, %460, %c0_234, %c0_235] : memref<3x8x8x16xf32, #tpu.memory_space<vmem>>, vector<1x1x8x16xf32>
    %462 = vector.shape_cast %461 : vector<1x1x8x16xf32> to vector<8x16xf32>
    %463 = arith.addf %462, %453 : vector<8x16xf32>
    %464 = arith.negf %463 : vector<8x16xf32>
    %465 = math.exp %464 : vector<8x16xf32>
    %cst_236 = arith.constant 1.000000e+00 : f32
    %466 = vector.broadcast %cst_236 : f32 to vector<8x16xf32>
    %467 = arith.addf %466, %465 : vector<8x16xf32>
    %468 = arith.divf %466, %467 : vector<8x16xf32>
    %c1_237 = arith.constant 1 : index
    %469 = arith.index_cast %c7_i32 : i32 to index
    %c0_238 = arith.constant 0 : index
    %c0_239 = arith.constant 0 : index
    %470 = vector.load %arg18[%c1_237, %469, %c0_238, %c0_239] : memref<3x8x8x16xf32, #tpu.memory_space<vmem>>, vector<1x1x8x16xf32>
    %471 = vector.shape_cast %470 : vector<1x1x8x16xf32> to vector<8x16xf32>
    %472 = arith.addf %471, %456 : vector<8x16xf32>
    %473 = arith.negf %472 : vector<8x16xf32>
    %474 = math.exp %473 : vector<8x16xf32>
    %cst_240 = arith.constant 1.000000e+00 : f32
    %475 = vector.broadcast %cst_240 : f32 to vector<8x16xf32>
    %476 = arith.addf %475, %474 : vector<8x16xf32>
    %477 = arith.divf %475, %476 : vector<8x16xf32>
    %c2_241 = arith.constant 2 : index
    %478 = arith.index_cast %c7_i32 : i32 to index
    %c0_242 = arith.constant 0 : index
    %c0_243 = arith.constant 0 : index
    %479 = vector.load %arg18[%c2_241, %478, %c0_242, %c0_243] : memref<3x8x8x16xf32, #tpu.memory_space<vmem>>, vector<1x1x8x16xf32>
    %480 = vector.shape_cast %479 : vector<1x1x8x16xf32> to vector<8x16xf32>
    %481 = arith.mulf %468, %459 : vector<8x16xf32>
    %482 = arith.addf %480, %481 : vector<8x16xf32>
    %483 = math.tanh %482 : vector<8x16xf32>
    %cst_244 = arith.constant 1.000000e+00 : f32
    %484 = vector.broadcast %cst_244 : f32 to vector<8x16xf32>
    %485 = arith.subf %484, %477 : vector<8x16xf32>
    %486 = arith.mulf %485, %483 : vector<8x16xf32>
    %487 = arith.mulf %477, %450 : vector<8x16xf32>
    %488 = arith.addf %486, %487 : vector<8x16xf32>
    %489 = vector.broadcast %c7_i32 : i32 to vector<8x1xi32>
    %490 = arith.cmpi slt, %489, %0 : vector<8x1xi32>
    %cst_245 = arith.constant 0.000000e+00 : f32
    %491 = vector.shape_cast %490 : vector<8x1xi1> to vector<8x1xi1>
    %492 = vector.broadcast %491 : vector<8x1xi1> to vector<8x16xi1>
    %493 = vector.broadcast %cst_245 : f32 to vector<8x16xf32>
    %494 = arith.select %492, %488, %493 : vector<8x16xi1>, vector<8x16xf32>
    %495 = arith.index_cast %c7_i32 : i32 to index
    %c0_246 = arith.constant 0 : index
    %c0_247 = arith.constant 0 : index
    %496 = vector.load %arg20[%495, %c0_246, %c0_247] : memref<8x8x16xf32, #tpu.memory_space<vmem>>, vector<1x8x16xf32>
    %497 = vector.shape_cast %496 : vector<1x8x16xf32> to vector<8x16xf32>
    %498 = vector.shape_cast %494 : vector<8x16xf32> to vector<1x8x16xf32>
    tpu.vector_store %arg20[%495, %c0_246, %c0_247], %498 {strides = array<i32>} : memref<8x8x16xf32, #tpu.memory_space<vmem>>, vector<1x8x16xf32>,
    %499 = vector.shape_cast %490 : vector<8x1xi1> to vector<8x1xi1>
    %500 = vector.broadcast %499 : vector<8x1xi1> to vector<8x16xi1>
    %501 = arith.select %500, %488, %450 : vector<8x16xi1>, vector<8x16xf32>
    %c8_i32 = arith.constant 8 : i32
    %c0_i32_248 = arith.constant 0 : i32
    %c7_i32_249 = arith.constant 7 : i32
    %502 = arith.subi %c7_i32_249, %c0_i32_248 : i32
    %cst_250 = arith.constant dense<0.000000e+00> : vector<8x16xf32>
    %503 = tpu.matmul %93, %82, %cst_250 {dimension_numbers = #tpu.dot_dimension_numbers<[1], [0], [0], [1], [0, 0, 1, 1], [], []>} : vector<8x16xf32>, vector<16x16xf32>, vector<8x16xf32> -> vector<8x16xf32>
    %504 = vector.broadcast %88 : vector<1x16xf32> to vector<8x16xf32>
    %505 = arith.addf %503, %504 : vector<8x16xf32>
    %cst_251 = arith.constant dense<0.000000e+00> : vector<8x16xf32>
    %506 = tpu.matmul %93, %84, %cst_251 {dimension_numbers = #tpu.dot_dimension_numbers<[1], [0], [0], [1], [0, 0, 1, 1], [], []>} : vector<8x16xf32>, vector<16x16xf32>, vector<8x16xf32> -> vector<8x16xf32>
    %507 = vector.broadcast %90 : vector<1x16xf32> to vector<8x16xf32>
    %508 = arith.addf %506, %507 : vector<8x16xf32>
    %cst_252 = arith.constant dense<0.000000e+00> : vector<8x16xf32>
    %509 = tpu.matmul %93, %86, %cst_252 {dimension_numbers = #tpu.dot_dimension_numbers<[1], [0], [0], [1], [0, 0, 1, 1], [], []>} : vector<8x16xf32>, vector<16x16xf32>, vector<8x16xf32> -> vector<8x16xf32>
    %510 = vector.broadcast %92 : vector<1x16xf32> to vector<8x16xf32>
    %511 = arith.addf %509, %510 : vector<8x16xf32>
    %c0_253 = arith.constant 0 : index
    %512 = arith.index_cast %502 : i32 to index
    %c0_254 = arith.constant 0 : index
    %c0_255 = arith.constant 0 : index
    %513 = vector.load %arg19[%c0_253, %512, %c0_254, %c0_255] : memref<3x8x8x16xf32, #tpu.memory_space<vmem>>, vector<1x1x8x16xf32>
    %514 = vector.shape_cast %513 : vector<1x1x8x16xf32> to vector<8x16xf32>
    %515 = arith.addf %514, %505 : vector<8x16xf32>
    %516 = arith.negf %515 : vector<8x16xf32>
    %517 = math.exp %516 : vector<8x16xf32>
    %cst_256 = arith.constant 1.000000e+00 : f32
    %518 = vector.broadcast %cst_256 : f32 to vector<8x16xf32>
    %519 = arith.addf %518, %517 : vector<8x16xf32>
    %520 = arith.divf %518, %519 : vector<8x16xf32>
    %c1_257 = arith.constant 1 : index
    %521 = arith.index_cast %502 : i32 to index
    %c0_258 = arith.constant 0 : index
    %c0_259 = arith.constant 0 : index
    %522 = vector.load %arg19[%c1_257, %521, %c0_258, %c0_259] : memref<3x8x8x16xf32, #tpu.memory_space<vmem>>, vector<1x1x8x16xf32>
    %523 = vector.shape_cast %522 : vector<1x1x8x16xf32> to vector<8x16xf32>
    %524 = arith.addf %523, %508 : vector<8x16xf32>
    %525 = arith.negf %524 : vector<8x16xf32>
    %526 = math.exp %525 : vector<8x16xf32>
    %cst_260 = arith.constant 1.000000e+00 : f32
    %527 = vector.broadcast %cst_260 : f32 to vector<8x16xf32>
    %528 = arith.addf %527, %526 : vector<8x16xf32>
    %529 = arith.divf %527, %528 : vector<8x16xf32>
    %c2_261 = arith.constant 2 : index
    %530 = arith.index_cast %502 : i32 to index
    %c0_262 = arith.constant 0 : index
    %c0_263 = arith.constant 0 : index
    %531 = vector.load %arg19[%c2_261, %530, %c0_262, %c0_263] : memref<3x8x8x16xf32, #tpu.memory_space<vmem>>, vector<1x1x8x16xf32>
    %532 = vector.shape_cast %531 : vector<1x1x8x16xf32> to vector<8x16xf32>
    %533 = arith.mulf %520, %511 : vector<8x16xf32>
    %534 = arith.addf %532, %533 : vector<8x16xf32>
    %535 = math.tanh %534 : vector<8x16xf32>
    %cst_264 = arith.constant 1.000000e+00 : f32
    %536 = vector.broadcast %cst_264 : f32 to vector<8x16xf32>
    %537 = arith.subf %536, %529 : vector<8x16xf32>
    %538 = arith.mulf %537, %535 : vector<8x16xf32>
    %539 = arith.mulf %529, %93 : vector<8x16xf32>
    %540 = arith.addf %538, %539 : vector<8x16xf32>
    %541 = vector.broadcast %502 : i32 to vector<8x1xi32>
    %542 = arith.cmpi slt, %541, %0 : vector<8x1xi32>
    %cst_265 = arith.constant 0.000000e+00 : f32
    %543 = vector.shape_cast %542 : vector<8x1xi1> to vector<8x1xi1>
    %544 = vector.broadcast %543 : vector<8x1xi1> to vector<8x16xi1>
    %545 = vector.broadcast %cst_265 : f32 to vector<8x16xf32>
    %546 = arith.select %544, %540, %545 : vector<8x16xi1>, vector<8x16xf32>
    %547 = arith.index_cast %502 : i32 to index
    %c0_266 = arith.constant 0 : index
    %c0_267 = arith.constant 0 : index
    %548 = vector.load %arg21[%547, %c0_266, %c0_267] : memref<8x8x16xf32, #tpu.memory_space<vmem>>, vector<1x8x16xf32>
    %549 = vector.shape_cast %548 : vector<1x8x16xf32> to vector<8x16xf32>
    %550 = vector.shape_cast %546 : vector<8x16xf32> to vector<1x8x16xf32>
    tpu.vector_store %arg21[%547, %c0_266, %c0_267], %550 {strides = array<i32>} : memref<8x8x16xf32, #tpu.memory_space<vmem>>, vector<1x8x16xf32>,
    %551 = vector.shape_cast %542 : vector<8x1xi1> to vector<8x1xi1>
    %552 = vector.broadcast %551 : vector<8x1xi1> to vector<8x16xi1>
    %553 = arith.select %552, %540, %93 : vector<8x16xi1>, vector<8x16xf32>
    %c1_i32_268 = arith.constant 1 : i32
    %c7_i32_269 = arith.constant 7 : i32
    %554 = arith.subi %c7_i32_269, %c1_i32_268 : i32
    %cst_270 = arith.constant dense<0.000000e+00> : vector<8x16xf32>
    %555 = tpu.matmul %553, %82, %cst_270 {dimension_numbers = #tpu.dot_dimension_numbers<[1], [0], [0], [1], [0, 0, 1, 1], [], []>} : vector<8x16xf32>, vector<16x16xf32>, vector<8x16xf32> -> vector<8x16xf32>
    %556 = vector.broadcast %88 : vector<1x16xf32> to vector<8x16xf32>
    %557 = arith.addf %555, %556 : vector<8x16xf32>
    %cst_271 = arith.constant dense<0.000000e+00> : vector<8x16xf32>
    %558 = tpu.matmul %553, %84, %cst_271 {dimension_numbers = #tpu.dot_dimension_numbers<[1], [0], [0], [1], [0, 0, 1, 1], [], []>} : vector<8x16xf32>, vector<16x16xf32>, vector<8x16xf32> -> vector<8x16xf32>
    %559 = vector.broadcast %90 : vector<1x16xf32> to vector<8x16xf32>
    %560 = arith.addf %558, %559 : vector<8x16xf32>
    %cst_272 = arith.constant dense<0.000000e+00> : vector<8x16xf32>
    %561 = tpu.matmul %553, %86, %cst_272 {dimension_numbers = #tpu.dot_dimension_numbers<[1], [0], [0], [1], [0, 0, 1, 1], [], []>} : vector<8x16xf32>, vector<16x16xf32>, vector<8x16xf32> -> vector<8x16xf32>
    %562 = vector.broadcast %92 : vector<1x16xf32> to vector<8x16xf32>
    %563 = arith.addf %561, %562 : vector<8x16xf32>
    %c0_273 = arith.constant 0 : index
    %564 = arith.index_cast %554 : i32 to index
    %c0_274 = arith.constant 0 : index
    %c0_275 = arith.constant 0 : index
    %565 = vector.load %arg19[%c0_273, %564, %c0_274, %c0_275] : memref<3x8x8x16xf32, #tpu.memory_space<vmem>>, vector<1x1x8x16xf32>
    %566 = vector.shape_cast %565 : vector<1x1x8x16xf32> to vector<8x16xf32>
    %567 = arith.addf %566, %557 : vector<8x16xf32>
    %568 = arith.negf %567 : vector<8x16xf32>
    %569 = math.exp %568 : vector<8x16xf32>
    %cst_276 = arith.constant 1.000000e+00 : f32
    %570 = vector.broadcast %cst_276 : f32 to vector<8x16xf32>
    %571 = arith.addf %570, %569 : vector<8x16xf32>
    %572 = arith.divf %570, %571 : vector<8x16xf32>
    %c1_277 = arith.constant 1 : index
    %573 = arith.index_cast %554 : i32 to index
    %c0_278 = arith.constant 0 : index
    %c0_279 = arith.constant 0 : index
    %574 = vector.load %arg19[%c1_277, %573, %c0_278, %c0_279] : memref<3x8x8x16xf32, #tpu.memory_space<vmem>>, vector<1x1x8x16xf32>
    %575 = vector.shape_cast %574 : vector<1x1x8x16xf32> to vector<8x16xf32>
    %576 = arith.addf %575, %560 : vector<8x16xf32>
    %577 = arith.negf %576 : vector<8x16xf32>
    %578 = math.exp %577 : vector<8x16xf32>
    %cst_280 = arith.constant 1.000000e+00 : f32
    %579 = vector.broadcast %cst_280 : f32 to vector<8x16xf32>
    %580 = arith.addf %579, %578 : vector<8x16xf32>
    %581 = arith.divf %579, %580 : vector<8x16xf32>
    %c2_281 = arith.constant 2 : index
    %582 = arith.index_cast %554 : i32 to index
    %c0_282 = arith.constant 0 : index
    %c0_283 = arith.constant 0 : index
    %583 = vector.load %arg19[%c2_281, %582, %c0_282, %c0_283] : memref<3x8x8x16xf32, #tpu.memory_space<vmem>>, vector<1x1x8x16xf32>
    %584 = vector.shape_cast %583 : vector<1x1x8x16xf32> to vector<8x16xf32>
    %585 = arith.mulf %572, %563 : vector<8x16xf32>
    %586 = arith.addf %584, %585 : vector<8x16xf32>
    %587 = math.tanh %586 : vector<8x16xf32>
    %cst_284 = arith.constant 1.000000e+00 : f32
    %588 = vector.broadcast %cst_284 : f32 to vector<8x16xf32>
    %589 = arith.subf %588, %581 : vector<8x16xf32>
    %590 = arith.mulf %589, %587 : vector<8x16xf32>
    %591 = arith.mulf %581, %553 : vector<8x16xf32>
    %592 = arith.addf %590, %591 : vector<8x16xf32>
    %593 = vector.broadcast %554 : i32 to vector<8x1xi32>
    %594 = arith.cmpi slt, %593, %0 : vector<8x1xi32>
    %cst_285 = arith.constant 0.000000e+00 : f32
    %595 = vector.shape_cast %594 : vector<8x1xi1> to vector<8x1xi1>
    %596 = vector.broadcast %595 : vector<8x1xi1> to vector<8x16xi1>
    %597 = vector.broadcast %cst_285 : f32 to vector<8x16xf32>
    %598 = arith.select %596, %592, %597 : vector<8x16xi1>, vector<8x16xf32>
    %599 = arith.index_cast %554 : i32 to index
    %c0_286 = arith.constant 0 : index
    %c0_287 = arith.constant 0 : index
    %600 = vector.load %arg21[%599, %c0_286, %c0_287] : memref<8x8x16xf32, #tpu.memory_space<vmem>>, vector<1x8x16xf32>
    %601 = vector.shape_cast %600 : vector<1x8x16xf32> to vector<8x16xf32>
    %602 = vector.shape_cast %598 : vector<8x16xf32> to vector<1x8x16xf32>
    tpu.vector_store %arg21[%599, %c0_286, %c0_287], %602 {strides = array<i32>} : memref<8x8x16xf32, #tpu.memory_space<vmem>>, vector<1x8x16xf32>,
    %603 = vector.shape_cast %594 : vector<8x1xi1> to vector<8x1xi1>
    %604 = vector.broadcast %603 : vector<8x1xi1> to vector<8x16xi1>
    %605 = arith.select %604, %592, %553 : vector<8x16xi1>, vector<8x16xf32>
    %c2_i32_288 = arith.constant 2 : i32
    %c7_i32_289 = arith.constant 7 : i32
    %606 = arith.subi %c7_i32_289, %c2_i32_288 : i32
    %cst_290 = arith.constant dense<0.000000e+00> : vector<8x16xf32>
    %607 = tpu.matmul %605, %82, %cst_290 {dimension_numbers = #tpu.dot_dimension_numbers<[1], [0], [0], [1], [0, 0, 1, 1], [], []>} : vector<8x16xf32>, vector<16x16xf32>, vector<8x16xf32> -> vector<8x16xf32>
    %608 = vector.broadcast %88 : vector<1x16xf32> to vector<8x16xf32>
    %609 = arith.addf %607, %608 : vector<8x16xf32>
    %cst_291 = arith.constant dense<0.000000e+00> : vector<8x16xf32>
    %610 = tpu.matmul %605, %84, %cst_291 {dimension_numbers = #tpu.dot_dimension_numbers<[1], [0], [0], [1], [0, 0, 1, 1], [], []>} : vector<8x16xf32>, vector<16x16xf32>, vector<8x16xf32> -> vector<8x16xf32>
    %611 = vector.broadcast %90 : vector<1x16xf32> to vector<8x16xf32>
    %612 = arith.addf %610, %611 : vector<8x16xf32>
    %cst_292 = arith.constant dense<0.000000e+00> : vector<8x16xf32>
    %613 = tpu.matmul %605, %86, %cst_292 {dimension_numbers = #tpu.dot_dimension_numbers<[1], [0], [0], [1], [0, 0, 1, 1], [], []>} : vector<8x16xf32>, vector<16x16xf32>, vector<8x16xf32> -> vector<8x16xf32>
    %614 = vector.broadcast %92 : vector<1x16xf32> to vector<8x16xf32>
    %615 = arith.addf %613, %614 : vector<8x16xf32>
    %c0_293 = arith.constant 0 : index
    %616 = arith.index_cast %606 : i32 to index
    %c0_294 = arith.constant 0 : index
    %c0_295 = arith.constant 0 : index
    %617 = vector.load %arg19[%c0_293, %616, %c0_294, %c0_295] : memref<3x8x8x16xf32, #tpu.memory_space<vmem>>, vector<1x1x8x16xf32>
    %618 = vector.shape_cast %617 : vector<1x1x8x16xf32> to vector<8x16xf32>
    %619 = arith.addf %618, %609 : vector<8x16xf32>
    %620 = arith.negf %619 : vector<8x16xf32>
    %621 = math.exp %620 : vector<8x16xf32>
    %cst_296 = arith.constant 1.000000e+00 : f32
    %622 = vector.broadcast %cst_296 : f32 to vector<8x16xf32>
    %623 = arith.addf %622, %621 : vector<8x16xf32>
    %624 = arith.divf %622, %623 : vector<8x16xf32>
    %c1_297 = arith.constant 1 : index
    %625 = arith.index_cast %606 : i32 to index
    %c0_298 = arith.constant 0 : index
    %c0_299 = arith.constant 0 : index
    %626 = vector.load %arg19[%c1_297, %625, %c0_298, %c0_299] : memref<3x8x8x16xf32, #tpu.memory_space<vmem>>, vector<1x1x8x16xf32>
    %627 = vector.shape_cast %626 : vector<1x1x8x16xf32> to vector<8x16xf32>
    %628 = arith.addf %627, %612 : vector<8x16xf32>
    %629 = arith.negf %628 : vector<8x16xf32>
    %630 = math.exp %629 : vector<8x16xf32>
    %cst_300 = arith.constant 1.000000e+00 : f32
    %631 = vector.broadcast %cst_300 : f32 to vector<8x16xf32>
    %632 = arith.addf %631, %630 : vector<8x16xf32>
    %633 = arith.divf %631, %632 : vector<8x16xf32>
    %c2_301 = arith.constant 2 : index
    %634 = arith.index_cast %606 : i32 to index
    %c0_302 = arith.constant 0 : index
    %c0_303 = arith.constant 0 : index
    %635 = vector.load %arg19[%c2_301, %634, %c0_302, %c0_303] : memref<3x8x8x16xf32, #tpu.memory_space<vmem>>, vector<1x1x8x16xf32>
    %636 = vector.shape_cast %635 : vector<1x1x8x16xf32> to vector<8x16xf32>
    %637 = arith.mulf %624, %615 : vector<8x16xf32>
    %638 = arith.addf %636, %637 : vector<8x16xf32>
    %639 = math.tanh %638 : vector<8x16xf32>
    %cst_304 = arith.constant 1.000000e+00 : f32
    %640 = vector.broadcast %cst_304 : f32 to vector<8x16xf32>
    %641 = arith.subf %640, %633 : vector<8x16xf32>
    %642 = arith.mulf %641, %639 : vector<8x16xf32>
    %643 = arith.mulf %633, %605 : vector<8x16xf32>
    %644 = arith.addf %642, %643 : vector<8x16xf32>
    %645 = vector.broadcast %606 : i32 to vector<8x1xi32>
    %646 = arith.cmpi slt, %645, %0 : vector<8x1xi32>
    %cst_305 = arith.constant 0.000000e+00 : f32
    %647 = vector.shape_cast %646 : vector<8x1xi1> to vector<8x1xi1>
    %648 = vector.broadcast %647 : vector<8x1xi1> to vector<8x16xi1>
    %649 = vector.broadcast %cst_305 : f32 to vector<8x16xf32>
    %650 = arith.select %648, %644, %649 : vector<8x16xi1>, vector<8x16xf32>
    %651 = arith.index_cast %606 : i32 to index
    %c0_306 = arith.constant 0 : index
    %c0_307 = arith.constant 0 : index
    %652 = vector.load %arg21[%651, %c0_306, %c0_307] : memref<8x8x16xf32, #tpu.memory_space<vmem>>, vector<1x8x16xf32>
    %653 = vector.shape_cast %652 : vector<1x8x16xf32> to vector<8x16xf32>
    %654 = vector.shape_cast %650 : vector<8x16xf32> to vector<1x8x16xf32>
    tpu.vector_store %arg21[%651, %c0_306, %c0_307], %654 {strides = array<i32>} : memref<8x8x16xf32, #tpu.memory_space<vmem>>, vector<1x8x16xf32>,
    %655 = vector.shape_cast %646 : vector<8x1xi1> to vector<8x1xi1>
    %656 = vector.broadcast %655 : vector<8x1xi1> to vector<8x16xi1>
    %657 = arith.select %656, %644, %605 : vector<8x16xi1>, vector<8x16xf32>
    %c3_i32_308 = arith.constant 3 : i32
    %c7_i32_309 = arith.constant 7 : i32
    %658 = arith.subi %c7_i32_309, %c3_i32_308 : i32
    %cst_310 = arith.constant dense<0.000000e+00> : vector<8x16xf32>
    %659 = tpu.matmul %657, %82, %cst_310 {dimension_numbers = #tpu.dot_dimension_numbers<[1], [0], [0], [1], [0, 0, 1, 1], [], []>} : vector<8x16xf32>, vector<16x16xf32>, vector<8x16xf32> -> vector<8x16xf32>
    %660 = vector.broadcast %88 : vector<1x16xf32> to vector<8x16xf32>
    %661 = arith.addf %659, %660 : vector<8x16xf32>
    %cst_311 = arith.constant dense<0.000000e+00> : vector<8x16xf32>
    %662 = tpu.matmul %657, %84, %cst_311 {dimension_numbers = #tpu.dot_dimension_numbers<[1], [0], [0], [1], [0, 0, 1, 1], [], []>} : vector<8x16xf32>, vector<16x16xf32>, vector<8x16xf32> -> vector<8x16xf32>
    %663 = vector.broadcast %90 : vector<1x16xf32> to vector<8x16xf32>
    %664 = arith.addf %662, %663 : vector<8x16xf32>
    %cst_312 = arith.constant dense<0.000000e+00> : vector<8x16xf32>
    %665 = tpu.matmul %657, %86, %cst_312 {dimension_numbers = #tpu.dot_dimension_numbers<[1], [0], [0], [1], [0, 0, 1, 1], [], []>} : vector<8x16xf32>, vector<16x16xf32>, vector<8x16xf32> -> vector<8x16xf32>
    %666 = vector.broadcast %92 : vector<1x16xf32> to vector<8x16xf32>
    %667 = arith.addf %665, %666 : vector<8x16xf32>
    %c0_313 = arith.constant 0 : index
    %668 = arith.index_cast %658 : i32 to index
    %c0_314 = arith.constant 0 : index
    %c0_315 = arith.constant 0 : index
    %669 = vector.load %arg19[%c0_313, %668, %c0_314, %c0_315] : memref<3x8x8x16xf32, #tpu.memory_space<vmem>>, vector<1x1x8x16xf32>
    %670 = vector.shape_cast %669 : vector<1x1x8x16xf32> to vector<8x16xf32>
    %671 = arith.addf %670, %661 : vector<8x16xf32>
    %672 = arith.negf %671 : vector<8x16xf32>
    %673 = math.exp %672 : vector<8x16xf32>
    %cst_316 = arith.constant 1.000000e+00 : f32
    %674 = vector.broadcast %cst_316 : f32 to vector<8x16xf32>
    %675 = arith.addf %674, %673 : vector<8x16xf32>
    %676 = arith.divf %674, %675 : vector<8x16xf32>
    %c1_317 = arith.constant 1 : index
    %677 = arith.index_cast %658 : i32 to index
    %c0_318 = arith.constant 0 : index
    %c0_319 = arith.constant 0 : index
    %678 = vector.load %arg19[%c1_317, %677, %c0_318, %c0_319] : memref<3x8x8x16xf32, #tpu.memory_space<vmem>>, vector<1x1x8x16xf32>
    %679 = vector.shape_cast %678 : vector<1x1x8x16xf32> to vector<8x16xf32>
    %680 = arith.addf %679, %664 : vector<8x16xf32>
    %681 = arith.negf %680 : vector<8x16xf32>
    %682 = math.exp %681 : vector<8x16xf32>
    %cst_320 = arith.constant 1.000000e+00 : f32
    %683 = vector.broadcast %cst_320 : f32 to vector<8x16xf32>
    %684 = arith.addf %683, %682 : vector<8x16xf32>
    %685 = arith.divf %683, %684 : vector<8x16xf32>
    %c2_321 = arith.constant 2 : index
    %686 = arith.index_cast %658 : i32 to index
    %c0_322 = arith.constant 0 : index
    %c0_323 = arith.constant 0 : index
    %687 = vector.load %arg19[%c2_321, %686, %c0_322, %c0_323] : memref<3x8x8x16xf32, #tpu.memory_space<vmem>>, vector<1x1x8x16xf32>
    %688 = vector.shape_cast %687 : vector<1x1x8x16xf32> to vector<8x16xf32>
    %689 = arith.mulf %676, %667 : vector<8x16xf32>
    %690 = arith.addf %688, %689 : vector<8x16xf32>
    %691 = math.tanh %690 : vector<8x16xf32>
    %cst_324 = arith.constant 1.000000e+00 : f32
    %692 = vector.broadcast %cst_324 : f32 to vector<8x16xf32>
    %693 = arith.subf %692, %685 : vector<8x16xf32>
    %694 = arith.mulf %693, %691 : vector<8x16xf32>
    %695 = arith.mulf %685, %657 : vector<8x16xf32>
    %696 = arith.addf %694, %695 : vector<8x16xf32>
    %697 = vector.broadcast %658 : i32 to vector<8x1xi32>
    %698 = arith.cmpi slt, %697, %0 : vector<8x1xi32>
    %cst_325 = arith.constant 0.000000e+00 : f32
    %699 = vector.shape_cast %698 : vector<8x1xi1> to vector<8x1xi1>
    %700 = vector.broadcast %699 : vector<8x1xi1> to vector<8x16xi1>
    %701 = vector.broadcast %cst_325 : f32 to vector<8x16xf32>
    %702 = arith.select %700, %696, %701 : vector<8x16xi1>, vector<8x16xf32>
    %703 = arith.index_cast %658 : i32 to index
    %c0_326 = arith.constant 0 : index
    %c0_327 = arith.constant 0 : index
    %704 = vector.load %arg21[%703, %c0_326, %c0_327] : memref<8x8x16xf32, #tpu.memory_space<vmem>>, vector<1x8x16xf32>
    %705 = vector.shape_cast %704 : vector<1x8x16xf32> to vector<8x16xf32>
    %706 = vector.shape_cast %702 : vector<8x16xf32> to vector<1x8x16xf32>
    tpu.vector_store %arg21[%703, %c0_326, %c0_327], %706 {strides = array<i32>} : memref<8x8x16xf32, #tpu.memory_space<vmem>>, vector<1x8x16xf32>,
    %707 = vector.shape_cast %698 : vector<8x1xi1> to vector<8x1xi1>
    %708 = vector.broadcast %707 : vector<8x1xi1> to vector<8x16xi1>
    %709 = arith.select %708, %696, %657 : vector<8x16xi1>, vector<8x16xf32>
    %c4_i32_328 = arith.constant 4 : i32
    %c7_i32_329 = arith.constant 7 : i32
    %710 = arith.subi %c7_i32_329, %c4_i32_328 : i32
    %cst_330 = arith.constant dense<0.000000e+00> : vector<8x16xf32>
    %711 = tpu.matmul %709, %82, %cst_330 {dimension_numbers = #tpu.dot_dimension_numbers<[1], [0], [0], [1], [0, 0, 1, 1], [], []>} : vector<8x16xf32>, vector<16x16xf32>, vector<8x16xf32> -> vector<8x16xf32>
    %712 = vector.broadcast %88 : vector<1x16xf32> to vector<8x16xf32>
    %713 = arith.addf %711, %712 : vector<8x16xf32>
    %cst_331 = arith.constant dense<0.000000e+00> : vector<8x16xf32>
    %714 = tpu.matmul %709, %84, %cst_331 {dimension_numbers = #tpu.dot_dimension_numbers<[1], [0], [0], [1], [0, 0, 1, 1], [], []>} : vector<8x16xf32>, vector<16x16xf32>, vector<8x16xf32> -> vector<8x16xf32>
    %715 = vector.broadcast %90 : vector<1x16xf32> to vector<8x16xf32>
    %716 = arith.addf %714, %715 : vector<8x16xf32>
    %cst_332 = arith.constant dense<0.000000e+00> : vector<8x16xf32>
    %717 = tpu.matmul %709, %86, %cst_332 {dimension_numbers = #tpu.dot_dimension_numbers<[1], [0], [0], [1], [0, 0, 1, 1], [], []>} : vector<8x16xf32>, vector<16x16xf32>, vector<8x16xf32> -> vector<8x16xf32>
    %718 = vector.broadcast %92 : vector<1x16xf32> to vector<8x16xf32>
    %719 = arith.addf %717, %718 : vector<8x16xf32>
    %c0_333 = arith.constant 0 : index
    %720 = arith.index_cast %710 : i32 to index
    %c0_334 = arith.constant 0 : index
    %c0_335 = arith.constant 0 : index
    %721 = vector.load %arg19[%c0_333, %720, %c0_334, %c0_335] : memref<3x8x8x16xf32, #tpu.memory_space<vmem>>, vector<1x1x8x16xf32>
    %722 = vector.shape_cast %721 : vector<1x1x8x16xf32> to vector<8x16xf32>
    %723 = arith.addf %722, %713 : vector<8x16xf32>
    %724 = arith.negf %723 : vector<8x16xf32>
    %725 = math.exp %724 : vector<8x16xf32>
    %cst_336 = arith.constant 1.000000e+00 : f32
    %726 = vector.broadcast %cst_336 : f32 to vector<8x16xf32>
    %727 = arith.addf %726, %725 : vector<8x16xf32>
    %728 = arith.divf %726, %727 : vector<8x16xf32>
    %c1_337 = arith.constant 1 : index
    %729 = arith.index_cast %710 : i32 to index
    %c0_338 = arith.constant 0 : index
    %c0_339 = arith.constant 0 : index
    %730 = vector.load %arg19[%c1_337, %729, %c0_338, %c0_339] : memref<3x8x8x16xf32, #tpu.memory_space<vmem>>, vector<1x1x8x16xf32>
    %731 = vector.shape_cast %730 : vector<1x1x8x16xf32> to vector<8x16xf32>
    %732 = arith.addf %731, %716 : vector<8x16xf32>
    %733 = arith.negf %732 : vector<8x16xf32>
    %734 = math.exp %733 : vector<8x16xf32>
    %cst_340 = arith.constant 1.000000e+00 : f32
    %735 = vector.broadcast %cst_340 : f32 to vector<8x16xf32>
    %736 = arith.addf %735, %734 : vector<8x16xf32>
    %737 = arith.divf %735, %736 : vector<8x16xf32>
    %c2_341 = arith.constant 2 : index
    %738 = arith.index_cast %710 : i32 to index
    %c0_342 = arith.constant 0 : index
    %c0_343 = arith.constant 0 : index
    %739 = vector.load %arg19[%c2_341, %738, %c0_342, %c0_343] : memref<3x8x8x16xf32, #tpu.memory_space<vmem>>, vector<1x1x8x16xf32>
    %740 = vector.shape_cast %739 : vector<1x1x8x16xf32> to vector<8x16xf32>
    %741 = arith.mulf %728, %719 : vector<8x16xf32>
    %742 = arith.addf %740, %741 : vector<8x16xf32>
    %743 = math.tanh %742 : vector<8x16xf32>
    %cst_344 = arith.constant 1.000000e+00 : f32
    %744 = vector.broadcast %cst_344 : f32 to vector<8x16xf32>
    %745 = arith.subf %744, %737 : vector<8x16xf32>
    %746 = arith.mulf %745, %743 : vector<8x16xf32>
    %747 = arith.mulf %737, %709 : vector<8x16xf32>
    %748 = arith.addf %746, %747 : vector<8x16xf32>
    %749 = vector.broadcast %710 : i32 to vector<8x1xi32>
    %750 = arith.cmpi slt, %749, %0 : vector<8x1xi32>
    %cst_345 = arith.constant 0.000000e+00 : f32
    %751 = vector.shape_cast %750 : vector<8x1xi1> to vector<8x1xi1>
    %752 = vector.broadcast %751 : vector<8x1xi1> to vector<8x16xi1>
    %753 = vector.broadcast %cst_345 : f32 to vector<8x16xf32>
    %754 = arith.select %752, %748, %753 : vector<8x16xi1>, vector<8x16xf32>
    %755 = arith.index_cast %710 : i32 to index
    %c0_346 = arith.constant 0 : index
    %c0_347 = arith.constant 0 : index
    %756 = vector.load %arg21[%755, %c0_346, %c0_347] : memref<8x8x16xf32, #tpu.memory_space<vmem>>, vector<1x8x16xf32>
    %757 = vector.shape_cast %756 : vector<1x8x16xf32> to vector<8x16xf32>
    %758 = vector.shape_cast %754 : vector<8x16xf32> to vector<1x8x16xf32>
    tpu.vector_store %arg21[%755, %c0_346, %c0_347], %758 {strides = array<i32>} : memref<8x8x16xf32, #tpu.memory_space<vmem>>, vector<1x8x16xf32>,
    %759 = vector.shape_cast %750 : vector<8x1xi1> to vector<8x1xi1>
    %760 = vector.broadcast %759 : vector<8x1xi1> to vector<8x16xi1>
    %761 = arith.select %760, %748, %709 : vector<8x16xi1>, vector<8x16xf32>
    %c5_i32_348 = arith.constant 5 : i32
    %c7_i32_349 = arith.constant 7 : i32
    %762 = arith.subi %c7_i32_349, %c5_i32_348 : i32
    %cst_350 = arith.constant dense<0.000000e+00> : vector<8x16xf32>
    %763 = tpu.matmul %761, %82, %cst_350 {dimension_numbers = #tpu.dot_dimension_numbers<[1], [0], [0], [1], [0, 0, 1, 1], [], []>} : vector<8x16xf32>, vector<16x16xf32>, vector<8x16xf32> -> vector<8x16xf32>
    %764 = vector.broadcast %88 : vector<1x16xf32> to vector<8x16xf32>
    %765 = arith.addf %763, %764 : vector<8x16xf32>
    %cst_351 = arith.constant dense<0.000000e+00> : vector<8x16xf32>
    %766 = tpu.matmul %761, %84, %cst_351 {dimension_numbers = #tpu.dot_dimension_numbers<[1], [0], [0], [1], [0, 0, 1, 1], [], []>} : vector<8x16xf32>, vector<16x16xf32>, vector<8x16xf32> -> vector<8x16xf32>
    %767 = vector.broadcast %90 : vector<1x16xf32> to vector<8x16xf32>
    %768 = arith.addf %766, %767 : vector<8x16xf32>
    %cst_352 = arith.constant dense<0.000000e+00> : vector<8x16xf32>
    %769 = tpu.matmul %761, %86, %cst_352 {dimension_numbers = #tpu.dot_dimension_numbers<[1], [0], [0], [1], [0, 0, 1, 1], [], []>} : vector<8x16xf32>, vector<16x16xf32>, vector<8x16xf32> -> vector<8x16xf32>
    %770 = vector.broadcast %92 : vector<1x16xf32> to vector<8x16xf32>
    %771 = arith.addf %769, %770 : vector<8x16xf32>
    %c0_353 = arith.constant 0 : index
    %772 = arith.index_cast %762 : i32 to index
    %c0_354 = arith.constant 0 : index
    %c0_355 = arith.constant 0 : index
    %773 = vector.load %arg19[%c0_353, %772, %c0_354, %c0_355] : memref<3x8x8x16xf32, #tpu.memory_space<vmem>>, vector<1x1x8x16xf32>
    %774 = vector.shape_cast %773 : vector<1x1x8x16xf32> to vector<8x16xf32>
    %775 = arith.addf %774, %765 : vector<8x16xf32>
    %776 = arith.negf %775 : vector<8x16xf32>
    %777 = math.exp %776 : vector<8x16xf32>
    %cst_356 = arith.constant 1.000000e+00 : f32
    %778 = vector.broadcast %cst_356 : f32 to vector<8x16xf32>
    %779 = arith.addf %778, %777 : vector<8x16xf32>
    %780 = arith.divf %778, %779 : vector<8x16xf32>
    %c1_357 = arith.constant 1 : index
    %781 = arith.index_cast %762 : i32 to index
    %c0_358 = arith.constant 0 : index
    %c0_359 = arith.constant 0 : index
    %782 = vector.load %arg19[%c1_357, %781, %c0_358, %c0_359] : memref<3x8x8x16xf32, #tpu.memory_space<vmem>>, vector<1x1x8x16xf32>
    %783 = vector.shape_cast %782 : vector<1x1x8x16xf32> to vector<8x16xf32>
    %784 = arith.addf %783, %768 : vector<8x16xf32>
    %785 = arith.negf %784 : vector<8x16xf32>
    %786 = math.exp %785 : vector<8x16xf32>
    %cst_360 = arith.constant 1.000000e+00 : f32
    %787 = vector.broadcast %cst_360 : f32 to vector<8x16xf32>
    %788 = arith.addf %787, %786 : vector<8x16xf32>
    %789 = arith.divf %787, %788 : vector<8x16xf32>
    %c2_361 = arith.constant 2 : index
    %790 = arith.index_cast %762 : i32 to index
    %c0_362 = arith.constant 0 : index
    %c0_363 = arith.constant 0 : index
    %791 = vector.load %arg19[%c2_361, %790, %c0_362, %c0_363] : memref<3x8x8x16xf32, #tpu.memory_space<vmem>>, vector<1x1x8x16xf32>
    %792 = vector.shape_cast %791 : vector<1x1x8x16xf32> to vector<8x16xf32>
    %793 = arith.mulf %780, %771 : vector<8x16xf32>
    %794 = arith.addf %792, %793 : vector<8x16xf32>
    %795 = math.tanh %794 : vector<8x16xf32>
    %cst_364 = arith.constant 1.000000e+00 : f32
    %796 = vector.broadcast %cst_364 : f32 to vector<8x16xf32>
    %797 = arith.subf %796, %789 : vector<8x16xf32>
    %798 = arith.mulf %797, %795 : vector<8x16xf32>
    %799 = arith.mulf %789, %761 : vector<8x16xf32>
    %800 = arith.addf %798, %799 : vector<8x16xf32>
    %801 = vector.broadcast %762 : i32 to vector<8x1xi32>
    %802 = arith.cmpi slt, %801, %0 : vector<8x1xi32>
    %cst_365 = arith.constant 0.000000e+00 : f32
    %803 = vector.shape_cast %802 : vector<8x1xi1> to vector<8x1xi1>
    %804 = vector.broadcast %803 : vector<8x1xi1> to vector<8x16xi1>
    %805 = vector.broadcast %cst_365 : f32 to vector<8x16xf32>
    %806 = arith.select %804, %800, %805 : vector<8x16xi1>, vector<8x16xf32>
    %807 = arith.index_cast %762 : i32 to index
    %c0_366 = arith.constant 0 : index
    %c0_367 = arith.constant 0 : index
    %808 = vector.load %arg21[%807, %c0_366, %c0_367] : memref<8x8x16xf32, #tpu.memory_space<vmem>>, vector<1x8x16xf32>
    %809 = vector.shape_cast %808 : vector<1x8x16xf32> to vector<8x16xf32>
    %810 = vector.shape_cast %806 : vector<8x16xf32> to vector<1x8x16xf32>
    tpu.vector_store %arg21[%807, %c0_366, %c0_367], %810 {strides = array<i32>} : memref<8x8x16xf32, #tpu.memory_space<vmem>>, vector<1x8x16xf32>,
    %811 = vector.shape_cast %802 : vector<8x1xi1> to vector<8x1xi1>
    %812 = vector.broadcast %811 : vector<8x1xi1> to vector<8x16xi1>
    %813 = arith.select %812, %800, %761 : vector<8x16xi1>, vector<8x16xf32>
    %c6_i32_368 = arith.constant 6 : i32
    %c7_i32_369 = arith.constant 7 : i32
    %814 = arith.subi %c7_i32_369, %c6_i32_368 : i32
    %cst_370 = arith.constant dense<0.000000e+00> : vector<8x16xf32>
    %815 = tpu.matmul %813, %82, %cst_370 {dimension_numbers = #tpu.dot_dimension_numbers<[1], [0], [0], [1], [0, 0, 1, 1], [], []>} : vector<8x16xf32>, vector<16x16xf32>, vector<8x16xf32> -> vector<8x16xf32>
    %816 = vector.broadcast %88 : vector<1x16xf32> to vector<8x16xf32>
    %817 = arith.addf %815, %816 : vector<8x16xf32>
    %cst_371 = arith.constant dense<0.000000e+00> : vector<8x16xf32>
    %818 = tpu.matmul %813, %84, %cst_371 {dimension_numbers = #tpu.dot_dimension_numbers<[1], [0], [0], [1], [0, 0, 1, 1], [], []>} : vector<8x16xf32>, vector<16x16xf32>, vector<8x16xf32> -> vector<8x16xf32>
    %819 = vector.broadcast %90 : vector<1x16xf32> to vector<8x16xf32>
    %820 = arith.addf %818, %819 : vector<8x16xf32>
    %cst_372 = arith.constant dense<0.000000e+00> : vector<8x16xf32>
    %821 = tpu.matmul %813, %86, %cst_372 {dimension_numbers = #tpu.dot_dimension_numbers<[1], [0], [0], [1], [0, 0, 1, 1], [], []>} : vector<8x16xf32>, vector<16x16xf32>, vector<8x16xf32> -> vector<8x16xf32>
    %822 = vector.broadcast %92 : vector<1x16xf32> to vector<8x16xf32>
    %823 = arith.addf %821, %822 : vector<8x16xf32>
    %c0_373 = arith.constant 0 : index
    %824 = arith.index_cast %814 : i32 to index
    %c0_374 = arith.constant 0 : index
    %c0_375 = arith.constant 0 : index
    %825 = vector.load %arg19[%c0_373, %824, %c0_374, %c0_375] : memref<3x8x8x16xf32, #tpu.memory_space<vmem>>, vector<1x1x8x16xf32>
    %826 = vector.shape_cast %825 : vector<1x1x8x16xf32> to vector<8x16xf32>
    %827 = arith.addf %826, %817 : vector<8x16xf32>
    %828 = arith.negf %827 : vector<8x16xf32>
    %829 = math.exp %828 : vector<8x16xf32>
    %cst_376 = arith.constant 1.000000e+00 : f32
    %830 = vector.broadcast %cst_376 : f32 to vector<8x16xf32>
    %831 = arith.addf %830, %829 : vector<8x16xf32>
    %832 = arith.divf %830, %831 : vector<8x16xf32>
    %c1_377 = arith.constant 1 : index
    %833 = arith.index_cast %814 : i32 to index
    %c0_378 = arith.constant 0 : index
    %c0_379 = arith.constant 0 : index
    %834 = vector.load %arg19[%c1_377, %833, %c0_378, %c0_379] : memref<3x8x8x16xf32, #tpu.memory_space<vmem>>, vector<1x1x8x16xf32>
    %835 = vector.shape_cast %834 : vector<1x1x8x16xf32> to vector<8x16xf32>
    %836 = arith.addf %835, %820 : vector<8x16xf32>
    %837 = arith.negf %836 : vector<8x16xf32>
    %838 = math.exp %837 : vector<8x16xf32>
    %cst_380 = arith.constant 1.000000e+00 : f32
    %839 = vector.broadcast %cst_380 : f32 to vector<8x16xf32>
    %840 = arith.addf %839, %838 : vector<8x16xf32>
    %841 = arith.divf %839, %840 : vector<8x16xf32>
    %c2_381 = arith.constant 2 : index
    %842 = arith.index_cast %814 : i32 to index
    %c0_382 = arith.constant 0 : index
    %c0_383 = arith.constant 0 : index
    %843 = vector.load %arg19[%c2_381, %842, %c0_382, %c0_383] : memref<3x8x8x16xf32, #tpu.memory_space<vmem>>, vector<1x1x8x16xf32>
    %844 = vector.shape_cast %843 : vector<1x1x8x16xf32> to vector<8x16xf32>
    %845 = arith.mulf %832, %823 : vector<8x16xf32>
    %846 = arith.addf %844, %845 : vector<8x16xf32>
    %847 = math.tanh %846 : vector<8x16xf32>
    %cst_384 = arith.constant 1.000000e+00 : f32
    %848 = vector.broadcast %cst_384 : f32 to vector<8x16xf32>
    %849 = arith.subf %848, %841 : vector<8x16xf32>
    %850 = arith.mulf %849, %847 : vector<8x16xf32>
    %851 = arith.mulf %841, %813 : vector<8x16xf32>
    %852 = arith.addf %850, %851 : vector<8x16xf32>
    %853 = vector.broadcast %814 : i32 to vector<8x1xi32>
    %854 = arith.cmpi slt, %853, %0 : vector<8x1xi32>
    %cst_385 = arith.constant 0.000000e+00 : f32
    %855 = vector.shape_cast %854 : vector<8x1xi1> to vector<8x1xi1>
    %856 = vector.broadcast %855 : vector<8x1xi1> to vector<8x16xi1>
    %857 = vector.broadcast %cst_385 : f32 to vector<8x16xf32>
    %858 = arith.select %856, %852, %857 : vector<8x16xi1>, vector<8x16xf32>
    %859 = arith.index_cast %814 : i32 to index
    %c0_386 = arith.constant 0 : index
    %c0_387 = arith.constant 0 : index
    %860 = vector.load %arg21[%859, %c0_386, %c0_387] : memref<8x8x16xf32, #tpu.memory_space<vmem>>, vector<1x8x16xf32>
    %861 = vector.shape_cast %860 : vector<1x8x16xf32> to vector<8x16xf32>
    %862 = vector.shape_cast %858 : vector<8x16xf32> to vector<1x8x16xf32>
    tpu.vector_store %arg21[%859, %c0_386, %c0_387], %862 {strides = array<i32>} : memref<8x8x16xf32, #tpu.memory_space<vmem>>, vector<1x8x16xf32>,
    %863 = vector.shape_cast %854 : vector<8x1xi1> to vector<8x1xi1>
    %864 = vector.broadcast %863 : vector<8x1xi1> to vector<8x16xi1>
    %865 = arith.select %864, %852, %813 : vector<8x16xi1>, vector<8x16xf32>
    %c7_i32_388 = arith.constant 7 : i32
    %c7_i32_389 = arith.constant 7 : i32
    %866 = arith.subi %c7_i32_389, %c7_i32_388 : i32
    %cst_390 = arith.constant dense<0.000000e+00> : vector<8x16xf32>
    %867 = tpu.matmul %865, %82, %cst_390 {dimension_numbers = #tpu.dot_dimension_numbers<[1], [0], [0], [1], [0, 0, 1, 1], [], []>} : vector<8x16xf32>, vector<16x16xf32>, vector<8x16xf32> -> vector<8x16xf32>
    %868 = vector.broadcast %88 : vector<1x16xf32> to vector<8x16xf32>
    %869 = arith.addf %867, %868 : vector<8x16xf32>
    %cst_391 = arith.constant dense<0.000000e+00> : vector<8x16xf32>
    %870 = tpu.matmul %865, %84, %cst_391 {dimension_numbers = #tpu.dot_dimension_numbers<[1], [0], [0], [1], [0, 0, 1, 1], [], []>} : vector<8x16xf32>, vector<16x16xf32>, vector<8x16xf32> -> vector<8x16xf32>
    %871 = vector.broadcast %90 : vector<1x16xf32> to vector<8x16xf32>
    %872 = arith.addf %870, %871 : vector<8x16xf32>
    %cst_392 = arith.constant dense<0.000000e+00> : vector<8x16xf32>
    %873 = tpu.matmul %865, %86, %cst_392 {dimension_numbers = #tpu.dot_dimension_numbers<[1], [0], [0], [1], [0, 0, 1, 1], [], []>} : vector<8x16xf32>, vector<16x16xf32>, vector<8x16xf32> -> vector<8x16xf32>
    %874 = vector.broadcast %92 : vector<1x16xf32> to vector<8x16xf32>
    %875 = arith.addf %873, %874 : vector<8x16xf32>
    %c0_393 = arith.constant 0 : index
    %876 = arith.index_cast %866 : i32 to index
    %c0_394 = arith.constant 0 : index
    %c0_395 = arith.constant 0 : index
    %877 = vector.load %arg19[%c0_393, %876, %c0_394, %c0_395] : memref<3x8x8x16xf32, #tpu.memory_space<vmem>>, vector<1x1x8x16xf32>
    %878 = vector.shape_cast %877 : vector<1x1x8x16xf32> to vector<8x16xf32>
    %879 = arith.addf %878, %869 : vector<8x16xf32>
    %880 = arith.negf %879 : vector<8x16xf32>
    %881 = math.exp %880 : vector<8x16xf32>
    %cst_396 = arith.constant 1.000000e+00 : f32
    %882 = vector.broadcast %cst_396 : f32 to vector<8x16xf32>
    %883 = arith.addf %882, %881 : vector<8x16xf32>
    %884 = arith.divf %882, %883 : vector<8x16xf32>
    %c1_397 = arith.constant 1 : index
    %885 = arith.index_cast %866 : i32 to index
    %c0_398 = arith.constant 0 : index
    %c0_399 = arith.constant 0 : index
    %886 = vector.load %arg19[%c1_397, %885, %c0_398, %c0_399] : memref<3x8x8x16xf32, #tpu.memory_space<vmem>>, vector<1x1x8x16xf32>
    %887 = vector.shape_cast %886 : vector<1x1x8x16xf32> to vector<8x16xf32>
    %888 = arith.addf %887, %872 : vector<8x16xf32>
    %889 = arith.negf %888 : vector<8x16xf32>
    %890 = math.exp %889 : vector<8x16xf32>
    %cst_400 = arith.constant 1.000000e+00 : f32
    %891 = vector.broadcast %cst_400 : f32 to vector<8x16xf32>
    %892 = arith.addf %891, %890 : vector<8x16xf32>
    %893 = arith.divf %891, %892 : vector<8x16xf32>
    %c2_401 = arith.constant 2 : index
    %894 = arith.index_cast %866 : i32 to index
    %c0_402 = arith.constant 0 : index
    %c0_403 = arith.constant 0 : index
    %895 = vector.load %arg19[%c2_401, %894, %c0_402, %c0_403] : memref<3x8x8x16xf32, #tpu.memory_space<vmem>>, vector<1x1x8x16xf32>
    %896 = vector.shape_cast %895 : vector<1x1x8x16xf32> to vector<8x16xf32>
    %897 = arith.mulf %884, %875 : vector<8x16xf32>
    %898 = arith.addf %896, %897 : vector<8x16xf32>
    %899 = math.tanh %898 : vector<8x16xf32>
    %cst_404 = arith.constant 1.000000e+00 : f32
    %900 = vector.broadcast %cst_404 : f32 to vector<8x16xf32>
    %901 = arith.subf %900, %893 : vector<8x16xf32>
    %902 = arith.mulf %901, %899 : vector<8x16xf32>
    %903 = arith.mulf %893, %865 : vector<8x16xf32>
    %904 = arith.addf %902, %903 : vector<8x16xf32>
    %905 = vector.broadcast %866 : i32 to vector<8x1xi32>
    %906 = arith.cmpi slt, %905, %0 : vector<8x1xi32>
    %cst_405 = arith.constant 0.000000e+00 : f32
    %907 = vector.shape_cast %906 : vector<8x1xi1> to vector<8x1xi1>
    %908 = vector.broadcast %907 : vector<8x1xi1> to vector<8x16xi1>
    %909 = vector.broadcast %cst_405 : f32 to vector<8x16xf32>
    %910 = arith.select %908, %904, %909 : vector<8x16xi1>, vector<8x16xf32>
    %911 = arith.index_cast %866 : i32 to index
    %c0_406 = arith.constant 0 : index
    %c0_407 = arith.constant 0 : index
    %912 = vector.load %arg21[%911, %c0_406, %c0_407] : memref<8x8x16xf32, #tpu.memory_space<vmem>>, vector<1x8x16xf32>
    %913 = vector.shape_cast %912 : vector<1x8x16xf32> to vector<8x16xf32>
    %914 = vector.shape_cast %910 : vector<8x16xf32> to vector<1x8x16xf32>
    tpu.vector_store %arg21[%911, %c0_406, %c0_407], %914 {strides = array<i32>} : memref<8x8x16xf32, #tpu.memory_space<vmem>>, vector<1x8x16xf32>,
    %915 = vector.shape_cast %906 : vector<8x1xi1> to vector<8x1xi1>
    %916 = vector.broadcast %915 : vector<8x1xi1> to vector<8x16xi1>
    %917 = arith.select %916, %904, %865 : vector<8x16xi1>, vector<8x16xf32>
    %c8_i32_408 = arith.constant 8 : i32
    %c0_409 = arith.constant 0 : index
    %c0_410 = arith.constant 0 : index
    %918 = vector.load %arg1[%c0_409, %c0_410] : memref<8x32xf32, #tpu.memory_space<vmem>>, vector<8x32xf32>
    %c0_411 = arith.constant 0 : index
    %c0_412 = arith.constant 0 : index
    %919 = vector.load %arg12[%c0_411, %c0_412] : memref<32x32xf32, #tpu.memory_space<vmem>>, vector<32x32xf32>
    %cst_413 = arith.constant dense<0.000000e+00> : vector<8x32xf32>
    %920 = tpu.matmul %918, %919, %cst_413 {dimension_numbers = #tpu.dot_dimension_numbers<[1], [0], [0], [1], [0, 0, 1, 1], [], []>} : vector<8x32xf32>, vector<32x32xf32>, vector<8x32xf32> -> vector<8x32xf32>
    %c0_414 = arith.constant 0 : index
    %c0_415 = arith.constant 0 : index
    %921 = vector.load %arg13[%c0_414, %c0_415] : memref<1x32xf32, #tpu.memory_space<vmem>>, vector<1x32xf32>
    %922 = vector.broadcast %921 : vector<1x32xf32> to vector<8x32xf32>
    %923 = arith.addf %920, %922 : vector<8x32xf32>
    %cst_416 = arith.constant 0.000000e+00 : f32
    %924 = vector.broadcast %cst_416 : f32 to vector<8x32xf32>
    %925 = arith.maximumf %923, %924 : vector<8x32xf32>
    %c0_417 = arith.constant 0 : index
    %c0_418 = arith.constant 0 : index
    %c0_419 = arith.constant 0 : index
    %926 = vector.load %arg20[%c0_417, %c0_418, %c0_419] : memref<8x8x16xf32, #tpu.memory_space<vmem>>, vector<8x8x16xf32>
    %c0_420 = arith.constant 0 : index
    %c0_421 = arith.constant 0 : index
    %c0_422 = arith.constant 0 : index
    %927 = vector.load %arg21[%c0_420, %c0_421, %c0_422] : memref<8x8x16xf32, #tpu.memory_space<vmem>>, vector<8x8x16xf32>
    %928 = vector.shape_cast %926 : vector<8x8x16xf32> to vector<64x16xf32>
    %c0_423 = arith.constant 0 : index
    %c0_424 = arith.constant 0 : index
    %929 = vector.load %arg14[%c0_423, %c0_424] : memref<16x32xf32, #tpu.memory_space<vmem>>, vector<16x32xf32>
    %cst_425 = arith.constant dense<0.000000e+00> : vector<64x32xf32>
    %930 = tpu.matmul %928, %929, %cst_425 {dimension_numbers = #tpu.dot_dimension_numbers<[1], [0], [0], [1], [0, 0, 1, 1], [], []>} : vector<64x16xf32>, vector<16x32xf32>, vector<64x32xf32> -> vector<64x32xf32>
    %931 = vector.shape_cast %927 : vector<8x8x16xf32> to vector<64x16xf32>
    %c0_426 = arith.constant 0 : index
    %c0_427 = arith.constant 0 : index
    %932 = vector.load %arg15[%c0_426, %c0_427] : memref<16x32xf32, #tpu.memory_space<vmem>>, vector<16x32xf32>
    %cst_428 = arith.constant dense<0.000000e+00> : vector<64x32xf32>
    %933 = tpu.matmul %931, %932, %cst_428 {dimension_numbers = #tpu.dot_dimension_numbers<[1], [0], [0], [1], [0, 0, 1, 1], [], []>} : vector<64x16xf32>, vector<16x32xf32>, vector<64x32xf32> -> vector<64x32xf32>
    %934 = arith.addf %930, %933 : vector<64x32xf32>
    %c0_429 = arith.constant 0 : index
    %c0_430 = arith.constant 0 : index
    %935 = vector.load %arg16[%c0_429, %c0_430] : memref<1x32xf32, #tpu.memory_space<vmem>>, vector<1x32xf32>
    %936 = vector.broadcast %935 : vector<1x32xf32> to vector<64x32xf32>
    %937 = arith.addf %934, %936 : vector<64x32xf32>
    %cst_431 = arith.constant 0.000000e+00 : f32
    %938 = vector.broadcast %cst_431 : f32 to vector<64x32xf32>
    %939 = arith.maximumf %937, %938 : vector<64x32xf32>
    %940 = vector.extract_strided_slice %939 {offsets = [0, 0], sizes = [8, 32], strides = [1, 1]} : vector<64x32xf32> to vector<8x32xf32>
    %941 = arith.mulf %940, %925 : vector<8x32xf32>
    %cst_432 = arith.constant dense<0.000000e+00> : vector<8xf32>
    %942 = vector.multi_reduction <add>, %941, %cst_432 [1] : vector<8x32xf32> to vector<8xf32>
    %943 = vector.shape_cast %942 : vector<8xf32> to vector<8x1xf32>
    %cst_433 = arith.constant 0.176776692 : f32
    %944 = vector.broadcast %cst_433 : f32 to vector<8x1xf32>
    %945 = arith.mulf %943, %944 : vector<8x1xf32>
    %946 = vector.extract_strided_slice %939 {offsets = [8, 0], sizes = [8, 32], strides = [1, 1]} : vector<64x32xf32> to vector<8x32xf32>
    %947 = arith.mulf %946, %925 : vector<8x32xf32>
    %cst_434 = arith.constant dense<0.000000e+00> : vector<8xf32>
    %948 = vector.multi_reduction <add>, %947, %cst_434 [1] : vector<8x32xf32> to vector<8xf32>
    %949 = vector.shape_cast %948 : vector<8xf32> to vector<8x1xf32>
    %cst_435 = arith.constant 0.176776692 : f32
    %950 = vector.broadcast %cst_435 : f32 to vector<8x1xf32>
    %951 = arith.mulf %949, %950 : vector<8x1xf32>
    %952 = vector.extract_strided_slice %939 {offsets = [16, 0], sizes = [8, 32], strides = [1, 1]} : vector<64x32xf32> to vector<8x32xf32>
    %953 = arith.mulf %952, %925 : vector<8x32xf32>
    %cst_436 = arith.constant dense<0.000000e+00> : vector<8xf32>
    %954 = vector.multi_reduction <add>, %953, %cst_436 [1] : vector<8x32xf32> to vector<8xf32>
    %955 = vector.shape_cast %954 : vector<8xf32> to vector<8x1xf32>
    %cst_437 = arith.constant 0.176776692 : f32
    %956 = vector.broadcast %cst_437 : f32 to vector<8x1xf32>
    %957 = arith.mulf %955, %956 : vector<8x1xf32>
    %958 = vector.extract_strided_slice %939 {offsets = [24, 0], sizes = [8, 32], strides = [1, 1]} : vector<64x32xf32> to vector<8x32xf32>
    %959 = arith.mulf %958, %925 : vector<8x32xf32>
    %cst_438 = arith.constant dense<0.000000e+00> : vector<8xf32>
    %960 = vector.multi_reduction <add>, %959, %cst_438 [1] : vector<8x32xf32> to vector<8xf32>
    %961 = vector.shape_cast %960 : vector<8xf32> to vector<8x1xf32>
    %cst_439 = arith.constant 0.176776692 : f32
    %962 = vector.broadcast %cst_439 : f32 to vector<8x1xf32>
    %963 = arith.mulf %961, %962 : vector<8x1xf32>
    %964 = vector.extract_strided_slice %939 {offsets = [32, 0], sizes = [8, 32], strides = [1, 1]} : vector<64x32xf32> to vector<8x32xf32>
    %965 = arith.mulf %964, %925 : vector<8x32xf32>
    %cst_440 = arith.constant dense<0.000000e+00> : vector<8xf32>
    %966 = vector.multi_reduction <add>, %965, %cst_440 [1] : vector<8x32xf32> to vector<8xf32>
    %967 = vector.shape_cast %966 : vector<8xf32> to vector<8x1xf32>
    %cst_441 = arith.constant 0.176776692 : f32
    %968 = vector.broadcast %cst_441 : f32 to vector<8x1xf32>
    %969 = arith.mulf %967, %968 : vector<8x1xf32>
    %970 = vector.extract_strided_slice %939 {offsets = [40, 0], sizes = [8, 32], strides = [1, 1]} : vector<64x32xf32> to vector<8x32xf32>
    %971 = arith.mulf %970, %925 : vector<8x32xf32>
    %cst_442 = arith.constant dense<0.000000e+00> : vector<8xf32>
    %972 = vector.multi_reduction <add>, %971, %cst_442 [1] : vector<8x32xf32> to vector<8xf32>
    %973 = vector.shape_cast %972 : vector<8xf32> to vector<8x1xf32>
    %cst_443 = arith.constant 0.176776692 : f32
    %974 = vector.broadcast %cst_443 : f32 to vector<8x1xf32>
    %975 = arith.mulf %973, %974 : vector<8x1xf32>
    %976 = vector.extract_strided_slice %939 {offsets = [48, 0], sizes = [8, 32], strides = [1, 1]} : vector<64x32xf32> to vector<8x32xf32>
    %977 = arith.mulf %976, %925 : vector<8x32xf32>
    %cst_444 = arith.constant dense<0.000000e+00> : vector<8xf32>
    %978 = vector.multi_reduction <add>, %977, %cst_444 [1] : vector<8x32xf32> to vector<8xf32>
    %979 = vector.shape_cast %978 : vector<8xf32> to vector<8x1xf32>
    %cst_445 = arith.constant 0.176776692 : f32
    %980 = vector.broadcast %cst_445 : f32 to vector<8x1xf32>
    %981 = arith.mulf %979, %980 : vector<8x1xf32>
    %982 = vector.extract_strided_slice %939 {offsets = [56, 0], sizes = [8, 32], strides = [1, 1]} : vector<64x32xf32> to vector<8x32xf32>
    %983 = arith.mulf %982, %925 : vector<8x32xf32>
    %cst_446 = arith.constant dense<0.000000e+00> : vector<8xf32>
    %984 = vector.multi_reduction <add>, %983, %cst_446 [1] : vector<8x32xf32> to vector<8xf32>
    %985 = vector.shape_cast %984 : vector<8xf32> to vector<8x1xf32>
    %cst_447 = arith.constant 0.176776692 : f32
    %986 = vector.broadcast %cst_447 : f32 to vector<8x1xf32>
    %987 = arith.mulf %985, %986 : vector<8x1xf32>
    %988 = tpu.concatenate %945, %951, %957, %963, %969, %975, %981, %987 in 1 : vector<8x1xf32>, vector<8x1xf32>, vector<8x1xf32>, vector<8x1xf32>, vector<8x1xf32>, vector<8x1xf32>, vector<8x1xf32>, vector<8x1xf32> -> vector<8x8xf32>
    %cst_448 = arith.constant dense<0xFF800000> : vector<8xf32>
    %989 = vector.multi_reduction <maximumf>, %988, %cst_448 [1] : vector<8x8xf32> to vector<8xf32>
    %990 = vector.shape_cast %989 : vector<8xf32> to vector<8x1xf32>
    %991 = vector.broadcast %990 : vector<8x1xf32> to vector<8x8xf32>
    %992 = arith.subf %988, %991 : vector<8x8xf32>
    %993 = math.exp %992 : vector<8x8xf32>
    %cst_449 = arith.constant dense<0.000000e+00> : vector<8xf32>
    %994 = vector.multi_reduction <add>, %993, %cst_449 [1] : vector<8x8xf32> to vector<8xf32>
    %995 = vector.shape_cast %994 : vector<8xf32> to vector<8x1xf32>
    %996 = tpu.reciprocal %995 {approx = true} : vector<8x1xf32> -> vector<8x1xf32>
    %997 = vector.broadcast %996 : vector<8x1xf32> to vector<8x8xf32>
    %998 = arith.mulf %993, %997 : vector<8x8xf32>
    %cst_450 = arith.constant dense<0xFF800000> : vector<8x16xf32>
    %999 = vector.multi_reduction <maximumf>, %926, %cst_450 [0] : vector<8x8x16xf32> to vector<8x16xf32>
    %cst_451 = arith.constant dense<0xFF800000> : vector<8x16xf32>
    %1000 = vector.multi_reduction <maximumf>, %927, %cst_451 [0] : vector<8x8x16xf32> to vector<8x16xf32>
    %cst_452 = arith.constant 0.000000e+00 : f32
    %1001 = vector.broadcast %cst_452 : f32 to vector<8x16xf32>
    %cst_453 = arith.constant 0.000000e+00 : f32
    %1002 = vector.broadcast %cst_453 : f32 to vector<8x16xf32>
    %1003 = vector.extract_strided_slice %998 {offsets = [0, 0], sizes = [8, 1], strides = [1, 1]} : vector<8x8xf32> to vector<8x1xf32>
    %1004 = vector.extract_strided_slice %926 {offsets = [0, 0, 0], sizes = [1, 8, 16], strides = [1, 1, 1]} : vector<8x8x16xf32> to vector<1x8x16xf32>
    %1005 = vector.shape_cast %1004 : vector<1x8x16xf32> to vector<8x16xf32>
    %1006 = vector.broadcast %1003 : vector<8x1xf32> to vector<8x16xf32>
    %1007 = arith.mulf %1006, %1005 : vector<8x16xf32>
    %1008 = arith.addf %1001, %1007 : vector<8x16xf32>
    %1009 = vector.extract_strided_slice %927 {offsets = [0, 0, 0], sizes = [1, 8, 16], strides = [1, 1, 1]} : vector<8x8x16xf32> to vector<1x8x16xf32>
    %1010 = vector.shape_cast %1009 : vector<1x8x16xf32> to vector<8x16xf32>
    %1011 = vector.broadcast %1003 : vector<8x1xf32> to vector<8x16xf32>
    %1012 = arith.mulf %1011, %1010 : vector<8x16xf32>
    %1013 = arith.addf %1002, %1012 : vector<8x16xf32>
    %1014 = vector.extract_strided_slice %998 {offsets = [0, 1], sizes = [8, 1], strides = [1, 1]} : vector<8x8xf32> to vector<8x1xf32>
    %1015 = vector.extract_strided_slice %926 {offsets = [1, 0, 0], sizes = [1, 8, 16], strides = [1, 1, 1]} : vector<8x8x16xf32> to vector<1x8x16xf32>
    %1016 = vector.shape_cast %1015 : vector<1x8x16xf32> to vector<8x16xf32>
    %1017 = vector.broadcast %1014 : vector<8x1xf32> to vector<8x16xf32>
    %1018 = arith.mulf %1017, %1016 : vector<8x16xf32>
    %1019 = arith.addf %1008, %1018 : vector<8x16xf32>
    %1020 = vector.extract_strided_slice %927 {offsets = [1, 0, 0], sizes = [1, 8, 16], strides = [1, 1, 1]} : vector<8x8x16xf32> to vector<1x8x16xf32>
    %1021 = vector.shape_cast %1020 : vector<1x8x16xf32> to vector<8x16xf32>
    %1022 = vector.broadcast %1014 : vector<8x1xf32> to vector<8x16xf32>
    %1023 = arith.mulf %1022, %1021 : vector<8x16xf32>
    %1024 = arith.addf %1013, %1023 : vector<8x16xf32>
    %1025 = vector.extract_strided_slice %998 {offsets = [0, 2], sizes = [8, 1], strides = [1, 1]} : vector<8x8xf32> to vector<8x1xf32>
    %1026 = vector.extract_strided_slice %926 {offsets = [2, 0, 0], sizes = [1, 8, 16], strides = [1, 1, 1]} : vector<8x8x16xf32> to vector<1x8x16xf32>
    %1027 = vector.shape_cast %1026 : vector<1x8x16xf32> to vector<8x16xf32>
    %1028 = vector.broadcast %1025 : vector<8x1xf32> to vector<8x16xf32>
    %1029 = arith.mulf %1028, %1027 : vector<8x16xf32>
    %1030 = arith.addf %1019, %1029 : vector<8x16xf32>
    %1031 = vector.extract_strided_slice %927 {offsets = [2, 0, 0], sizes = [1, 8, 16], strides = [1, 1, 1]} : vector<8x8x16xf32> to vector<1x8x16xf32>
    %1032 = vector.shape_cast %1031 : vector<1x8x16xf32> to vector<8x16xf32>
    %1033 = vector.broadcast %1025 : vector<8x1xf32> to vector<8x16xf32>
    %1034 = arith.mulf %1033, %1032 : vector<8x16xf32>
    %1035 = arith.addf %1024, %1034 : vector<8x16xf32>
    %1036 = vector.extract_strided_slice %998 {offsets = [0, 3], sizes = [8, 1], strides = [1, 1]} : vector<8x8xf32> to vector<8x1xf32>
    %1037 = vector.extract_strided_slice %926 {offsets = [3, 0, 0], sizes = [1, 8, 16], strides = [1, 1, 1]} : vector<8x8x16xf32> to vector<1x8x16xf32>
    %1038 = vector.shape_cast %1037 : vector<1x8x16xf32> to vector<8x16xf32>
    %1039 = vector.broadcast %1036 : vector<8x1xf32> to vector<8x16xf32>
    %1040 = arith.mulf %1039, %1038 : vector<8x16xf32>
    %1041 = arith.addf %1030, %1040 : vector<8x16xf32>
    %1042 = vector.extract_strided_slice %927 {offsets = [3, 0, 0], sizes = [1, 8, 16], strides = [1, 1, 1]} : vector<8x8x16xf32> to vector<1x8x16xf32>
    %1043 = vector.shape_cast %1042 : vector<1x8x16xf32> to vector<8x16xf32>
    %1044 = vector.broadcast %1036 : vector<8x1xf32> to vector<8x16xf32>
    %1045 = arith.mulf %1044, %1043 : vector<8x16xf32>
    %1046 = arith.addf %1035, %1045 : vector<8x16xf32>
    %1047 = vector.extract_strided_slice %998 {offsets = [0, 4], sizes = [8, 1], strides = [1, 1]} : vector<8x8xf32> to vector<8x1xf32>
    %1048 = vector.extract_strided_slice %926 {offsets = [4, 0, 0], sizes = [1, 8, 16], strides = [1, 1, 1]} : vector<8x8x16xf32> to vector<1x8x16xf32>
    %1049 = vector.shape_cast %1048 : vector<1x8x16xf32> to vector<8x16xf32>
    %1050 = vector.broadcast %1047 : vector<8x1xf32> to vector<8x16xf32>
    %1051 = arith.mulf %1050, %1049 : vector<8x16xf32>
    %1052 = arith.addf %1041, %1051 : vector<8x16xf32>
    %1053 = vector.extract_strided_slice %927 {offsets = [4, 0, 0], sizes = [1, 8, 16], strides = [1, 1, 1]} : vector<8x8x16xf32> to vector<1x8x16xf32>
    %1054 = vector.shape_cast %1053 : vector<1x8x16xf32> to vector<8x16xf32>
    %1055 = vector.broadcast %1047 : vector<8x1xf32> to vector<8x16xf32>
    %1056 = arith.mulf %1055, %1054 : vector<8x16xf32>
    %1057 = arith.addf %1046, %1056 : vector<8x16xf32>
    %1058 = vector.extract_strided_slice %998 {offsets = [0, 5], sizes = [8, 1], strides = [1, 1]} : vector<8x8xf32> to vector<8x1xf32>
    %1059 = vector.extract_strided_slice %926 {offsets = [5, 0, 0], sizes = [1, 8, 16], strides = [1, 1, 1]} : vector<8x8x16xf32> to vector<1x8x16xf32>
    %1060 = vector.shape_cast %1059 : vector<1x8x16xf32> to vector<8x16xf32>
    %1061 = vector.broadcast %1058 : vector<8x1xf32> to vector<8x16xf32>
    %1062 = arith.mulf %1061, %1060 : vector<8x16xf32>
    %1063 = arith.addf %1052, %1062 : vector<8x16xf32>
    %1064 = vector.extract_strided_slice %927 {offsets = [5, 0, 0], sizes = [1, 8, 16], strides = [1, 1, 1]} : vector<8x8x16xf32> to vector<1x8x16xf32>
    %1065 = vector.shape_cast %1064 : vector<1x8x16xf32> to vector<8x16xf32>
    %1066 = vector.broadcast %1058 : vector<8x1xf32> to vector<8x16xf32>
    %1067 = arith.mulf %1066, %1065 : vector<8x16xf32>
    %1068 = arith.addf %1057, %1067 : vector<8x16xf32>
    %1069 = vector.extract_strided_slice %998 {offsets = [0, 6], sizes = [8, 1], strides = [1, 1]} : vector<8x8xf32> to vector<8x1xf32>
    %1070 = vector.extract_strided_slice %926 {offsets = [6, 0, 0], sizes = [1, 8, 16], strides = [1, 1, 1]} : vector<8x8x16xf32> to vector<1x8x16xf32>
    %1071 = vector.shape_cast %1070 : vector<1x8x16xf32> to vector<8x16xf32>
    %1072 = vector.broadcast %1069 : vector<8x1xf32> to vector<8x16xf32>
    %1073 = arith.mulf %1072, %1071 : vector<8x16xf32>
    %1074 = arith.addf %1063, %1073 : vector<8x16xf32>
    %1075 = vector.extract_strided_slice %927 {offsets = [6, 0, 0], sizes = [1, 8, 16], strides = [1, 1, 1]} : vector<8x8x16xf32> to vector<1x8x16xf32>
    %1076 = vector.shape_cast %1075 : vector<1x8x16xf32> to vector<8x16xf32>
    %1077 = vector.broadcast %1069 : vector<8x1xf32> to vector<8x16xf32>
    %1078 = arith.mulf %1077, %1076 : vector<8x16xf32>
    %1079 = arith.addf %1068, %1078 : vector<8x16xf32>
    %1080 = vector.extract_strided_slice %998 {offsets = [0, 7], sizes = [8, 1], strides = [1, 1]} : vector<8x8xf32> to vector<8x1xf32>
    %1081 = vector.extract_strided_slice %926 {offsets = [7, 0, 0], sizes = [1, 8, 16], strides = [1, 1, 1]} : vector<8x8x16xf32> to vector<1x8x16xf32>
    %1082 = vector.shape_cast %1081 : vector<1x8x16xf32> to vector<8x16xf32>
    %1083 = vector.broadcast %1080 : vector<8x1xf32> to vector<8x16xf32>
    %1084 = arith.mulf %1083, %1082 : vector<8x16xf32>
    %1085 = arith.addf %1074, %1084 : vector<8x16xf32>
    %1086 = vector.extract_strided_slice %927 {offsets = [7, 0, 0], sizes = [1, 8, 16], strides = [1, 1, 1]} : vector<8x8x16xf32> to vector<1x8x16xf32>
    %1087 = vector.shape_cast %1086 : vector<1x8x16xf32> to vector<8x16xf32>
    %1088 = vector.broadcast %1080 : vector<8x1xf32> to vector<8x16xf32>
    %1089 = arith.mulf %1088, %1087 : vector<8x16xf32>
    %1090 = arith.addf %1079, %1089 : vector<8x16xf32>
    %cst_454 = arith.constant 0.000000e+00 : f32
    %1091 = vector.broadcast %cst_454 : f32 to vector<8x56xf32>
    %1092 = tpu.concatenate %1085, %1090, %999, %1000, %998, %1091 in 1 : vector<8x16xf32>, vector<8x16xf32>, vector<8x16xf32>, vector<8x16xf32>, vector<8x8xf32>, vector<8x56xf32> -> vector<8x128xf32>
    %c0_455 = arith.constant 0 : index
    %c0_456 = arith.constant 0 : index
    %1093 = vector.load %arg17[%c0_455, %c0_456] : memref<8x128xf32, #tpu.memory_space<vmem>>, vector<8x128xf32>
    tpu.vector_store %arg17[%c0_455, %c0_456], %1092 {strides = array<i32>} : memref<8x128xf32, #tpu.memory_space<vmem>>, vector<8x128xf32>,
    return
  }
  func.func @transform_0(%arg0: i32) -> (i32, i32) {
    %c0_i32 = arith.constant 0 : i32
    %c0_i32_0 = arith.constant 0 : i32
    return %arg0, %c0_i32 : i32, i32
  }
  func.func @transform_1(%arg0: i32) -> (i32, i32, i32) {
    %c0_i32 = arith.constant 0 : i32
    %c0_i32_0 = arith.constant 0 : i32
    %c0_i32_1 = arith.constant 0 : i32
    return %c0_i32, %arg0, %c0_i32_0 : i32, i32, i32
  }
  func.func @transform_2(%arg0: i32) -> (i32, i32) {
    %c0_i32 = arith.constant 0 : i32
    %c0_i32_0 = arith.constant 0 : i32
    return %arg0, %c0_i32 : i32, i32
  }
  func.func @transform_3(%arg0: i32) -> (i32, i32, i32) {
    %c0_i32 = arith.constant 0 : i32
    %c0_i32_0 = arith.constant 0 : i32
    %c0_i32_1 = arith.constant 0 : i32
    %c0_i32_2 = arith.constant 0 : i32
    return %c0_i32, %c0_i32_0, %c0_i32_1 : i32, i32, i32
  }
  func.func @transform_4(%arg0: i32) -> (i32, i32, i32) {
    %c0_i32 = arith.constant 0 : i32
    %c0_i32_0 = arith.constant 0 : i32
    %c0_i32_1 = arith.constant 0 : i32
    %c0_i32_2 = arith.constant 0 : i32
    return %c0_i32, %c0_i32_0, %c0_i32_1 : i32, i32, i32
  }
  func.func @transform_5(%arg0: i32) -> (i32, i32, i32) {
    %c0_i32 = arith.constant 0 : i32
    %c0_i32_0 = arith.constant 0 : i32
    %c0_i32_1 = arith.constant 0 : i32
    %c0_i32_2 = arith.constant 0 : i32
    return %c0_i32, %c0_i32_0, %c0_i32_1 : i32, i32, i32
  }
  func.func @transform_6(%arg0: i32) -> (i32, i32, i32) {
    %c0_i32 = arith.constant 0 : i32
    %c0_i32_0 = arith.constant 0 : i32
    %c0_i32_1 = arith.constant 0 : i32
    %c0_i32_2 = arith.constant 0 : i32
    return %c0_i32, %c0_i32_0, %c0_i32_1 : i32, i32, i32
  }
  func.func @transform_7(%arg0: i32) -> (i32, i32, i32) {
    %c0_i32 = arith.constant 0 : i32
    %c0_i32_0 = arith.constant 0 : i32
    %c0_i32_1 = arith.constant 0 : i32
    %c0_i32_2 = arith.constant 0 : i32
    return %c0_i32, %c0_i32_0, %c0_i32_1 : i32, i32, i32
  }
  func.func @transform_8(%arg0: i32) -> (i32, i32, i32) {
    %c0_i32 = arith.constant 0 : i32
    %c0_i32_0 = arith.constant 0 : i32
    %c0_i32_1 = arith.constant 0 : i32
    %c0_i32_2 = arith.constant 0 : i32
    return %c0_i32, %c0_i32_0, %c0_i32_1 : i32, i32, i32
  }
  func.func @transform_9(%arg0: i32) -> (i32, i32, i32) {
    %c0_i32 = arith.constant 0 : i32
    %c0_i32_0 = arith.constant 0 : i32
    %c0_i32_1 = arith.constant 0 : i32
    %c0_i32_2 = arith.constant 0 : i32
    return %c0_i32, %c0_i32_0, %c0_i32_1 : i32, i32, i32
  }
  func.func @transform_10(%arg0: i32) -> (i32, i32, i32) {
    %c0_i32 = arith.constant 0 : i32
    %c0_i32_0 = arith.constant 0 : i32
    %c0_i32_1 = arith.constant 0 : i32
    %c0_i32_2 = arith.constant 0 : i32
    return %c0_i32, %c0_i32_0, %c0_i32_1 : i32, i32, i32
  }
  func.func @transform_11(%arg0: i32) -> (i32, i32) {
    %c0_i32 = arith.constant 0 : i32
    %c0_i32_0 = arith.constant 0 : i32
    %c0_i32_1 = arith.constant 0 : i32
    return %c0_i32, %c0_i32_0 : i32, i32
  }
  func.func @transform_12(%arg0: i32) -> (i32, i32) {
    %c0_i32 = arith.constant 0 : i32
    %c0_i32_0 = arith.constant 0 : i32
    %c0_i32_1 = arith.constant 0 : i32
    return %c0_i32, %c0_i32_0 : i32, i32
  }
  func.func @transform_13(%arg0: i32) -> (i32, i32) {
    %c0_i32 = arith.constant 0 : i32
    %c0_i32_0 = arith.constant 0 : i32
    %c0_i32_1 = arith.constant 0 : i32
    return %c0_i32, %c0_i32_0 : i32, i32
  }
  func.func @transform_14(%arg0: i32) -> (i32, i32) {
    %c0_i32 = arith.constant 0 : i32
    %c0_i32_0 = arith.constant 0 : i32
    %c0_i32_1 = arith.constant 0 : i32
    return %c0_i32, %c0_i32_0 : i32, i32
  }
  func.func @transform_15(%arg0: i32) -> (i32, i32) {
    %c0_i32 = arith.constant 0 : i32
    %c0_i32_0 = arith.constant 0 : i32
    %c0_i32_1 = arith.constant 0 : i32
    return %c0_i32, %c0_i32_0 : i32, i32
  }
  func.func @transform_16(%arg0: i32) -> (i32, i32) {
    %c0_i32 = arith.constant 0 : i32
    %c0_i32_0 = arith.constant 0 : i32
    return %arg0, %c0_i32 : i32, i32
  }
}

</mosaic_0001>

<bundles_post_ra>
// kernel: tpu_custom_call.1
= control target key start
LH: loop header
LB: loop body
LE: loop exit
PB: predicated region body
PF: predicated region fallthrough
CT: control target
= control target key end

     0   :  { %s7749_s0 = inlined_call_operand.vmem [shape: f32[8,32], index: 0, kind: input, shape index: {}]   ;;  %s7750_s1 = inlined_call_operand.vmem [shape: f32[8,8,32], index: 1, kind: input, shape index: {}]   ;;  %s7751_s2 = inlined_call_operand.vmem [shape: s32[8,1], index: 2, kind: input, shape index: {}]   ;;  %s7752_s3 = inlined_call_operand.vmem [shape: f32[3,32,16], index: 3, kind: input, shape index: {}]   ;;  %s7753_s4 = inlined_call_operand.vmem [shape: f32[3,16,16], index: 4, kind: input, shape index: {}]   ;;  %s7754_s5 = inlined_call_operand.vmem [shape: f32[3,1,16], index: 5, kind: input, shape index: {}]   ;;  %s7755_s6 = inlined_call_operand.vmem [shape: f32[3,1,16], index: 6, kind: input, shape index: {}]   ;;  %s7756_s7 = inlined_call_operand.vmem [shape: f32[3,32,16], index: 7, kind: input, shape index: {}]   ;;  %s7757_s8 = inlined_call_operand.vmem [shape: f32[3,16,16], index: 8, kind: input, shape index: {}]   ;;  %s7758_s9 = inlined_call_operand.vmem [shape: f32[3,1,16], index: 9, kind: input, shape index: {}]   ;;  %s7759_s10 = inlined_call_operand.vmem [shape: f32[3,1,16], index: 10, kind: input, shape index: {}]   ;;  %s7760_s11 = inlined_call_operand.vmem [shape: f32[32,32], index: 11, kind: input, shape index: {}]   ;;  %s7761_s12 = inlined_call_operand.vmem [shape: f32[1,32], index: 12, kind: input, shape index: {}]   ;;  %s7762_s13 = inlined_call_operand.vmem [shape: f32[16,32], index: 13, kind: input, shape index: {}]   ;;  %s7763_s14 = inlined_call_operand.vmem [shape: f32[16,32], index: 14, kind: input, shape index: {}]   ;;  %s7764_s15 = inlined_call_operand.vmem [shape: f32[1,32], index: 15, kind: input, shape index: {}]   ;;  %s7765_s16 = inlined_call_operand.hbm [shape: f32[8,128], index: 16, kind: output, shape index: {}]  }
   0x1   :  { %7766 = sst [smem:[#allocation9_spill]] %s7749_s0 }
   0x2   :  { %v216_v0 = vld [vmem:[%s7756_s7 + $0x18] sm:$0xff]  ;;  %v215_v1 = vld [vmem:[%s7756_s7 + $0x10] sm:$0xff]  ;;  %vm74_vm0 = vcmask 261120   ;;  %v6681_v2 = vld [vmem:[%s7750_s1] sm:$0xff]  ;;  %v6572_v5 = vmov 0  }
   0x3   :  { %5876 = vmatprep.subr.mxu1 %v216_v0  ;;  %v214_v3 = vld [vmem:[%s7756_s7 + $0x8] sm:$0xff]  ;;  %5884 = vmatprep.mubr.msk.f32.mxu1 %vm74_vm0, %v6681_v2  ;;  %v213_v4 = vld [vmem:[%s7756_s7] sm:$0xff]  ;;  %v5465_v7 = vld [vmem:[%s7756_s7 + $0x38] sm:$0xff] }
   0x4   :  { %5877 = vmatpush3.msra.mxu1 %v216_v0  ;;  %5864 = vmatprep.mubr.msk.f32.mxu0 %vm74_vm0, %v6681_v2  ;;  %v6698_v6 = vld [vmem:[%s7750_s1 + $0x8] sm:$0xff]  ;;  %v66_v8 = vld [vmem:[%s7752_s3 + $0x18] sm:$0xff]  ;;  %v6709_v9 = vld [vmem:[%s7750_s1 + $0x10] sm:$0xff] }
   0x5   :  { %5878 = vmatprep.subr.mxu1 %v215_v1  ;;  %6370 = vset.pattern.permute.xlu0 %v6572_v5  ;;  %v5464_v10 = vld [vmem:[%s7756_s7 + $0x30] sm:$0xff]  ;;  %v6724_v12 = vld [vmem:[%s7750_s1 + $0x18] sm:$0xff]  ;;  %v5463_v13 = vld [vmem:[%s7756_s7 + $0x28] sm:$0xff] }
   0x6   :  { %5879 = vmatpush3.msra.mxu1 %v215_v1  ;;  %6371 = vset.pattern.permute.xlu1 %v6572_v5  ;;  %v65_v11 = vld [vmem:[%s7752_s3 + $0x10] sm:$0xff]  ;;  %v6732_v14 = vld [vmem:[%s7750_s1 + $0x20] sm:$0xff]  ;;  %v64_v16 = vld [vmem:[%s7752_s3 + $0x8] sm:$0xff] }
   0x7   :  { %5880 = vmatprep.subr.mxu1 %v214_v3  ;;  %5856 = vmatprep.subr.mxu0 %v66_v8  ;;  %v5462_v15 = vld [vmem:[%s7756_s7 + $0x20] sm:$0xff] }
   0x8   :  { %5881 = vmatpush3.msra.mxu1 %v214_v3  ;;  %5857 = vmatpush3.msra.mxu0 %v66_v8  ;;  %v6743_v17 = vld [vmem:[%s7751_s2] sm:$0xff] }
   0x9   :  { %5882 = vmatprep.subr.mxu1 %v213_v4  ;;  %5858 = vmatprep.subr.mxu0 %v65_v11  ;;  %vm1126_vm1 = vcmp.gt.s32.totalorder %v6743_v17, 0 }
   0xa   :  { %5883 = vmatpush3.msra.mxu1 %v213_v4  ;;  %5859 = vmatpush3.msra.mxu0 %v65_v11 }
   0xb   :  { %5885 = vmatmul.mubr.msk.f32.vlgmr.msra.gmra.mxu1 %vm74_vm0, %v6698_v6  ;;  %5916 = vmatprep.subr.mxu1 %v5465_v7 }
   0xc   :  { %5917 = vmatpush3.msra.mxu1 %v5465_v7  ;;  %5887 = vmatprep.mubr.msk.f32.mxu1 %vm74_vm0, %v6709_v9 }
   0xd   :  { %5918 = vmatprep.subr.mxu1 %v5464_v10 }
   0xe   :  { %5919 = vmatpush3.msra.mxu1 %v5464_v10 }
   0xf   :  { %5888 = vmatmul.mubr.msk.f32.gmra.mxu1 %vm74_vm0, %v6724_v12  ;;  %5920 = vmatprep.subr.mxu1 %v5463_v13 }
  0x10   :  { %21 = vsyncpa [#allocation7], 0  ;;  %5890 = vmatprep.mubr.msk.f32.mxu1 %vm74_vm0, %v6732_v14  ;;  %v6753_v18 = vld [vmem:[%s7750_s1 + $0x28] sm:$0xff]  ;;  %5921 = vmatpush3.msra.mxu1 %v5463_v13  ;;  %v5493_v19 = vld [vmem:[%s7756_s7 + $0x58] sm:$0xff]  ;;  %v1127_v22 = vsel %vm1126_vm1, 1, %v6572_v5  ;;  %vm1374_vm2 = vcmp.gt.s32.totalorder %v6743_v17, 1 }
  0x11   :  { %v6761_v20 = vld [vmem:[%s7750_s1 + $0x30] sm:$0xff]  ;;  %5922 = vmatprep.subr.mxu1 %v5462_v15  ;;  %5860 = vmatprep.subr.mxu0 %v64_v16  ;;  %v63_v21 = vld [vmem:[%s7752_s3] sm:$0xff]  ;;  %v5451_v23 = vld [vmem:[%s7752_s3 + $0x38] sm:$0xff]  ;;  %v1375_v26 = vsel %vm1374_vm2, 1, %v6572_v5  ;;  %vm2124_vm3 = vcmp.gt.s32.totalorder %v6743_v17, 4  ;;  %v6573_v32 = vmov 0.0  }
  0x12   :  { %5923 = vmatpush3.msra.mxu1 %v5462_v15  ;;  %5861 = vmatpush3.msra.mxu0 %v64_v16  ;;  %v6778_v24 = vld [vmem:[%s7750_s1 + $0x38] sm:$0xff]  ;;  %v5450_v25 = vld [vmem:[%s7752_s3 + $0x30] sm:$0xff]  ;;  %v5491_v28 = vld [vmem:[%s7756_s7 + $0x48] sm:$0xff]  ;;  %v2125_v34 = vsel %vm2124_vm3, 1, %v6572_v5  ;;  %vm2624_vm4 = vcmp.gt.s32.totalorder %v6743_v17, 6  ;;  %vm6574_vm5 = vmmov 0  }
  0x13   :  { %5891 = vmatmul.mubr.msk.f32.gmra.mxu1 %vm74_vm0, %v6753_v18  ;;  %5956 = vmatprep.subr.mxu1 %v5493_v19  ;;  %v5492_v27 = vld [vmem:[%s7756_s7 + $0x50] sm:$0xff]  ;;  %v5490_v29 = vld [vmem:[%s7756_s7 + $0x40] sm:$0xff]  ;;  %v5449_v30 = vld [vmem:[%s7752_s3 + $0x28] sm:$0xff]  ;;  %v2625_v40 = vsel %vm2624_vm4, 1, %v6572_v5  ;;  %vm204_vm6 = vcmask 130048   ;;  %vm1624_vm8 = vcmp.gt.s32.totalorder %v6743_v17, 2 }
  0x14   :  { %5893 = vmatprep.mubr.msk.f32.mxu1 %vm74_vm0, %v6761_v20  ;;  %5862 = vmatprep.subr.mxu0 %v63_v21  ;;  %v5448_v31 = vld [vmem:[%s7752_s3 + $0x20] sm:$0xff]  ;;  %v5479_v33 = vld [vmem:[%s7752_s3 + $0x58] sm:$0xff]  ;;  %v5478_v35 = vld [vmem:[%s7752_s3 + $0x50] sm:$0xff]  ;;  %vm1874_vm9 = vcmp.gt.s32.totalorder %v6743_v17, 3  ;;  %vm2374_vm10 = vcmp.gt.s32.totalorder %v6743_v17, 5  ;;  %vm2874_vm11 = vcmp.gt.s32.totalorder %v6743_v17, 7 }
  0x15   :  { %5863 = vmatpush3.msra.mxu0 %v63_v21  ;;  %1129 = vperm.xlu0 %6370, %v1127_v22   ;;  %v6847_v36 = vld [vmem:[%s7753_s4 + $0x8] sm:$0xff]  ;;  %v6858_v37 = vld [vmem:[%s7753_s4] sm:$0xff]  ;;  %v6907_v42 = vld [vmem:[%s7753_s4 + $0x18] sm:$0xff]  ;;  %vm5271_vm4 = vcmask 7168   ;;  %s6584_s7 = smov 16   ;;  %s6585_s29 = smov 64  }
  0x16   :  { %5865 = vmatmul.mubr.msk.f32.vlgmr.msra.gmra.mxu0 %vm74_vm0, %v6698_v6  ;;  %5896 = vmatprep.subr.mxu0 %v5451_v23  ;;  %v5477_v38 = vld [vmem:[%s7752_s3 + $0x48] sm:$0xff]  ;;  %v5476_v39 = vld [vmem:[%s7752_s3 + $0x40] sm:$0xff]  ;;  %v6918_v43 = vld [vmem:[%s7753_s4 + $0x10] sm:$0xff]  ;;  %s6586_s30 = smov [#allocation6]  }
  0x17   :  { %5894 = vmatmul.mubr.msk.f32.gmra.mxu1 %vm74_vm0, %v6778_v24  ;;  %5897 = vmatpush3.msra.mxu0 %v5451_v23  ;;  %v6900_v41 = vld [vmem:[%s7753_s4 + $0x28] sm:$0xff]  ;;  %v6927_v44 = vld [vmem:[%s7753_s4 + $0x20] sm:$0xff]  ;;  %s5422_s0 = sshll.u32 %s6586_s30, 4  ;;  %s5423_s0 = int_to_ptr.vmem [resolvable:$true] %s5422_s0 }
  0x18   :  { %5924 = vmatprep.mubr.msk.f32.mxu1 %vm74_vm0, %v6681_v2  ;;  %5867 = vmatprep.mubr.msk.f32.mxu0 %vm74_vm0, %v6709_v9  ;;  %v5439_v45 = vld [vmem:[%s7758_s9] ss:$0 sm:$0xff]  ;;  %v5467_v1 = vld [vmem:[%s7758_s9 + $0x1] ss:$0 sm:$0xff]  ;;  %s6550_s17 = scalar_lea.vmem %s5423_s0, 128  ;;  %p6555_p1 = scmp.lt.s32.totalorder %s5423_s0, %s5423_s0 }
  0x19   :  { %5898 = vmatprep.subr.mxu0 %v5450_v25  ;;  %1377 = vperm.xlu0 %6370, %v1375_v26   ;;  %v5430_v56 = vld [vmem:[%s7754_s5] ss:$0 sm:$0xff]  ;;  %p6551_p0 = scmp.ne.s32.totalorder %s5423_s0, %s6550_s17  ;;  %p6556_p2 = scmp.lt.s32.totalorder %s6550_s17, %s6550_s17 }
  0x1a   :  { %5868 = vmatmul.mubr.msk.f32.gmra.mxu0 %vm74_vm0, %v6724_v12 }
  0x1b   :  { %5925 = vmatmul.mubr.msk.f32.vlgmr.msra.gmra.mxu1 %vm74_vm0, %v6698_v6  ;;  %5899 = vmatpush3.msra.mxu0 %v5450_v25  ;;  %p6557_p3 = por %p6556_p2, %p6555_p1 }
  0x1c   :  { %5957 = vmatpush3.msra.mxu1 %v5493_v19  ;;  %5927 = vmatprep.mubr.msk.f32.mxu1 %vm74_vm0, %v6709_v9 }
  0x1d   :  { %5958 = vmatprep.subr.mxu1 %v5492_v27  ;;  %5870 = vmatprep.mubr.msk.f32.mxu0 %vm74_vm0, %v6732_v14  ;;  %p6558_p4 = pnand %p6557_p3, %p6551_p0 }
  0x1e   :  { %5959 = vmatpush3.msra.mxu1 %v5492_v27  ;;  %5871 = vmatmul.mubr.msk.f32.gmra.mxu0 %vm74_vm0, %v6753_v18 }
  0x1f   :  { %5928 = vmatmul.mubr.msk.f32.gmra.mxu1 %vm74_vm0, %v6724_v12  ;;  %5960 = vmatprep.subr.mxu1 %v5491_v28 }
  0x20   :  { %5930 = vmatprep.mubr.msk.f32.mxu1 %vm74_vm0, %v6732_v14  ;;  %5961 = vmatpush3.msra.mxu1 %v5491_v28 }
  0x21   :  { %5962 = vmatprep.subr.mxu1 %v5490_v29  ;;  %5900 = vmatprep.subr.mxu0 %v5449_v30 }
  0x22   :  { %5963 = vmatpush3.msra.mxu1 %v5490_v29  ;;  %5901 = vmatpush3.msra.mxu0 %v5449_v30  ;;  %v5453_v30 = vld [vmem:[%s7754_s5 + $0x1] ss:$0 sm:$0xff] }
  0x23   :  { %5931 = vmatmul.mubr.msk.f32.gmra.mxu1 %vm74_vm0, %v6753_v18  ;;  %5976 = vmatprep.subr.mxu1 %v6573_v32 }
  0x24   :  { %5933 = vmatprep.mubr.msk.f32.mxu1 %vm74_vm0, %v6761_v20  ;;  %5873 = vmatprep.mubr.msk.f32.mxu0 %vm74_vm0, %v6761_v20 }
  0x25   :  { %5874 = vmatmul.mubr.msk.f32.gmra.mxu0 %vm74_vm0, %v6778_v24  ;;  %5902 = vmatprep.subr.mxu0 %v5448_v31 }
  0x26   :  { %5903 = vmatpush3.msra.mxu0 %v5448_v31  ;;  %5904 = vmatprep.mubr.msk.f32.mxu0 %vm74_vm0, %v6681_v2 }
  0x27   :  { %5934 = vmatmul.mubr.msk.f32.gmra.mxu1 %vm74_vm0, %v6778_v24  ;;  %5936 = vmatprep.subr.mxu0 %v5479_v33 }
  0x28   :  { %5964 = vmatprep.mubr.msk.f32.mxu1 %vm74_vm0, %v6681_v2  ;;  %2127 = vperm.xlu0 %6370, %v2125_v34  }
  0x29   :  { %5905 = vmatmul.mubr.msk.f32.vlgmr.msra.gmra.mxu0 %vm74_vm0, %v6698_v6 }
  0x2a   :  { %5937 = vmatpush3.msra.mxu0 %v5479_v33  ;;  %5907 = vmatprep.mubr.msk.f32.mxu0 %vm74_vm0, %v6709_v9 }
  0x2b   :  { %5965 = vmatmul.mubr.msk.f32.vlgmr.msra.gmra.mxu1 %vm74_vm0, %v6698_v6  ;;  %5938 = vmatprep.subr.mxu0 %v5478_v35 }
  0x2c   :  { %5977 = vmatpush3.msra.mxu1 %v6847_v36  ;;  %5967 = vmatprep.mubr.msk.f32.mxu1 %vm74_vm0, %v6709_v9 }
  0x2d   :  { %5978 = vmatprep.subr.mxu1 %v6573_v32  ;;  %5908 = vmatmul.mubr.msk.f32.gmra.mxu0 %vm74_vm0, %v6724_v12 }
  0x2e   :  { %5979 = vmatpush3.msra.mxu1 %v6858_v37  ;;  %5939 = vmatpush3.msra.mxu0 %v5478_v35  ;;  %v5495_v35 = vld [vmem:[%s7758_s9 + $0x2] ss:$0 sm:$0xff]  ;;  %s7767_s9 = sld [smem:[#allocation9_spill]] }
  0x2f   :  { %5968 = vmatmul.mubr.msk.f32.gmra.mxu1 %vm74_vm0, %v6724_v12  ;;  %5983 = vmatprep.subr.mxu1 %v6573_v32 }
  0x30   :  { %5970 = vmatprep.mubr.msk.f32.mxu1 %vm74_vm0, %v6732_v14  ;;  %5910 = vmatprep.mubr.msk.f32.mxu0 %vm74_vm0, %v6732_v14 }
  0x31   :  { %5911 = vmatmul.mubr.msk.f32.gmra.mxu0 %vm74_vm0, %v6753_v18  ;;  %5940 = vmatprep.subr.mxu0 %v5477_v38 }
  0x32   :  { %5941 = vmatpush3.msra.mxu0 %v5477_v38  ;;  %5913 = vmatprep.mubr.msk.f32.mxu0 %vm74_vm0, %v6761_v20 }
  0x33   :  { %5971 = vmatmul.mubr.msk.f32.gmra.mxu1 %vm74_vm0, %v6753_v18  ;;  %5942 = vmatprep.subr.mxu0 %v5476_v39 }
  0x34   :  { %5973 = vmatprep.mubr.msk.f32.mxu1 %vm74_vm0, %v6761_v20  ;;  %5943 = vmatpush3.msra.mxu0 %v5476_v39 }
  0x35   :  { %5914 = vmatmul.mubr.msk.f32.gmra.mxu0 %vm74_vm0, %v6778_v24  ;;  %5990 = vmatprep.subr.mxu0 %v6573_v32 }
  0x36   :  { %5944 = vmatprep.mubr.msk.f32.mxu0 %vm74_vm0, %v6681_v2  ;;  %2627 = vperm.xlu0 %6370, %v2625_v40  }
  0x37   :  { %5974 = vmatmul.mubr.msk.f32.gmra.mxu1 %vm74_vm0, %v6778_v24 }
  0x38   :  { %5980 = vmatprep.mubr.msk.f32.mxu1 %vm6574_vm5, %v6573_v32 }
  0x39   :  { %5945 = vmatmul.mubr.msk.f32.vlgmr.msra.gmra.mxu0 %vm74_vm0, %v6698_v6 }
  0x3a   :  { %5991 = vmatpush3.msra.mxu0 %v6900_v41  ;;  %5947 = vmatprep.mubr.msk.f32.mxu0 %vm74_vm0, %v6709_v9 }
  0x3b   :  { %5981 = vmatmul.mubr.f32.vlgmr.msra.gmra.mxu1 %v6573_v32  ;;  %5992 = vmatprep.subr.mxu0 %v6573_v32 }
  0x3c   :  { %5984 = vmatpush3.msra.mxu1 %v6907_v42  ;;  %5987 = vmatprep.mubr.msk.f32.mxu1 %vm6574_vm5, %v6573_v32 }
  0x3d   :  { %5985 = vmatprep.subr.mxu1 %v6573_v32  ;;  %5948 = vmatmul.mubr.msk.f32.gmra.mxu0 %vm74_vm0, %v6724_v12 }
  0x3e   :  { %5986 = vmatpush3.msra.mxu1 %v6918_v43  ;;  %5950 = vmatprep.mubr.msk.f32.mxu0 %vm74_vm0, %v6732_v14 }
  0x3f   :  { %5988 = vmatmul.mubr.f32.vlgmr.msra.gmra.mxu1 %v6573_v32  ;;  %5993 = vmatpush3.msra.mxu0 %v6927_v44 }
  0x40   :  { %5997 = vmatprep.subr.mxu1 %v6573_v32  ;;  %6004 = vmatprep.subr.mxu0 %v6573_v32 }
  0x41   :  { %5951 = vmatmul.mubr.msk.f32.gmra.mxu0 %vm74_vm0, %v6753_v18  ;;  %5998 = vmatpush3.msra.mxu1 %v6847_v36 }
  0x42   :  { %5953 = vmatprep.mubr.msk.f32.mxu0 %vm74_vm0, %v6761_v20  ;;  %5999 = vmatprep.subr.mxu1 %v6573_v32 }
  0x43   :  { %6000 = vmatpush3.msra.mxu1 %v6858_v37  ;;  %6001 = vmatprep.mubr.msk.f32.mxu1 %vm6574_vm5, %v6573_v32 }
  0x44   :  { %6011 = vmatprep.subr.mxu1 %v6573_v32 }
  0x45   :  { %5954 = vmatmul.mubr.msk.f32.gmra.mxu0 %vm74_vm0, %v6778_v24 }
  0x46   :  { %5994 = vmatprep.mubr.msk.f32.mxu0 %vm6574_vm5, %v6573_v32 }
  0x49   :  { %5995 = vmatmul.mubr.f32.vlgmr.msra.gmra.mxu0 %v6573_v32 }
  0x4a   :  { %6005 = vmatpush3.msra.mxu0 %v6907_v42  ;;  %6008 = vmatprep.mubr.msk.f32.mxu0 %vm6574_vm5, %v6573_v32 }
  0x4b   :  { %6006 = vmatprep.subr.mxu0 %v6573_v32 }
  0x4c   :  { %6007 = vmatpush3.msra.mxu0 %v6918_v43 }
  0x4d   :  { %6018 = vmatprep.subr.mxu0 %v6573_v32 }
  0xcb   :  { %v5886_v46 = vpop.f32.mrf.mxu1 }
  0xcc   :  { %v296_v47 = vadd.f32 %v5886_v46, %v5439_v45 }
  0xcd   :  { %v290_v48 = vpop.f32.mrf.mxu1 }
  0xce   :  { %330 = vst.msk [vmem:[#allocation3 + $0x8] sm:$0xff] %vm204_vm6, %v296_v47  ;;  %v291_v49 = vadd.f32 %v5439_v45, %v290_v48 }
  0xcf   :  { %v5889_v50 = vpop.f32.mrf.mxu1 }
  0xd0   :  { %329 = vst.msk [vmem:[#allocation3] sm:$0xff] %vm204_vm6, %v291_v49  ;;  %v306_v51 = vadd.f32 %v5889_v50, %v5439_v45 }
  0xd1   :  { %v300_v52 = vpop.f32.mrf.mxu1 }
  0xd2   :  { %332 = vst.msk [vmem:[#allocation3 + $0x18] sm:$0xff] %vm204_vm6, %v306_v51  ;;  %v301_v53 = vadd.f32 %v5439_v45, %v300_v52 }
  0xd3   :  { %v5892_v54 = vpop.f32.mrf.mxu1 }
  0xd4   :  { %331 = vst.msk [vmem:[#allocation3 + $0x10] sm:$0xff] %vm204_vm6, %v301_v53  ;;  %v316_v55 = vadd.f32 %v5892_v54, %v5439_v45 }
  0xd5   :  { %v310_v57 = vpop.f32.mrf.mxu1 }
  0xd6   :  { %334 = vst.msk [vmem:[#allocation3 + $0x28] sm:$0xff] %vm204_vm6, %v316_v55  ;;  %v311_v58 = vadd.f32 %v5439_v45, %v310_v57  ;;  %v5866_v59 = vpop.f32.mrf.mxu0 }
  0xd7   :  { %v5895_v60 = vpop.f32.mrf.mxu1  ;;  %v171_v61 = vadd.f32 %v5866_v59, %v5430_v56 }
  0xd8   :  { %333 = vst.msk [vmem:[#allocation3 + $0x20] sm:$0xff] %vm204_vm6, %v311_v58  ;;  %v326_v62 = vadd.f32 %v5895_v60, %v5439_v45  ;;  %v165_v63 = vpop.f32.mrf.mxu0 }
  0xd9   :  { %v320_v0 = vpop.f32.mrf.mxu1  ;;  %206 = vst.msk [vmem:[#allocation2 + $0x8] sm:$0xff] %vm204_vm6, %v171_v61  ;;  %v166_v2 = vadd.f32 %v5430_v56, %v165_v63 }
  0xda   :  { %336 = vst.msk [vmem:[#allocation3 + $0x38] sm:$0xff] %vm204_vm6, %v326_v62  ;;  %v321_v3 = vadd.f32 %v5439_v45, %v320_v0  ;;  %v5869_v4 = vpop.f32.mrf.mxu0 }
  0xdb   :  { %v5926_v6 = vpop.f32.mrf.mxu1  ;;  %205 = vst.msk [vmem:[#allocation2] sm:$0xff] %vm204_vm6, %v166_v2  ;;  %v181_v7 = vadd.f32 %v5869_v4, %v5430_v56 }
  0xdc   :  { %335 = vst.msk [vmem:[#allocation3 + $0x30] sm:$0xff] %vm204_vm6, %v321_v3  ;;  %v549_v8 = vadd.f32 %v5926_v6, %v5467_v1  ;;  %v175_v9 = vpop.f32.mrf.mxu0 }
  0xdd   :  { %v543_v10 = vpop.f32.mrf.mxu1  ;;  %208 = vst.msk [vmem:[#allocation2 + $0x18] sm:$0xff] %vm204_vm6, %v181_v7  ;;  %v176_v11 = vadd.f32 %v5430_v56, %v175_v9 }
  0xde   :  { %584 = vst.msk [vmem:[#allocation3 + $0x48] sm:$0xff] %vm204_vm6, %v549_v8  ;;  %v544_v12 = vadd.f32 %v5467_v1, %v543_v10  ;;  %v5872_v13 = vpop.f32.mrf.mxu0  ;;  %v5481_v8 = vld [vmem:[%s7754_s5 + $0x2] ss:$0 sm:$0xff] }
  0xdf   :  { %v5929_v14 = vpop.f32.mrf.mxu1  ;;  %207 = vst.msk [vmem:[#allocation2 + $0x10] sm:$0xff] %vm204_vm6, %v176_v11  ;;  %v191_v15 = vadd.f32 %v5872_v13, %v5430_v56 }
  0xe0   :  { %583 = vst.msk [vmem:[#allocation3 + $0x40] sm:$0xff] %vm204_vm6, %v544_v12  ;;  %v559_v16 = vadd.f32 %v5929_v14, %v5467_v1  ;;  %v185_v18 = vpop.f32.mrf.mxu0  ;;  %v7018_v12 = vld [vmem:[%s7755_s6] ss:$0 sm:$0xff] }
  0xe1   :  { %v553_v19 = vpop.f32.mrf.mxu1  ;;  %210 = vst.msk [vmem:[#allocation2 + $0x28] sm:$0xff] %vm204_vm6, %v191_v15  ;;  %v186_v20 = vadd.f32 %v5430_v56, %v185_v18 }
  0xe2   :  { %586 = vst.msk [vmem:[#allocation3 + $0x58] sm:$0xff] %vm204_vm6, %v559_v16  ;;  %v554_v21 = vadd.f32 %v5467_v1, %v553_v19 }
  0xe3   :  { %v5932_v22 = vpop.f32.mrf.mxu1  ;;  %209 = vst.msk [vmem:[#allocation2 + $0x20] sm:$0xff] %vm204_vm6, %v186_v20 }
  0xe4   :  { %585 = vst.msk [vmem:[#allocation3 + $0x50] sm:$0xff] %vm204_vm6, %v554_v21  ;;  %v569_v23 = vadd.f32 %v5932_v22, %v5467_v1  ;;  %v1102_v21 = vld [vmem:[#allocation2] sm:$0xff] }
  0xe5   :  { %v563_v24 = vpop.f32.mrf.mxu1  ;;  %v5875_v25 = vpop.f32.mrf.mxu0 }
  0xe6   :  { %588 = vst.msk [vmem:[#allocation3 + $0x68] sm:$0xff] %vm204_vm6, %v569_v23  ;;  %v564_v26 = vadd.f32 %v5467_v1, %v563_v24  ;;  %v201_v27 = vadd.f32 %v5875_v25, %v5430_v56  ;;  %v7028_v23 = vld [vmem:[%s7755_s6 + $0x1] ss:$0 sm:$0xff] }
  0xe7   :  { %v5935_v28 = vpop.f32.mrf.mxu1  ;;  %v195_v29 = vpop.f32.mrf.mxu0 }
  0xe8   :  { %587 = vst.msk [vmem:[#allocation3 + $0x60] sm:$0xff] %vm204_vm6, %v564_v26  ;;  %v579_v31 = vadd.f32 %v5935_v28, %v5467_v1  ;;  %212 = vst.msk [vmem:[#allocation2 + $0x38] sm:$0xff] %vm204_vm6, %v201_v27  ;;  %v196_v33 = vadd.f32 %v5430_v56, %v195_v29 }
  0xe9   :  { %v573_v34 = vpop.f32.mrf.mxu1  ;;  %v5906_v38 = vpop.f32.mrf.mxu0 }
  0xea   :  { %590 = vst.msk [vmem:[#allocation3 + $0x78] sm:$0xff] %vm204_vm6, %v579_v31  ;;  %v574_v39 = vadd.f32 %v5467_v1, %v573_v34  ;;  %211 = vst.msk [vmem:[#allocation2 + $0x30] sm:$0xff] %vm204_vm6, %v196_v33  ;;  %v422_v40 = vadd.f32 %v5906_v38, %v5453_v30 }
  0xeb   :  { %v5966_v45 = vpop.f32.mrf.mxu1  ;;  %v416_v46 = vpop.f32.mrf.mxu0 }
  0xec   :  { %589 = vst.msk [vmem:[#allocation3 + $0x70] sm:$0xff] %vm204_vm6, %v574_v39  ;;  %v803_v47 = vadd.f32 %v5966_v45, %v5495_v35  ;;  %457 = vst.msk [vmem:[#allocation2 + $0x48] sm:$0xff] %vm204_vm6, %v422_v40  ;;  %v417_v48 = vadd.f32 %v5453_v30, %v416_v46 }
  0xed   :  { %v797_v49 = vpop.f32.mrf.mxu1  ;;  %v5909_v50 = vpop.f32.mrf.mxu0 }
  0xee   :  { %838 = vst.msk [vmem:[#allocation3 + $0x88] sm:$0xff] %vm204_vm6, %v803_v47  ;;  %v798_v51 = vadd.f32 %v5495_v35, %v797_v49  ;;  %456 = vst.msk [vmem:[#allocation2 + $0x40] sm:$0xff] %vm204_vm6, %v417_v48  ;;  %v432_v52 = vadd.f32 %v5909_v50, %v5453_v30 }
  0xef   :  { %v5969_v53 = vpop.f32.mrf.mxu1  ;;  %v426_v54 = vpop.f32.mrf.mxu0 }
  0xf0   :  { %837 = vst.msk [vmem:[#allocation3 + $0x80] sm:$0xff] %vm204_vm6, %v798_v51  ;;  %v813_v55 = vadd.f32 %v5969_v53, %v5495_v35  ;;  %459 = vst.msk [vmem:[#allocation2 + $0x58] sm:$0xff] %vm204_vm6, %v432_v52  ;;  %v427_v56 = vadd.f32 %v5453_v30, %v426_v54 }
  0xf1   :  { %v807_v57 = vpop.f32.mrf.mxu1  ;;  %v5912_v58 = vpop.f32.mrf.mxu0 }
  0xf2   :  { %840 = vst.msk [vmem:[#allocation3 + $0x98] sm:$0xff] %vm204_vm6, %v813_v55  ;;  %v808_v59 = vadd.f32 %v5495_v35, %v807_v57  ;;  %458 = vst.msk [vmem:[#allocation2 + $0x50] sm:$0xff] %vm204_vm6, %v427_v56  ;;  %v442_v60 = vadd.f32 %v5912_v58, %v5453_v30  ;;  %v7041_v56 = vld [vmem:[%s7755_s6 + $0x2] ss:$0 sm:$0xff] }
  0xf3   :  { %v5972_v61 = vpop.f32.mrf.mxu1  ;;  %v436_v62 = vpop.f32.mrf.mxu0 }
  0xf4   :  { %839 = vst.msk [vmem:[#allocation3 + $0x90] sm:$0xff] %vm204_vm6, %v808_v59  ;;  %v823_v63 = vadd.f32 %v5972_v61, %v5495_v35  ;;  %461 = vst.msk [vmem:[#allocation2 + $0x68] sm:$0xff] %vm204_vm6, %v442_v60  ;;  %v437_v0 = vadd.f32 %v5453_v30, %v436_v62 }
  0xf5   :  { %v817_v1 = vpop.f32.mrf.mxu1  ;;  %v5915_v2 = vpop.f32.mrf.mxu0  ;;  %v1110_v33 = vld [vmem:[#allocation2 + $0x40] sm:$0xff] }
  0xf6   :  { %842 = vst.msk [vmem:[#allocation3 + $0xa8] sm:$0xff] %vm204_vm6, %v823_v63  ;;  %v818_v3 = vadd.f32 %v5495_v35, %v817_v1  ;;  %460 = vst.msk [vmem:[#allocation2 + $0x60] sm:$0xff] %vm204_vm6, %v437_v0  ;;  %v452_v4 = vadd.f32 %v5915_v2, %v5453_v30 }
  0xf7   :  { %v5975_v6 = vpop.f32.mrf.mxu1  ;;  %v446_v7 = vpop.f32.mrf.mxu0 }
  0xf8   :  { %841 = vst.msk [vmem:[#allocation3 + $0xa0] sm:$0xff] %vm204_vm6, %v818_v3  ;;  %v833_v9 = vadd.f32 %v5975_v6, %v5495_v35  ;;  %463 = vst.msk [vmem:[#allocation2 + $0x78] sm:$0xff] %vm204_vm6, %v452_v4  ;;  %v447_v10 = vadd.f32 %v5453_v30, %v446_v7  ;;  %v7044_v4 = vpop.permute.xlu0 %1129 }
  0xf9   :  { %v827_v11 = vpop.f32.mrf.mxu1  ;;  %v5946_v13 = vpop.f32.mrf.mxu0  ;;  %vm1131_vm7 = vcmp.eq.s32.totalorder %v7044_v4, 1 }
  0xfa   :  { %844 = vst.msk [vmem:[#allocation3 + $0xb8] sm:$0xff] %vm204_vm6, %v833_v9  ;;  %v828_v14 = vadd.f32 %v5495_v35, %v827_v11  ;;  %462 = vst.msk [vmem:[#allocation2 + $0x70] sm:$0xff] %vm204_vm6, %v447_v10  ;;  %v676_v15 = vadd.f32 %v5946_v13, %v5481_v8  ;;  %v1875_v9 = vsel %vm1874_vm9, 1, %v6572_v5  ;;  %v2375_v10 = vsel %vm2374_vm10, 1, %v6572_v5 }
  0xfb   :  { %v946_v16 = vpop.f32.mrf.mxu1  ;;  %v670_v18 = vpop.f32.mrf.mxu0  ;;  %v2875_v11 = vsel %vm2874_vm11, 1, %v6572_v5  ;;  %vm5279_vm9 = vcmask 39936   ;;  %vm5281_vm10 = vcmask 48128   ;;  %vm5283_vm11 = vcmask 56320  }
  0xfc   :  { %843 = vst.msk [vmem:[#allocation3 + $0xb0] sm:$0xff] %vm204_vm6, %v828_v14  ;;  %v947_v19 = vadd.f32 %v7018_v12, %v946_v16  ;;  %711 = vst.msk [vmem:[#allocation2 + $0x88] sm:$0xff] %vm204_vm6, %v676_v15  ;;  %v671_v20 = vadd.f32 %v5481_v8, %v670_v18  ;;  %v1348_v16 = vld [vmem:[#allocation2 + $0x8] sm:$0xff] }
  0xfd   :  { %v5982_v22 = vpop.f32.mrf.mxu1  ;;  %v5949_v24 = vpop.f32.mrf.mxu0 }
  0xfe   :  { %v1103_v25 = vadd.f32 %v1102_v21, %v947_v19  ;;  %710 = vst.msk [vmem:[#allocation2 + $0x80] sm:$0xff] %vm204_vm6, %v671_v20  ;;  %v686_v26 = vadd.f32 %v5949_v24, %v5481_v8 }
  0xff   :  { %v1022_v27 = vpop.f32.mrf.mxu1  ;;  %v680_v28 = vpop.f32.mrf.mxu0 }
 0x100   :  { %v5519_v29 = vmul.f32 -1.442695, %v1103_v25  ;;  %v1023_v30 = vadd.f32 %v7028_v23, %v1022_v27  ;;  %713 = vst.msk [vmem:[#allocation2 + $0x98] sm:$0xff] %vm204_vm6, %v686_v26  ;;  %v681_v31 = vadd.f32 %v5481_v8, %v680_v28  ;;  %v1357_v26 = vld [vmem:[#allocation2 + $0x48] sm:$0xff] }
 0x101   :  { %v5989_v34 = vpop.f32.mrf.mxu1  ;;  %v5952_v35 = vpop.f32.mrf.mxu0 }
 0x102   :  { %6380 = vpow2.f32 %v5519_v29  ;;  %712 = vst.msk [vmem:[#allocation2 + $0x90] sm:$0xff] %vm204_vm6, %v681_v31  ;;  %v696_v38 = vadd.f32 %v5952_v35, %v5481_v8  ;;  %v1111_v40 = vadd.f32 %v1110_v33, %v1023_v30 }
 0x103   :  { %v690_v39 = vpop.f32.mrf.mxu0  ;;  %v1366_v35 = vld [vmem:[#allocation2 + $0x88] sm:$0xff] }
 0x104   :  { %715 = vst.msk [vmem:[#allocation2 + $0xa8] sm:$0xff] %vm204_vm6, %v696_v38  ;;  %v691_v45 = vadd.f32 %v5481_v8, %v690_v39  ;;  %v5520_v49 = vmul.f32 -1.442695, %v1111_v40 }
 0x105   :  { %v5955_v46 = vpop.f32.mrf.mxu0  ;;  %v1118_v61 = vld [vmem:[#allocation2 + $0x80] sm:$0xff] }
 0x106   :  { %714 = vst.msk [vmem:[#allocation2 + $0xa0] sm:$0xff] %vm204_vm6, %v691_v45  ;;  %v706_v47 = vadd.f32 %v5955_v46, %v5481_v8  ;;  %6382 = vpow2.f32 %v5520_v49 }
 0x107   :  { %v700_v48 = vpop.f32.mrf.mxu0 }
 0x108   :  { %717 = vst.msk [vmem:[#allocation2 + $0xb8] sm:$0xff] %vm204_vm6, %v706_v47  ;;  %v701_v50 = vadd.f32 %v5481_v8, %v700_v48  ;;  %v1625_v8 = vsel %vm1624_vm8, 1, %v6572_v5  ;;  %v7089_v48 = vpop.permute.xlu0 %1377  ;;  %vm5277_vm8 = vcmask 31744  }
 0x109   :  { %v1098_v51 = vpop.f32.mrf.mxu0  ;;  %1627 = vperm.xlu1 %6371, %v1625_v8   ;;  %vm1379_vm12 = vcmp.eq.s32.totalorder %v7089_v48, 1  ;;  %v4846_v48 = vld [vmem:[%s7760_s11 + $0x8] sm:$0xff] }
 0x10a   :  { %716 = vst.msk [vmem:[#allocation2 + $0xb0] sm:$0xff] %vm204_vm6, %v701_v50  ;;  %v1099_v58 = vadd.f32 %v7041_v56, %v1098_v51 }
 0x10b   :  { %v5996_v52 = vpop.f32.mrf.mxu0 }
 0x10d   :  { %1877 = vperm.xlu1 %6371, %v1875_v9  }
 0x10f   :  { %v6381_v53 = vpop.eup %6380 }
 0x110   :  { %v1107_v54 = vadd.f32 1.0, %v6381_v53 }
 0x111   :  { %2377 = vperm.xlu1 %6371, %v2375_v10  }
 0x112   :  { %6384 = vrcp.f32 %v1107_v54 }
 0x113   :  { %v6383_v55 = vpop.eup %6382 }
 0x114   :  { %v1115_v57 = vadd.f32 1.0, %v6383_v55  ;;  %v1598_v55 = vld [vmem:[#allocation2 + $0x10] sm:$0xff] }
 0x115   :  { %2877 = vperm.xlu1 %6371, %v2875_v11  }
 0x116   :  { %6386 = vrcp.f32 %v1115_v57 }
 0x11f   :  { %v6385_v59 = vpop.eup %6384 }
 0x120   :  { %v1119_v60 = vmul.f32 %v6385_v59, %v1099_v58 }
 0x122   :  { %v1120_v62 = vadd.f32 %v1119_v60, %v1118_v61 }
 0x123   :  { %v6387_v63 = vpop.eup %6386 }
 0x124   :  { %6388 = vtanh.f32 %v1120_v62  ;;  %v1122_v0 = vsub.f32 1.0, %v6387_v63  ;;  %v1124_v3 = vmul.f32 0.0, %v6387_v63 }
 0x131   :  { %v6389_v1 = vpop.eup %6388 }
 0x132   :  { %v1123_v2 = vmul.f32 %v6389_v1, %v1122_v0  ;;  %v1607_v0 = vld [vmem:[#allocation2 + $0x50] sm:$0xff] }
 0x134   :  { %v1125_v6 = vadd.f32 %v1124_v3, %v1123_v2 }
 0x136   :  { %v7049_v7 = vsel %vm1131_vm7, %v1125_v6, 0.0 }
 0x137   :  { %1133 = vst.msk [vmem:[#allocation4] sm:$0xff] %vm204_vm6, %v7049_v7  ;;  %6002 = vmatmul.mubr.msk.f32.vlgmr.msra.gmra.mxu1 %vm204_vm6, %v7049_v7  ;;  %6009 = vmatmul.mubr.msk.f32.vlgmr.msra.gmra.mxu0 %vm204_vm6, %v7049_v7 }
 0x138   :  { %6012 = vmatpush3.msra.mxu1 %v6900_v41  ;;  %6015 = vmatprep.mubr.msk.f32.mxu1 %vm6574_vm5, %v6573_v32 }
 0x139   :  { %6013 = vmatprep.subr.mxu1 %v6573_v32  ;;  %6019 = vmatpush3.msra.mxu0 %v6847_v36 }
 0x13a   :  { %6014 = vmatpush3.msra.mxu1 %v6927_v44  ;;  %6020 = vmatprep.subr.mxu0 %v6573_v32 }
 0x13b   :  { %6016 = vmatmul.mubr.msk.f32.vlgmr.msra.gmra.mxu1 %vm204_vm6, %v7049_v7  ;;  %6025 = vmatprep.subr.mxu1 %v6573_v32 }
 0x13c   :  { %6026 = vmatpush3.msra.mxu1 %v6907_v42  ;;  %6021 = vmatpush3.msra.mxu0 %v6858_v37 }
 0x13d   :  { %6027 = vmatprep.subr.mxu1 %v6573_v32  ;;  %6022 = vmatprep.mubr.msk.f32.mxu0 %vm6574_vm5, %v6573_v32 }
 0x13e   :  { %6028 = vmatpush3.msra.mxu1 %v6918_v43  ;;  %6029 = vmatprep.mubr.msk.f32.mxu1 %vm6574_vm5, %v6573_v32 }
 0x13f   :  { %6032 = vmatprep.subr.mxu0 %v6573_v32  ;;  %6039 = vmatprep.subr.mxu1 %v6573_v32 }
 0x1f7   :  { %v1203_v13 = vpop.f32.mrf.mxu1  ;;  %v1273_v14 = vpop.f32.mrf.mxu0 }
 0x1f8   :  { %v1204_v15 = vadd.f32 %v7018_v12, %v1203_v13  ;;  %v1274_v24 = vadd.f32 %v7028_v23, %v1273_v14  ;;  %v1616_v13 = vld [vmem:[#allocation2 + $0x90] sm:$0xff] }
 0x1f9   :  { %v6003_v18 = vpop.f32.mrf.mxu1  ;;  %v6010_v19 = vpop.f32.mrf.mxu0 }
 0x1fa   :  { %v1349_v20 = vadd.f32 %v1348_v16, %v1204_v15  ;;  %v1358_v17 = vadd.f32 %v1357_v26, %v1274_v24  ;;  %v7122_v19 = vpop.permute.xlu1 %1627 }
 0x1fb   :  { %v1343_v21 = vpop.f32.mrf.mxu1  ;;  %vm1629_vm13 = vcmp.eq.s32.totalorder %v7122_v19, 1 }
 0x1fc   :  { %v5524_v22 = vmul.f32 -1.442695, %v1349_v20  ;;  %v5525_v27 = vmul.f32 -1.442695, %v1358_v17  ;;  %v1344_v31 = vadd.f32 %v7041_v56, %v1343_v21 }
 0x1fd   :  { %v6017_v25 = vpop.f32.mrf.mxu1 }
 0x1fe   :  { %6390 = vpow2.f32 %v5524_v22 }
 0x1ff   :  { %6392 = vpow2.f32 %v5525_v27 }
 0x20b   :  { %v6391_v5 = vpop.eup %6390 }
 0x20c   :  { %v1353_v28 = vadd.f32 1.0, %v6391_v5  ;;  %v6393_v29 = vpop.eup %6392  ;;  %v1848_v5 = vld [vmem:[#allocation2 + $0x18] sm:$0xff] }
 0x20d   :  { %v1362_v30 = vadd.f32 1.0, %v6393_v29 }
 0x20e   :  { %6394 = vrcp.f32 %v1353_v28 }
 0x20f   :  { %6396 = vrcp.f32 %v1362_v30 }
 0x21b   :  { %v6395_v33 = vpop.eup %6394 }
 0x21c   :  { %v1367_v34 = vmul.f32 %v6395_v33, %v1344_v31  ;;  %v6397_v39 = vpop.eup %6396 }
 0x21d   :  { %v1370_v40 = vsub.f32 1.0, %v6397_v39  ;;  %v1372_v47 = vmul.f32 %v6397_v39, %v7049_v7 }
 0x21e   :  { %v1368_v38 = vadd.f32 %v1367_v34, %v1366_v35 }
 0x220   :  { %6398 = vtanh.f32 %v1368_v38  ;;  %v1857_v38 = vld [vmem:[#allocation2 + $0x58] sm:$0xff] }
 0x22d   :  { %v6399_v45 = vpop.eup %6398 }
 0x22e   :  { %v1371_v46 = vmul.f32 %v6399_v45, %v1370_v40 }
 0x230   :  { %v1373_v49 = vadd.f32 %v1372_v47, %v1371_v46 }
 0x232   :  { %v1380_v50 = vsel %vm1379_vm12, %v1373_v49, 0.0  ;;  %v1383_v51 = vsel %vm1379_vm12, %v1373_v49, %v7049_v7 }
 0x233   :  { %1382 = vst.msk [vmem:[#allocation4 + $0x8] sm:$0xff] %vm204_vm6, %v1380_v50  ;;  %6023 = vmatmul.mubr.msk.f32.vlgmr.msra.gmra.mxu0 %vm204_vm6, %v1383_v51  ;;  %6030 = vmatmul.mubr.msk.f32.vlgmr.msra.gmra.mxu1 %vm204_vm6, %v1383_v51 }
 0x234   :  { %6033 = vmatpush3.msra.mxu0 %v6900_v41  ;;  %6036 = vmatprep.mubr.msk.f32.mxu0 %vm6574_vm5, %v6573_v32 }
 0x235   :  { %6034 = vmatprep.subr.mxu0 %v6573_v32  ;;  %6040 = vmatpush3.msra.mxu1 %v6847_v36 }
 0x236   :  { %6035 = vmatpush3.msra.mxu0 %v6927_v44  ;;  %6041 = vmatprep.subr.mxu1 %v6573_v32 }
 0x237   :  { %6037 = vmatmul.mubr.msk.f32.vlgmr.msra.gmra.mxu0 %vm204_vm6, %v1383_v51  ;;  %6046 = vmatprep.subr.mxu0 %v6573_v32 }
 0x238   :  { %6047 = vmatpush3.msra.mxu0 %v6907_v42  ;;  %6042 = vmatpush3.msra.mxu1 %v6858_v37 }
 0x239   :  { %6048 = vmatprep.subr.mxu0 %v6573_v32  ;;  %6043 = vmatprep.mubr.msk.f32.mxu1 %vm6574_vm5, %v6573_v32 }
 0x23a   :  { %6049 = vmatpush3.msra.mxu0 %v6918_v43  ;;  %6050 = vmatprep.mubr.msk.f32.mxu0 %vm6574_vm5, %v6573_v32 }
 0x23b   :  { %6053 = vmatprep.subr.mxu1 %v6573_v32  ;;  %6060 = vmatprep.subr.mxu0 %v6573_v32 }
 0x2f3   :  { %v1453_v52 = vpop.f32.mrf.mxu0  ;;  %v1523_v53 = vpop.f32.mrf.mxu1 }
 0x2f4   :  { %v1454_v54 = vadd.f32 %v7018_v12, %v1453_v52  ;;  %v1524_v62 = vadd.f32 %v7028_v23, %v1523_v53  ;;  %v1866_v53 = vld [vmem:[#allocation2 + $0x98] sm:$0xff] }
 0x2f5   :  { %v6024_v57 = vpop.f32.mrf.mxu0  ;;  %v6031_v58 = vpop.f32.mrf.mxu1 }
 0x2f6   :  { %v1599_v59 = vadd.f32 %v1598_v55, %v1454_v54  ;;  %v1608_v1 = vadd.f32 %v1607_v0, %v1524_v62 }
 0x2f7   :  { %v1593_v60 = vpop.f32.mrf.mxu0 }
 0x2f8   :  { %v5529_v61 = vmul.f32 -1.442695, %v1599_v59  ;;  %v5530_v2 = vmul.f32 -1.442695, %v1608_v1  ;;  %v1594_v9 = vadd.f32 %v7041_v56, %v1593_v60 }
 0x2f9   :  { %v6038_v63 = vpop.f32.mrf.mxu0 }
 0x2fa   :  { %6400 = vpow2.f32 %v5529_v61  ;;  %v7154_v61 = vpop.permute.xlu1 %1877 }
 0x2fb   :  { %6402 = vpow2.f32 %v5530_v2  ;;  %vm1879_vm14 = vcmp.eq.s32.totalorder %v7154_v61, 1 }
 0x307   :  { %v6401_v3 = vpop.eup %6400 }
 0x308   :  { %v1603_v6 = vadd.f32 1.0, %v6401_v3  ;;  %v6403_v7 = vpop.eup %6402 }
 0x309   :  { %v1612_v8 = vadd.f32 1.0, %v6403_v7 }
 0x30a   :  { %6404 = vrcp.f32 %v1603_v6  ;;  %v2098_v6 = vld [vmem:[#allocation2 + $0x20] sm:$0xff] }
 0x30b   :  { %6406 = vrcp.f32 %v1612_v8 }
 0x317   :  { %v6405_v10 = vpop.eup %6404 }
 0x318   :  { %v1617_v11 = vmul.f32 %v6405_v10, %v1594_v9  ;;  %v6407_v15 = vpop.eup %6406 }
 0x319   :  { %v1620_v16 = vsub.f32 1.0, %v6407_v15  ;;  %v1622_v21 = vmul.f32 %v6407_v15, %v1383_v51  ;;  %v2107_v15 = vld [vmem:[#allocation2 + $0x60] sm:$0xff] }
 0x31a   :  { %v1618_v14 = vadd.f32 %v1617_v11, %v1616_v13 }
 0x31c   :  { %6408 = vtanh.f32 %v1618_v14 }
 0x329   :  { %v6409_v18 = vpop.eup %6408 }
 0x32a   :  { %v1621_v20 = vmul.f32 %v6409_v18, %v1620_v16 }
 0x32c   :  { %v1623_v22 = vadd.f32 %v1622_v21, %v1621_v20 }
 0x32e   :  { %v1630_v24 = vsel %vm1629_vm13, %v1623_v22, 0.0  ;;  %v1633_v25 = vsel %vm1629_vm13, %v1623_v22, %v1383_v51 }
 0x32f   :  { %1632 = vst.msk [vmem:[#allocation4 + $0x10] sm:$0xff] %vm204_vm6, %v1630_v24  ;;  %6044 = vmatmul.mubr.msk.f32.vlgmr.msra.gmra.mxu1 %vm204_vm6, %v1633_v25  ;;  %6051 = vmatmul.mubr.msk.f32.vlgmr.msra.gmra.mxu0 %vm204_vm6, %v1633_v25 }
 0x330   :  { %6054 = vmatpush3.msra.mxu1 %v6900_v41  ;;  %6057 = vmatprep.mubr.msk.f32.mxu1 %vm6574_vm5, %v6573_v32 }
 0x331   :  { %6055 = vmatprep.subr.mxu1 %v6573_v32  ;;  %6061 = vmatpush3.msra.mxu0 %v6847_v36 }
 0x332   :  { %6056 = vmatpush3.msra.mxu1 %v6927_v44  ;;  %6062 = vmatprep.subr.mxu0 %v6573_v32 }
 0x333   :  { %6058 = vmatmul.mubr.msk.f32.vlgmr.msra.gmra.mxu1 %vm204_vm6, %v1633_v25  ;;  %6067 = vmatprep.subr.mxu1 %v6573_v32 }
 0x334   :  { %6068 = vmatpush3.msra.mxu1 %v6907_v42  ;;  %6063 = vmatpush3.msra.mxu0 %v6858_v37 }
 0x335   :  { %6069 = vmatprep.subr.mxu1 %v6573_v32  ;;  %6064 = vmatprep.mubr.msk.f32.mxu0 %vm6574_vm5, %v6573_v32 }
 0x336   :  { %6070 = vmatpush3.msra.mxu1 %v6918_v43  ;;  %6071 = vmatprep.mubr.msk.f32.mxu1 %vm6574_vm5, %v6573_v32 }
 0x337   :  { %6074 = vmatprep.subr.mxu0 %v6573_v32  ;;  %6081 = vmatprep.subr.mxu1 %v6573_v32 }
 0x3ef   :  { %v1703_v26 = vpop.f32.mrf.mxu1  ;;  %v1773_v17 = vpop.f32.mrf.mxu0 }
 0x3f0   :  { %v1704_v27 = vadd.f32 %v7018_v12, %v1703_v26  ;;  %v1774_v34 = vadd.f32 %v7028_v23, %v1773_v17 }
 0x3f1   :  { %v6045_v28 = vpop.f32.mrf.mxu1  ;;  %v6052_v29 = vpop.f32.mrf.mxu0 }
 0x3f2   :  { %v1849_v30 = vadd.f32 %v1848_v5, %v1704_v27  ;;  %v1858_v39 = vadd.f32 %v1857_v38, %v1774_v34  ;;  %v2116_v27 = vld [vmem:[#allocation2 + $0xa0] sm:$0xff]  ;;  %v7186_v34 = vpop.permute.xlu0 %2127 }
 0x3f3   :  { %v1843_v31 = vpop.f32.mrf.mxu1  ;;  %vm2129_vm15 = vcmp.eq.s32.totalorder %v7186_v34, 1 }
 0x3f4   :  { %v5534_v33 = vmul.f32 -1.442695, %v1849_v30  ;;  %v5535_v40 = vmul.f32 -1.442695, %v1858_v39  ;;  %v1844_v50 = vadd.f32 %v7041_v56, %v1843_v31 }
 0x3f5   :  { %v6059_v35 = vpop.f32.mrf.mxu1 }
 0x3f6   :  { %6410 = vpow2.f32 %v5534_v33 }
 0x3f7   :  { %6412 = vpow2.f32 %v5535_v40 }
 0x403   :  { %v6411_v45 = vpop.eup %6410 }
 0x404   :  { %v1853_v46 = vadd.f32 1.0, %v6411_v45  ;;  %v6413_v47 = vpop.eup %6412 }
 0x405   :  { %v1862_v49 = vadd.f32 1.0, %v6413_v47 }
 0x406   :  { %6414 = vrcp.f32 %v1853_v46 }
 0x407   :  { %6416 = vrcp.f32 %v1862_v49 }
 0x413   :  { %v6415_v51 = vpop.eup %6414 }
 0x414   :  { %v1867_v52 = vmul.f32 %v6415_v51, %v1844_v50  ;;  %v6417_v55 = vpop.eup %6416  ;;  %v2357_v50 = vld [vmem:[#allocation2 + $0x68] sm:$0xff] }
 0x415   :  { %v1870_v57 = vsub.f32 1.0, %v6417_v55  ;;  %v1872_v60 = vmul.f32 %v6417_v55, %v1633_v25 }
 0x416   :  { %v1868_v54 = vadd.f32 %v1867_v52, %v1866_v53 }
 0x418   :  { %6418 = vtanh.f32 %v1868_v54 }
 0x425   :  { %v6419_v58 = vpop.eup %6418 }
 0x426   :  { %v1871_v59 = vmul.f32 %v6419_v58, %v1870_v57 }
 0x428   :  { %v1873_v62 = vadd.f32 %v1872_v60, %v1871_v59 }
 0x42a   :  { %v1880_v63 = vsel %vm1879_vm14, %v1873_v62, 0.0  ;;  %v1883_v0 = vsel %vm1879_vm14, %v1873_v62, %v1633_v25  ;;  %v2366_v62 = vld [vmem:[#allocation2 + $0xa8] sm:$0xff] }
 0x42b   :  { %1882 = vst.msk [vmem:[#allocation4 + $0x18] sm:$0xff] %vm204_vm6, %v1880_v63  ;;  %6065 = vmatmul.mubr.msk.f32.vlgmr.msra.gmra.mxu0 %vm204_vm6, %v1883_v0  ;;  %6072 = vmatmul.mubr.msk.f32.vlgmr.msra.gmra.mxu1 %vm204_vm6, %v1883_v0 }
 0x42c   :  { %6075 = vmatpush3.msra.mxu0 %v6900_v41  ;;  %6078 = vmatprep.mubr.msk.f32.mxu0 %vm6574_vm5, %v6573_v32 }
 0x42d   :  { %6076 = vmatprep.subr.mxu0 %v6573_v32  ;;  %6082 = vmatpush3.msra.mxu1 %v6847_v36 }
 0x42e   :  { %6077 = vmatpush3.msra.mxu0 %v6927_v44  ;;  %6083 = vmatprep.subr.mxu1 %v6573_v32 }
 0x42f   :  { %6079 = vmatmul.mubr.msk.f32.vlgmr.msra.gmra.mxu0 %vm204_vm6, %v1883_v0  ;;  %6088 = vmatprep.subr.mxu0 %v6573_v32 }
 0x430   :  { %6089 = vmatpush3.msra.mxu0 %v6907_v42  ;;  %6084 = vmatpush3.msra.mxu1 %v6858_v37 }
 0x431   :  { %6090 = vmatprep.subr.mxu0 %v6573_v32  ;;  %6085 = vmatprep.mubr.msk.f32.mxu1 %vm6574_vm5, %v6573_v32 }
 0x432   :  { %6091 = vmatpush3.msra.mxu0 %v6918_v43  ;;  %6092 = vmatprep.mubr.msk.f32.mxu0 %vm6574_vm5, %v6573_v32 }
 0x433   :  { %6095 = vmatprep.subr.mxu1 %v6573_v32  ;;  %6102 = vmatprep.subr.mxu0 %v6573_v32 }
 0x4eb   :  { %v1953_v1 = vpop.f32.mrf.mxu0  ;;  %v2023_v2 = vpop.f32.mrf.mxu1 }
 0x4ec   :  { %v1954_v3 = vadd.f32 %v7018_v12, %v1953_v1  ;;  %v2024_v13 = vadd.f32 %v7028_v23, %v2023_v2 }
 0x4ed   :  { %v6066_v7 = vpop.f32.mrf.mxu0  ;;  %v6073_v8 = vpop.f32.mrf.mxu1 }
 0x4ee   :  { %v2099_v9 = vadd.f32 %v2098_v6, %v1954_v3  ;;  %v2108_v16 = vadd.f32 %v2107_v15, %v2024_v13  ;;  %v7218_v7 = vpop.permute.xlu1 %2377  ;;  %v6545_v13 = vld [vmem:[%s7753_s4 + $0x8] sm:$0xff]  ;;  %v6547_v15 = vld [vmem:[%s7753_s4 + $0x18] sm:$0xff] }
 0x4ef   :  { %v2093_v10 = vpop.f32.mrf.mxu0  ;;  %vm2379_vm1 = vcmp.eq.s32.totalorder %v7218_v7, 1 }
 0x4f0   :  { %v5539_v11 = vmul.f32 -1.442695, %v2099_v9  ;;  %v5540_v18 = vmul.f32 -1.442695, %v2108_v16  ;;  %v2094_v25 = vadd.f32 %v7041_v56, %v2093_v10  ;;  %v6548_v16 = vld [vmem:[%s7753_s4] sm:$0xff] }
 0x4f1   :  { %v6080_v14 = vpop.f32.mrf.mxu0 }
 0x4f2   :  { %6420 = vpow2.f32 %v5539_v11  ;;  %v7235_v11 = vld [vmem:[%s7753_s4 + $0x28] sm:$0xff]  ;;  %v6546_v14 = vld [vmem:[%s7753_s4 + $0x20] sm:$0xff] }
 0x4f3   :  { %6422 = vpow2.f32 %v5540_v18  ;;  %v6549_v18 = vld [vmem:[%s7753_s4 + $0x10] sm:$0xff] }
 0x4ff   :  { %v6421_v20 = vpop.eup %6420 }
 0x500   :  { %v2103_v21 = vadd.f32 1.0, %v6421_v20  ;;  %v6423_v22 = vpop.eup %6422 }
 0x501   :  { %v2112_v24 = vadd.f32 1.0, %v6423_v22 }
 0x502   :  { %6424 = vrcp.f32 %v2103_v21 }
 0x503   :  { %6426 = vrcp.f32 %v2112_v24  ;;  %v2598_v24 = vld [vmem:[#allocation2 + $0x30] sm:$0xff] }
 0x50f   :  { %v6425_v26 = vpop.eup %6424 }
 0x510   :  { %v2117_v17 = vmul.f32 %v6425_v26, %v2094_v25  ;;  %v6427_v28 = vpop.eup %6426 }
 0x511   :  { %v2120_v29 = vsub.f32 1.0, %v6427_v28  ;;  %v2122_v33 = vmul.f32 %v6427_v28, %v1883_v0 }
 0x512   :  { %v2118_v5 = vadd.f32 %v2117_v17, %v2116_v27 }
 0x514   :  { %6428 = vtanh.f32 %v2118_v5 }
 0x521   :  { %v6429_v30 = vpop.eup %6428 }
 0x522   :  { %v2121_v31 = vmul.f32 %v6429_v30, %v2120_v29  ;;  %v2607_v30 = vld [vmem:[#allocation2 + $0x70] sm:$0xff] }
 0x524   :  { %v2123_v35 = vadd.f32 %v2122_v33, %v2121_v31 }
 0x526   :  { %v2130_v38 = vsel %vm2129_vm15, %v2123_v35, 0.0  ;;  %v2133_v39 = vsel %vm2129_vm15, %v2123_v35, %v1883_v0 }
 0x527   :  { %2132 = vst.msk [vmem:[#allocation4 + $0x20] sm:$0xff] %vm204_vm6, %v2130_v38  ;;  %6086 = vmatmul.mubr.msk.f32.vlgmr.msra.gmra.mxu1 %vm204_vm6, %v2133_v39  ;;  %6093 = vmatmul.mubr.msk.f32.vlgmr.msra.gmra.mxu0 %vm204_vm6, %v2133_v39 }
 0x528   :  { %6096 = vmatpush3.msra.mxu1 %v6900_v41  ;;  %6099 = vmatprep.mubr.msk.f32.mxu1 %vm6574_vm5, %v6573_v32 }
 0x529   :  { %6097 = vmatprep.subr.mxu1 %v6573_v32  ;;  %6103 = vmatpush3.msra.mxu0 %v6847_v36 }
 0x52a   :  { %6098 = vmatpush3.msra.mxu1 %v6927_v44  ;;  %6104 = vmatprep.subr.mxu0 %v6573_v32  ;;  %v2348_v44 = vld [vmem:[#allocation2 + $0x28] sm:$0xff] }
 0x52b   :  { %6100 = vmatmul.mubr.msk.f32.vlgmr.msra.gmra.mxu1 %vm204_vm6, %v2133_v39  ;;  %6109 = vmatprep.subr.mxu1 %v6573_v32 }
 0x52c   :  { %6110 = vmatpush3.msra.mxu1 %v6907_v42  ;;  %6105 = vmatpush3.msra.mxu0 %v6858_v37 }
 0x52d   :  { %6111 = vmatprep.subr.mxu1 %v6573_v32  ;;  %6106 = vmatprep.mubr.msk.f32.mxu0 %vm6574_vm5, %v6573_v32 }
 0x52e   :  { %6112 = vmatpush3.msra.mxu1 %v6918_v43  ;;  %6113 = vmatprep.mubr.msk.f32.mxu1 %vm6574_vm5, %v6573_v32 }
 0x52f   :  { %6116 = vmatprep.subr.mxu0 %v6573_v32  ;;  %6123 = vmatprep.subr.mxu1 %v6573_v32 }
 0x5e7   :  { %v2203_v36 = vpop.f32.mrf.mxu1  ;;  %v2273_v41 = vpop.f32.mrf.mxu0 }
 0x5e8   :  { %v2204_v42 = vadd.f32 %v7018_v12, %v2203_v36  ;;  %v2274_v49 = vadd.f32 %v7028_v23, %v2273_v41 }
 0x5e9   :  { %v6087_v37 = vpop.f32.mrf.mxu1  ;;  %v6094_v40 = vpop.f32.mrf.mxu0 }
 0x5ea   :  { %v2349_v45 = vadd.f32 %v2348_v44, %v2204_v42  ;;  %v2358_v51 = vadd.f32 %v2357_v50, %v2274_v49  ;;  %v2616_v37 = vld [vmem:[#allocation2 + $0xb0] sm:$0xff]  ;;  %v7270_v49 = vpop.permute.xlu0 %2627 }
 0x5eb   :  { %v2343_v46 = vpop.f32.mrf.mxu1  ;;  %vm2629_vm2 = vcmp.eq.s32.totalorder %v7270_v49, 1 }
 0x5ec   :  { %v5544_v47 = vmul.f32 -1.442695, %v2349_v45  ;;  %v5545_v52 = vmul.f32 -1.442695, %v2358_v51  ;;  %v2344_v58 = vadd.f32 %v7041_v56, %v2343_v46 }
 0x5ed   :  { %v6101_v43 = vpop.f32.mrf.mxu1 }
 0x5ee   :  { %6430 = vpow2.f32 %v5544_v47 }
 0x5ef   :  { %6432 = vpow2.f32 %v5545_v52  ;;  %v7277_v52 = vld [vmem:[%s7757_s8 + $0x8] sm:$0xff] }
 0x5fb   :  { %v6431_v53 = vpop.eup %6430 }
 0x5fc   :  { %v2353_v54 = vadd.f32 1.0, %v6431_v53  ;;  %v6433_v55 = vpop.eup %6432 }
 0x5fd   :  { %v2362_v57 = vadd.f32 1.0, %v6433_v55  ;;  %v7296_v55 = vld [vmem:[%s7757_s8] sm:$0xff] }
 0x5fe   :  { %6434 = vrcp.f32 %v2353_v54 }
 0x5ff   :  { %6436 = vrcp.f32 %v2362_v57  ;;  %v7308_v57 = vld [vmem:[%s7757_s8 + $0x18] sm:$0xff] }
 0x60b   :  { %v6435_v59 = vpop.eup %6434 }
 0x60c   :  { %v2367_v60 = vmul.f32 %v6435_v59, %v2344_v58  ;;  %v6437_v0 = vpop.eup %6436  ;;  %v7316_v58 = vld [vmem:[%s7757_s8 + $0x28] sm:$0xff]  ;;  %v7322_v59 = vld [vmem:[%s7757_s8 + $0x10] sm:$0xff] }
 0x60d   :  { %v2370_v1 = vsub.f32 1.0, %v6437_v0  ;;  %v2372_v6 = vmul.f32 %v6437_v0, %v2133_v39 }
 0x60e   :  { %v2368_v63 = vadd.f32 %v2367_v60, %v2366_v62  ;;  %v7331_v60 = vld [vmem:[%s7757_s8 + $0x20] sm:$0xff] }
 0x610   :  { %6438 = vtanh.f32 %v2368_v63 }
 0x61d   :  { %v6439_v2 = vpop.eup %6438 }
 0x61e   :  { %v2371_v3 = vmul.f32 %v6439_v2, %v2370_v1  ;;  %v2848_v1 = vld [vmem:[#allocation2 + $0x38] sm:$0xff] }
 0x620   :  { %v2373_v8 = vadd.f32 %v2372_v6, %v2371_v3 }
 0x622   :  { %v2380_v9 = vsel %vm2379_vm1, %v2373_v8, 0.0  ;;  %v7225_v10 = vsel %vm2379_vm1, %v2373_v8, %v2133_v39  ;;  %v7360_v8 = vld [vmem:[%s7759_s10] ss:$0 sm:$0xff] }
 0x623   :  { %2382 = vst.msk [vmem:[#allocation4 + $0x28] sm:$0xff] %vm204_vm6, %v2380_v9  ;;  %6107 = vmatmul.mubr.msk.f32.vlgmr.msra.gmra.mxu0 %vm204_vm6, %v7225_v10  ;;  %6114 = vmatmul.mubr.msk.f32.vlgmr.msra.gmra.mxu1 %vm204_vm6, %v7225_v10 }
 0x624   :  { %6117 = vmatpush3.msra.mxu0 %v7235_v11  ;;  %6120 = vmatprep.mubr.msk.f32.mxu0 %vm6574_vm5, %v6573_v32 }
 0x625   :  { %6118 = vmatprep.subr.mxu0 %v6573_v32  ;;  %6124 = vmatpush3.msra.mxu1 %v6545_v13 }
 0x626   :  { %6119 = vmatpush3.msra.mxu0 %v6546_v14  ;;  %6125 = vmatprep.subr.mxu1 %v6573_v32 }
 0x627   :  { %6121 = vmatmul.mubr.msk.f32.vlgmr.msra.gmra.mxu0 %vm204_vm6, %v7225_v10  ;;  %6130 = vmatprep.subr.mxu0 %v6573_v32 }
 0x628   :  { %6131 = vmatpush3.msra.mxu0 %v6547_v15  ;;  %6126 = vmatpush3.msra.mxu1 %v6548_v16  ;;  %v3112_v15 = vld [vmem:[#allocation3 + $0x38] sm:$0xff] }
 0x629   :  { %6132 = vmatprep.subr.mxu0 %v6573_v32  ;;  %6127 = vmatprep.mubr.msk.f32.mxu1 %vm6574_vm5, %v6573_v32 }
 0x62a   :  { %6133 = vmatpush3.msra.mxu0 %v6549_v18  ;;  %6134 = vmatprep.mubr.msk.f32.mxu0 %vm6574_vm5, %v6573_v32  ;;  %v2857_v18 = vld [vmem:[#allocation2 + $0x78] sm:$0xff] }
 0x62b   :  { %6137 = vmatprep.subr.mxu1 %v6573_v32  ;;  %6144 = vmatprep.subr.mxu0 %v6573_v32 }
 0x6e3   :  { %v2453_v20 = vpop.f32.mrf.mxu0  ;;  %v2523_v21 = vpop.f32.mrf.mxu1 }
 0x6e4   :  { %v2454_v22 = vadd.f32 %v7018_v12, %v2453_v20  ;;  %v2524_v28 = vadd.f32 %v7028_v23, %v2523_v21  ;;  %v7367_v21 = vld [vmem:[%s7759_s10 + $0x1] ss:$0 sm:$0xff] }
 0x6e5   :  { %v6108_v25 = vpop.f32.mrf.mxu0  ;;  %v6115_v26 = vpop.f32.mrf.mxu1 }
 0x6e6   :  { %v2599_v17 = vadd.f32 %v2598_v24, %v2454_v22  ;;  %v2608_v31 = vadd.f32 %v2607_v30, %v2524_v28 }
 0x6e7   :  { %v2593_v27 = vpop.f32.mrf.mxu0 }
 0x6e8   :  { %v5549_v5 = vmul.f32 -1.442695, %v2599_v17  ;;  %v5550_v33 = vmul.f32 -1.442695, %v2608_v31  ;;  %v2594_v41 = vadd.f32 %v7041_v56, %v2593_v27 }
 0x6e9   :  { %v6122_v29 = vpop.f32.mrf.mxu0 }
 0x6ea   :  { %6440 = vpow2.f32 %v5549_v5  ;;  %v3121_v5 = vld [vmem:[#allocation3 + $0x78] sm:$0xff] }
 0x6eb   :  { %6442 = vpow2.f32 %v5550_v33 }
 0x6f7   :  { %v6441_v35 = vpop.eup %6440 }
 0x6f8   :  { %v2603_v38 = vadd.f32 1.0, %v6441_v35  ;;  %v6443_v39 = vpop.eup %6442 }
 0x6f9   :  { %v2612_v36 = vadd.f32 1.0, %v6443_v39 }
 0x6fa   :  { %6444 = vrcp.f32 %v2603_v38 }
 0x6fb   :  { %6446 = vrcp.f32 %v2612_v36 }
 0x707   :  { %v6445_v42 = vpop.eup %6444 }
 0x708   :  { %v2617_v44 = vmul.f32 %v6445_v42, %v2594_v41  ;;  %v6447_v45 = vpop.eup %6446 }
 0x709   :  { %v2620_v46 = vsub.f32 1.0, %v6447_v45  ;;  %v2622_v50 = vmul.f32 %v6447_v45, %v7225_v10  ;;  %v2866_v45 = vld [vmem:[#allocation2 + $0xb8] sm:$0xff] }
 0x70a   :  { %v2618_v40 = vadd.f32 %v2617_v44, %v2616_v37  ;;  %v7374_v44 = vld [vmem:[%s7759_s10 + $0x2] ss:$0 sm:$0xff] }
 0x70c   :  { %6448 = vtanh.f32 %v2618_v40 }
 0x719   :  { %v6449_v47 = vpop.eup %6448 }
 0x71a   :  { %v2621_v43 = vmul.f32 %v6449_v47, %v2620_v46 }
 0x71c   :  { %v2623_v51 = vadd.f32 %v2622_v50, %v2621_v43 }
 0x71e   :  { %v2630_v53 = vsel %vm2629_vm2, %v2623_v51, 0.0  ;;  %v7284_v54 = vsel %vm2629_vm2, %v2623_v51, %v7225_v10 }
 0x71f   :  { %2632 = vst.msk [vmem:[#allocation4 + $0x30] sm:$0xff] %vm204_vm6, %v2630_v53  ;;  %6128 = vmatmul.mubr.msk.f32.vlgmr.msra.gmra.mxu1 %vm204_vm6, %v7284_v54  ;;  %6135 = vmatmul.mubr.msk.f32.vlgmr.msra.gmra.mxu0 %vm204_vm6, %v7284_v54  ;;  %v3130_v53 = vld [vmem:[#allocation3 + $0xb8] sm:$0xff] }
 0x720   :  { %6138 = vmatpush3.msra.mxu1 %v7235_v11  ;;  %6145 = vmatpush3.msra.mxu0 %v7277_v52 }
 0x721   :  { %6139 = vmatprep.subr.mxu1 %v6573_v32  ;;  %6146 = vmatprep.subr.mxu0 %v6573_v32 }
 0x722   :  { %6140 = vmatpush3.msra.mxu1 %v6546_v14  ;;  %6141 = vmatprep.mubr.msk.f32.mxu1 %vm6574_vm5, %v6573_v32 }
 0x723   :  { %6147 = vmatpush3.msra.mxu0 %v7296_v55  ;;  %6148 = vmatprep.mubr.msk.f32.mxu0 %vm6574_vm5, %v6573_v32 }
 0x724   :  { %6142 = vmatmul.mubr.msk.f32.vlgmr.msra.gmra.mxu1 %vm204_vm6, %v7284_v54  ;;  %6149 = vmatmul.mubr.f32.vlgmr.msra.gmra.mxu0 %v6573_v32 }
 0x725   :  { %6151 = vmatprep.subr.mxu1 %v6573_v32  ;;  %6155 = vmatprep.mubr.msk.f32.mxu1 %vm6574_vm5, %v6573_v32 }
 0x726   :  { %6152 = vmatpush3.msra.mxu1 %v7308_v57  ;;  %6158 = vmatprep.subr.mxu0 %v6573_v32 }
 0x727   :  { %6153 = vmatprep.subr.mxu1 %v6573_v32  ;;  %6159 = vmatpush3.msra.mxu0 %v7316_v58 }
 0x728   :  { %6154 = vmatpush3.msra.mxu1 %v7322_v59  ;;  %6160 = vmatprep.subr.mxu0 %v6573_v32 }
 0x729   :  { %6156 = vmatmul.mubr.f32.vlgmr.msra.gmra.mxu1 %v6573_v32  ;;  %6161 = vmatpush3.msra.mxu0 %v7331_v60 }
 0x72a   :  { %6162 = vmatprep.mubr.msk.f32.mxu0 %vm6574_vm5, %v6573_v32  ;;  %6165 = vmatprep.subr.mxu1 %v6573_v32 }
 0x72b   :  { %6163 = vmatmul.mubr.f32.vlgmr.msra.gmra.mxu0 %v6573_v32  ;;  %6172 = vmatprep.subr.mxu0 %v6573_v32 }
 0x72c   :  { %6166 = vmatpush3.msra.mxu1 %v7277_v52  ;;  %6173 = vmatpush3.msra.mxu0 %v7308_v57 }
 0x72d   :  { %6167 = vmatprep.subr.mxu1 %v6573_v32  ;;  %6174 = vmatprep.subr.mxu0 %v6573_v32 }
 0x72e   :  { %6168 = vmatpush3.msra.mxu1 %v7296_v55  ;;  %6169 = vmatprep.mubr.msk.f32.mxu1 %vm6574_vm5, %v6573_v32 }
 0x72f   :  { %6175 = vmatpush3.msra.mxu0 %v7322_v59  ;;  %6176 = vmatprep.mubr.msk.f32.mxu0 %vm6574_vm5, %v6573_v32 }
 0x730   :  { %6179 = vmatprep.subr.mxu1 %v6573_v32  ;;  %6186 = vmatprep.subr.mxu0 %v6573_v32 }
 0x7df   :  { %v2703_v62 = vpop.f32.mrf.mxu1  ;;  %v2773_v63 = vpop.f32.mrf.mxu0 }
 0x7e0   :  { %v2704_v0 = vadd.f32 %v7018_v12, %v2703_v62  ;;  %v2774_v10 = vadd.f32 %v7028_v23, %v2773_v63 }
 0x7e1   :  { %v6129_v2 = vpop.f32.mrf.mxu1  ;;  %v6136_v3 = vpop.f32.mrf.mxu0 }
 0x7e2   :  { %v2849_v6 = vadd.f32 %v2848_v1, %v2704_v0  ;;  %v2858_v22 = vadd.f32 %v2857_v18, %v2774_v10  ;;  %v2878_v2 = vpop.permute.xlu1 %2877 }
 0x7e3   :  { %vm2879_vm3 = vcmp.eq.s32.totalorder %v2878_v2, 1 }
 0x7e4   :  { %v5554_v9 = vmul.f32 -1.442695, %v2849_v6  ;;  %v2843_v11 = vpop.f32.mrf.mxu1  ;;  %v2955_v13 = vpop.f32.mrf.mxu0  ;;  %v5555_v27 = vmul.f32 -1.442695, %v2858_v22  ;;  %v3355_v22 = vld [vmem:[#allocation3 + $0x30] sm:$0xff] }
 0x7e5   :  { %v2956_v14 = vadd.f32 %v7360_v8, %v2955_v13  ;;  %v2844_v42 = vadd.f32 %v7041_v56, %v2843_v11 }
 0x7e6   :  { %6450 = vpow2.f32 %v5554_v9  ;;  %v6143_v16 = vpop.f32.mrf.mxu1  ;;  %v6150_v12 = vpop.f32.mrf.mxu0 }
 0x7e7   :  { %v3113_v20 = vadd.f32 %v3112_v15, %v2956_v14 }
 0x7e9   :  { %v5559_v24 = vmul.f32 -1.442695, %v3113_v20  ;;  %v3031_v25 = vpop.f32.mrf.mxu1 }
 0x7ea   :  { %v3032_v23 = vadd.f32 %v7367_v21, %v3031_v25 }
 0x7eb   :  { %6452 = vpow2.f32 %v5559_v24  ;;  %v6157_v26 = vpop.f32.mrf.mxu1  ;;  %v3107_v17 = vpop.f32.mrf.mxu0 }
 0x7ec   :  { %v3122_v28 = vadd.f32 %v3121_v5, %v3032_v23  ;;  %6454 = vpow2.f32 %v5555_v27  ;;  %v3108_v47 = vadd.f32 %v7374_v44, %v3107_v17 }
 0x7ed   :  { %v6164_v29 = vpop.f32.mrf.mxu0 }
 0x7ee   :  { %v5560_v30 = vmul.f32 -1.442695, %v3122_v28  ;;  %v3364_v28 = vld [vmem:[#allocation3 + $0x70] sm:$0xff] }
 0x7f0   :  { %6456 = vpow2.f32 %v5560_v30 }
 0x7f3   :  { %v6451_v31 = vpop.eup %6450 }
 0x7f4   :  { %v2853_v33 = vadd.f32 1.0, %v6451_v31 }
 0x7f6   :  { %6458 = vrcp.f32 %v2853_v33 }
 0x7f8   :  { %v6453_v35 = vpop.eup %6452 }
 0x7f9   :  { %v3117_v38 = vadd.f32 1.0, %v6453_v35  ;;  %v6455_v39 = vpop.eup %6454 }
 0x7fa   :  { %v2862_v36 = vadd.f32 1.0, %v6455_v39 }
 0x7fb   :  { %6460 = vrcp.f32 %v3117_v38 }
 0x7fc   :  { %6462 = vrcp.f32 %v2862_v36 }
 0x7fd   :  { %v6457_v41 = vpop.eup %6456 }
 0x7fe   :  { %v3126_v46 = vadd.f32 1.0, %v6457_v41 }
 0x803   :  { %v6459_v37 = vpop.eup %6458 }
 0x804   :  { %v2867_v40 = vmul.f32 %v6459_v37, %v2844_v42  ;;  %v3373_v42 = vld [vmem:[#allocation3 + $0xb0] sm:$0xff] }
 0x806   :  { %v2868_v43 = vadd.f32 %v2867_v40, %v2866_v45 }
 0x808   :  { %v6461_v50 = vpop.eup %6460  ;;  %6464 = vtanh.f32 %v2868_v43 }
 0x809   :  { %6466 = vrcp.f32 %v3126_v46  ;;  %v3131_v51 = vmul.f32 %v6461_v50, %v3108_v47  ;;  %v6463_v56 = vpop.eup %6462 }
 0x80a   :  { %v2870_v63 = vsub.f32 1.0, %v6463_v56  ;;  %v2872_v3 = vmul.f32 %v6463_v56, %v7284_v54 }
 0x80b   :  { %v3132_v62 = vadd.f32 %v3131_v51, %v3130_v53 }
 0x80d   :  { %6468 = vtanh.f32 %v3132_v62 }
 0x815   :  { %v6465_v0 = vpop.eup %6464 }
 0x816   :  { %v6467_v1 = vpop.eup %6466  ;;  %v2871_v6 = vmul.f32 %v6465_v0, %v2870_v63  ;;  %v3599_v63 = vld [vmem:[#allocation3 + $0x28] sm:$0xff] }
 0x817   :  { %v3134_v10 = vsub.f32 1.0, %v6467_v1  ;;  %v3136_v15 = vmul.f32 0.0, %v6467_v1 }
 0x818   :  { %v2873_v9 = vadd.f32 %v2872_v3, %v2871_v6 }
 0x81a   :  { %v6469_v11 = vpop.eup %6468  ;;  %v2880_v13 = vsel %vm2879_vm3, %v2873_v9, 0.0 }
 0x81b   :  { %2882 = vst.msk [vmem:[#allocation4 + $0x38] sm:$0xff] %vm204_vm6, %v2880_v13  ;;  %v3135_v14 = vmul.f32 %v6469_v11, %v3134_v10  ;;  %v3608_v11 = vld [vmem:[#allocation3 + $0x68] sm:$0xff] }
 0x81d   :  { %v3137_v16 = vadd.f32 %v3136_v15, %v3135_v14 }
 0x81f   :  { %v3138_v12 = vsel %vm2879_vm3, %v3137_v16, 0.0 }
 0x820   :  { %3140 = vst.msk [vmem:[#allocation5 + $0x38] sm:$0xff] %vm204_vm6, %v3138_v12  ;;  %6170 = vmatmul.mubr.msk.f32.vlgmr.msra.gmra.mxu1 %vm204_vm6, %v3138_v12  ;;  %6177 = vmatmul.mubr.msk.f32.vlgmr.msra.gmra.mxu0 %vm204_vm6, %v3138_v12 }
 0x821   :  { %6180 = vmatpush3.msra.mxu1 %v7316_v58  ;;  %6183 = vmatprep.mubr.msk.f32.mxu1 %vm6574_vm5, %v6573_v32 }
 0x822   :  { %6181 = vmatprep.subr.mxu1 %v6573_v32  ;;  %6187 = vmatpush3.msra.mxu0 %v7277_v52 }
 0x823   :  { %6182 = vmatpush3.msra.mxu1 %v7331_v60  ;;  %6188 = vmatprep.subr.mxu0 %v6573_v32 }
 0x824   :  { %6184 = vmatmul.mubr.msk.f32.vlgmr.msra.gmra.mxu1 %vm204_vm6, %v3138_v12  ;;  %6193 = vmatprep.subr.mxu1 %v6573_v32 }
 0x825   :  { %6194 = vmatpush3.msra.mxu1 %v7308_v57  ;;  %6189 = vmatpush3.msra.mxu0 %v7296_v55 }
 0x826   :  { %6195 = vmatprep.subr.mxu1 %v6573_v32  ;;  %6190 = vmatprep.mubr.msk.f32.mxu0 %vm6574_vm5, %v6573_v32 }
 0x827   :  { %6196 = vmatpush3.msra.mxu1 %v7322_v59  ;;  %6197 = vmatprep.mubr.msk.f32.mxu1 %vm6574_vm5, %v6573_v32 }
 0x828   :  { %6200 = vmatprep.subr.mxu0 %v6573_v32  ;;  %6207 = vmatprep.subr.mxu1 %v6573_v32 }
 0x8e0   :  { %v3210_v54 = vpop.f32.mrf.mxu1  ;;  %v3280_v18 = vpop.f32.mrf.mxu0 }
 0x8e1   :  { %v3211_v20 = vadd.f32 %v7360_v8, %v3210_v54  ;;  %v3281_v27 = vadd.f32 %v7367_v21, %v3280_v18 }
 0x8e2   :  { %v6171_v24 = vpop.f32.mrf.mxu1  ;;  %v6178_v25 = vpop.f32.mrf.mxu0 }
 0x8e3   :  { %v3356_v23 = vadd.f32 %v3355_v22, %v3211_v20  ;;  %v3365_v29 = vadd.f32 %v3364_v28, %v3281_v27  ;;  %v3617_v24 = vld [vmem:[#allocation3 + $0xa8] sm:$0xff] }
 0x8e4   :  { %v3350_v26 = vpop.f32.mrf.mxu1 }
 0x8e5   :  { %v5564_v17 = vmul.f32 -1.442695, %v3356_v23  ;;  %v5565_v30 = vmul.f32 -1.442695, %v3365_v29  ;;  %v3351_v39 = vadd.f32 %v7374_v44, %v3350_v26 }
 0x8e6   :  { %v6185_v5 = vpop.f32.mrf.mxu1 }
 0x8e7   :  { %6470 = vpow2.f32 %v5564_v17 }
 0x8e8   :  { %6472 = vpow2.f32 %v5565_v30 }
 0x8f4   :  { %v6471_v31 = vpop.eup %6470 }
 0x8f5   :  { %v3360_v33 = vadd.f32 1.0, %v6471_v31  ;;  %v6473_v35 = vpop.eup %6472 }
 0x8f6   :  { %v3369_v38 = vadd.f32 1.0, %v6473_v35  ;;  %v3843_v35 = vld [vmem:[#allocation3 + $0x20] sm:$0xff] }
 0x8f7   :  { %6474 = vrcp.f32 %v3360_v33 }
 0x8f8   :  { %6476 = vrcp.f32 %v3369_v38 }
 0x904   :  { %v6475_v36 = vpop.eup %6474 }
 0x905   :  { %v3374_v41 = vmul.f32 %v6475_v36, %v3351_v39  ;;  %v6477_v40 = vpop.eup %6476 }
 0x906   :  { %v3377_v45 = vsub.f32 1.0, %v6477_v40  ;;  %v3379_v43 = vmul.f32 %v6477_v40, %v3138_v12 }
 0x907   :  { %v3375_v37 = vadd.f32 %v3374_v41, %v3373_v42 }
 0x909   :  { %6478 = vtanh.f32 %v3375_v37 }
 0x916   :  { %v6479_v46 = vpop.eup %6478 }
 0x917   :  { %v3378_v47 = vmul.f32 %v6479_v46, %v3377_v45  ;;  %v3852_v45 = vld [vmem:[#allocation3 + $0x60] sm:$0xff] }
 0x919   :  { %v3380_v50 = vadd.f32 %v3379_v43, %v3378_v47 }
 0x91b   :  { %v3381_v51 = vsel %vm2629_vm2, %v3380_v50, 0.0  ;;  %v3384_v53 = vsel %vm2629_vm2, %v3380_v50, %v3138_v12 }
 0x91c   :  { %3383 = vst.msk [vmem:[#allocation5 + $0x30] sm:$0xff] %vm204_vm6, %v3381_v51  ;;  %6191 = vmatmul.mubr.msk.f32.vlgmr.msra.gmra.mxu0 %vm204_vm6, %v3384_v53  ;;  %6198 = vmatmul.mubr.msk.f32.vlgmr.msra.gmra.mxu1 %vm204_vm6, %v3384_v53 }
 0x91d   :  { %6201 = vmatpush3.msra.mxu0 %v7316_v58  ;;  %6204 = vmatprep.mubr.msk.f32.mxu0 %vm6574_vm5, %v6573_v32 }
 0x91e   :  { %6202 = vmatprep.subr.mxu0 %v6573_v32  ;;  %6208 = vmatpush3.msra.mxu1 %v7277_v52 }
 0x91f   :  { %6203 = vmatpush3.msra.mxu0 %v7331_v60  ;;  %6209 = vmatprep.subr.mxu1 %v6573_v32 }
 0x920   :  { %6205 = vmatmul.mubr.msk.f32.vlgmr.msra.gmra.mxu0 %vm204_vm6, %v3384_v53  ;;  %6214 = vmatprep.subr.mxu0 %v6573_v32 }
 0x921   :  { %6215 = vmatpush3.msra.mxu0 %v7308_v57  ;;  %6210 = vmatpush3.msra.mxu1 %v7296_v55 }
 0x922   :  { %6216 = vmatprep.subr.mxu0 %v6573_v32  ;;  %6211 = vmatprep.mubr.msk.f32.mxu1 %vm6574_vm5, %v6573_v32 }
 0x923   :  { %6217 = vmatpush3.msra.mxu0 %v7322_v59  ;;  %6218 = vmatprep.mubr.msk.f32.mxu0 %vm6574_vm5, %v6573_v32 }
 0x924   :  { %6221 = vmatprep.subr.mxu1 %v6573_v32  ;;  %6228 = vmatprep.subr.mxu0 %v6573_v32 }
 0x9dc   :  { %v3454_v49 = vpop.f32.mrf.mxu0  ;;  %v3524_v62 = vpop.f32.mrf.mxu1 }
 0x9dd   :  { %v3455_v56 = vadd.f32 %v7360_v8, %v3454_v49  ;;  %v3525_v9 = vadd.f32 %v7367_v21, %v3524_v62 }
 0x9de   :  { %v6192_v0 = vpop.f32.mrf.mxu0  ;;  %v6199_v1 = vpop.f32.mrf.mxu1 }
 0x9df   :  { %v3600_v2 = vadd.f32 %v3599_v63, %v3455_v56  ;;  %v3609_v13 = vadd.f32 %v3608_v11, %v3525_v9  ;;  %v3861_v63 = vld [vmem:[#allocation3 + $0xa0] sm:$0xff] }
 0x9e0   :  { %v3594_v3 = vpop.f32.mrf.mxu0 }
 0x9e1   :  { %v5569_v6 = vmul.f32 -1.442695, %v3600_v2  ;;  %v5570_v14 = vmul.f32 -1.442695, %v3609_v13  ;;  %v3595_v18 = vadd.f32 %v7374_v44, %v3594_v3 }
 0x9e2   :  { %v6206_v10 = vpop.f32.mrf.mxu0 }
 0x9e3   :  { %6480 = vpow2.f32 %v5569_v6 }
 0x9e4   :  { %6482 = vpow2.f32 %v5570_v14 }
 0x9f0   :  { %v6481_v15 = vpop.eup %6480 }
 0x9f1   :  { %v3604_v16 = vadd.f32 1.0, %v6481_v15  ;;  %v6483_v12 = vpop.eup %6482 }
 0x9f2   :  { %v3613_v54 = vadd.f32 1.0, %v6483_v12 }
 0x9f3   :  { %6484 = vrcp.f32 %v3604_v16  ;;  %v4087_v16 = vld [vmem:[#allocation3 + $0x18] sm:$0xff] }
 0x9f4   :  { %6486 = vrcp.f32 %v3613_v54 }
 0xa00   :  { %v6485_v20 = vpop.eup %6484 }
 0xa01   :  { %v3618_v22 = vmul.f32 %v6485_v20, %v3595_v18  ;;  %v6487_v23 = vpop.eup %6486 }
 0xa02   :  { %v3621_v26 = vsub.f32 1.0, %v6487_v23  ;;  %v3623_v5 = vmul.f32 %v6487_v23, %v3384_v53  ;;  %v4096_v23 = vld [vmem:[#allocation3 + $0x58] sm:$0xff] }
 0xa03   :  { %v3619_v25 = vadd.f32 %v3618_v22, %v3617_v24 }
 0xa05   :  { %6488 = vtanh.f32 %v3619_v25 }
 0xa12   :  { %v6489_v17 = vpop.eup %6488 }
 0xa13   :  { %v3622_v27 = vmul.f32 %v6489_v17, %v3621_v26 }
 0xa15   :  { %v3624_v28 = vadd.f32 %v3623_v5, %v3622_v27 }
 0xa17   :  { %v3625_v29 = vsel %vm2379_vm1, %v3624_v28, 0.0  ;;  %v3628_v30 = vsel %vm2379_vm1, %v3624_v28, %v3384_v53 }
 0xa18   :  { %3627 = vst.msk [vmem:[#allocation5 + $0x28] sm:$0xff] %vm204_vm6, %v3625_v29  ;;  %6212 = vmatmul.mubr.msk.f32.vlgmr.msra.gmra.mxu1 %vm204_vm6, %v3628_v30  ;;  %6219 = vmatmul.mubr.msk.f32.vlgmr.msra.gmra.mxu0 %vm204_vm6, %v3628_v30 }
 0xa19   :  { %6222 = vmatpush3.msra.mxu1 %v7316_v58  ;;  %6225 = vmatprep.mubr.msk.f32.mxu1 %vm6574_vm5, %v6573_v32 }
 0xa1a   :  { %6223 = vmatprep.subr.mxu1 %v6573_v32  ;;  %6229 = vmatpush3.msra.mxu0 %v7277_v52 }
 0xa1b   :  { %6224 = vmatpush3.msra.mxu1 %v7331_v60  ;;  %6230 = vmatprep.subr.mxu0 %v6573_v32 }
 0xa1c   :  { %6226 = vmatmul.mubr.msk.f32.vlgmr.msra.gmra.mxu1 %vm204_vm6, %v3628_v30  ;;  %6235 = vmatprep.subr.mxu1 %v6573_v32 }
 0xa1d   :  { %6236 = vmatpush3.msra.mxu1 %v7308_v57  ;;  %6231 = vmatpush3.msra.mxu0 %v7296_v55 }
 0xa1e   :  { %6237 = vmatprep.subr.mxu1 %v6573_v32  ;;  %6232 = vmatprep.mubr.msk.f32.mxu0 %vm6574_vm5, %v6573_v32 }
 0xa1f   :  { %6238 = vmatpush3.msra.mxu1 %v7322_v59  ;;  %6239 = vmatprep.mubr.msk.f32.mxu1 %vm6574_vm5, %v6573_v32 }
 0xa20   :  { %6242 = vmatprep.subr.mxu0 %v6573_v32  ;;  %6249 = vmatprep.subr.mxu1 %v6573_v32 }
 0xad8   :  { %v3698_v7 = vpop.f32.mrf.mxu1  ;;  %v3768_v31 = vpop.f32.mrf.mxu0 }
 0xad9   :  { %v3699_v33 = vadd.f32 %v7360_v8, %v3698_v7  ;;  %v3769_v37 = vadd.f32 %v7367_v21, %v3768_v31 }
 0xada   :  { %v6213_v38 = vpop.f32.mrf.mxu1  ;;  %v6220_v39 = vpop.f32.mrf.mxu0 }
 0xadb   :  { %v3844_v36 = vadd.f32 %v3843_v35, %v3699_v33  ;;  %v3853_v46 = vadd.f32 %v3852_v45, %v3769_v37  ;;  %v4105_v33 = vld [vmem:[#allocation3 + $0x98] sm:$0xff] }
 0xadc   :  { %v3838_v41 = vpop.f32.mrf.mxu1 }
 0xadd   :  { %v5574_v42 = vmul.f32 -1.442695, %v3844_v36  ;;  %v5575_v47 = vmul.f32 -1.442695, %v3853_v46  ;;  %v3839_v49 = vadd.f32 %v7374_v44, %v3838_v41 }
 0xade   :  { %v6227_v40 = vpop.f32.mrf.mxu1 }
 0xadf   :  { %6490 = vpow2.f32 %v5574_v42 }
 0xae0   :  { %6492 = vpow2.f32 %v5575_v47 }
 0xaec   :  { %v6491_v43 = vpop.eup %6490 }
 0xaed   :  { %v3848_v50 = vadd.f32 1.0, %v6491_v43  ;;  %v6493_v51 = vpop.eup %6492  ;;  %v4331_v43 = vld [vmem:[#allocation3 + $0x10] sm:$0xff] }
 0xaee   :  { %v3857_v53 = vadd.f32 1.0, %v6493_v51 }
 0xaef   :  { %6494 = vrcp.f32 %v3848_v50 }
 0xaf0   :  { %6496 = vrcp.f32 %v3857_v53 }
 0xafc   :  { %v6495_v62 = vpop.eup %6494 }
 0xafd   :  { %v3862_v56 = vmul.f32 %v6495_v62, %v3839_v49  ;;  %v6497_v1 = vpop.eup %6496 }
 0xafe   :  { %v3865_v2 = vsub.f32 1.0, %v6497_v1  ;;  %v3867_v9 = vmul.f32 %v6497_v1, %v3628_v30 }
 0xaff   :  { %v3863_v0 = vadd.f32 %v3862_v56, %v3861_v63 }
 0xb01   :  { %6498 = vtanh.f32 %v3863_v0  ;;  %v4340_v0 = vld [vmem:[#allocation3 + $0x50] sm:$0xff] }
 0xb0e   :  { %v6499_v3 = vpop.eup %6498 }
 0xb0f   :  { %v3866_v6 = vmul.f32 %v6499_v3, %v3865_v2 }
 0xb11   :  { %v3868_v10 = vadd.f32 %v3867_v9, %v3866_v6 }
 0xb13   :  { %v3869_v11 = vsel %vm2129_vm15, %v3868_v10, 0.0  ;;  %v3872_v13 = vsel %vm2129_vm15, %v3868_v10, %v3628_v30  ;;  %vm5413_vm15 = vcmask 588800  }
 0xb14   :  { %3871 = vst.msk [vmem:[#allocation5 + $0x20] sm:$0xff] %vm204_vm6, %v3869_v11  ;;  %6233 = vmatmul.mubr.msk.f32.vlgmr.msra.gmra.mxu0 %vm204_vm6, %v3872_v13  ;;  %6240 = vmatmul.mubr.msk.f32.vlgmr.msra.gmra.mxu1 %vm204_vm6, %v3872_v13 }
 0xb15   :  { %6243 = vmatpush3.msra.mxu0 %v7316_v58  ;;  %6246 = vmatprep.mubr.msk.f32.mxu0 %vm6574_vm5, %v6573_v32 }
 0xb16   :  { %6244 = vmatprep.subr.mxu0 %v6573_v32  ;;  %6250 = vmatpush3.msra.mxu1 %v7277_v52 }
 0xb17   :  { %6245 = vmatpush3.msra.mxu0 %v7331_v60  ;;  %6251 = vmatprep.subr.mxu1 %v6573_v32 }
 0xb18   :  { %6247 = vmatmul.mubr.msk.f32.vlgmr.msra.gmra.mxu0 %vm204_vm6, %v3872_v13  ;;  %6256 = vmatprep.subr.mxu0 %v6573_v32 }
 0xb19   :  { %6257 = vmatpush3.msra.mxu0 %v7308_v57  ;;  %6252 = vmatpush3.msra.mxu1 %v7296_v55 }
 0xb1a   :  { %6258 = vmatprep.subr.mxu0 %v6573_v32  ;;  %6253 = vmatprep.mubr.msk.f32.mxu1 %vm6574_vm5, %v6573_v32 }
 0xb1b   :  { %6259 = vmatpush3.msra.mxu0 %v7322_v59  ;;  %6260 = vmatprep.mubr.msk.f32.mxu0 %vm6574_vm5, %v6573_v32  ;;  %v7655_v4 = vld [vmem:[#allocation5 + $0x20] sm:$0xff] }
 0xb1c   :  { %6263 = vmatprep.subr.mxu1 %v6573_v32  ;;  %6270 = vmatprep.subr.mxu0 %v6573_v32 }
 0xbd4   :  { %v3942_v34 = vpop.f32.mrf.mxu0  ;;  %v4012_v14 = vpop.f32.mrf.mxu1 }
 0xbd5   :  { %v3943_v15 = vadd.f32 %v7360_v8, %v3942_v34  ;;  %v4013_v24 = vadd.f32 %v7367_v21, %v4012_v14  ;;  %v4349_v14 = vld [vmem:[#allocation3 + $0x90] sm:$0xff] }
 0xbd6   :  { %v6234_v12 = vpop.f32.mrf.mxu0  ;;  %v6241_v54 = vpop.f32.mrf.mxu1 }
 0xbd7   :  { %v4088_v18 = vadd.f32 %v4087_v16, %v3943_v15  ;;  %v4097_v26 = vadd.f32 %v4096_v23, %v4013_v24  ;;  %v4575_v23 = vld [vmem:[#allocation3 + $0x8] sm:$0xff] }
 0xbd8   :  { %v4082_v20 = vpop.f32.mrf.mxu0 }
 0xbd9   :  { %v5579_v22 = vmul.f32 -1.442695, %v4088_v18  ;;  %v5580_v17 = vmul.f32 -1.442695, %v4097_v26  ;;  %v4083_v30 = vadd.f32 %v7374_v44, %v4082_v20 }
 0xbda   :  { %v6248_v25 = vpop.f32.mrf.mxu0 }
 0xbdb   :  { %6500 = vpow2.f32 %v5579_v22 }
 0xbdc   :  { %6502 = vpow2.f32 %v5580_v17 }
 0xbe8   :  { %v6501_v27 = vpop.eup %6500 }
 0xbe9   :  { %v4092_v5 = vadd.f32 1.0, %v6501_v27  ;;  %v6503_v28 = vpop.eup %6502 }
 0xbea   :  { %v4101_v29 = vadd.f32 1.0, %v6503_v28 }
 0xbeb   :  { %6504 = vrcp.f32 %v4092_v5 }
 0xbec   :  { %6506 = vrcp.f32 %v4101_v29  ;;  %v4584_v29 = vld [vmem:[#allocation3 + $0x48] sm:$0xff] }
 0xbf8   :  { %v6505_v7 = vpop.eup %6504 }
 0xbf9   :  { %v4106_v31 = vmul.f32 %v6505_v7, %v4083_v30  ;;  %v6507_v38 = vpop.eup %6506 }
 0xbfa   :  { %v4109_v39 = vsub.f32 1.0, %v6507_v38  ;;  %v4111_v42 = vmul.f32 %v6507_v38, %v3872_v13 }
 0xbfb   :  { %v4107_v35 = vadd.f32 %v4106_v31, %v4105_v33 }
 0xbfd   :  { %6508 = vtanh.f32 %v4107_v35 }
 0xc0a   :  { %v6509_v36 = vpop.eup %6508 }
 0xc0b   :  { %v4110_v41 = vmul.f32 %v6509_v36, %v4109_v39 }
 0xc0d   :  { %v4112_v37 = vadd.f32 %v4111_v42, %v4110_v41  ;;  %v4593_v42 = vld [vmem:[#allocation3 + $0x88] sm:$0xff] }
 0xc0f   :  { %v4113_v40 = vsel %vm1879_vm14, %v4112_v37, 0.0  ;;  %v4116_v45 = vsel %vm1879_vm14, %v4112_v37, %v3872_v13  ;;  %vm5411_vm14 = vcmask 523264  }
 0xc10   :  { %4115 = vst.msk [vmem:[#allocation5 + $0x18] sm:$0xff] %vm204_vm6, %v4113_v40  ;;  %6254 = vmatmul.mubr.msk.f32.vlgmr.msra.gmra.mxu1 %vm204_vm6, %v4116_v45  ;;  %6261 = vmatmul.mubr.msk.f32.vlgmr.msra.gmra.mxu0 %vm204_vm6, %v4116_v45 }
 0xc11   :  { %6264 = vmatpush3.msra.mxu1 %v7316_v58  ;;  %6267 = vmatprep.mubr.msk.f32.mxu1 %vm6574_vm5, %v6573_v32 }
 0xc12   :  { %6265 = vmatprep.subr.mxu1 %v6573_v32  ;;  %6271 = vmatpush3.msra.mxu0 %v7277_v52 }
 0xc13   :  { %6266 = vmatpush3.msra.mxu1 %v7331_v60  ;;  %6272 = vmatprep.subr.mxu0 %v6573_v32 }
 0xc14   :  { %6268 = vmatmul.mubr.msk.f32.vlgmr.msra.gmra.mxu1 %vm204_vm6, %v4116_v45  ;;  %6277 = vmatprep.subr.mxu1 %v6573_v32 }
 0xc15   :  { %6278 = vmatpush3.msra.mxu1 %v7308_v57  ;;  %6273 = vmatpush3.msra.mxu0 %v7296_v55 }
 0xc16   :  { %6279 = vmatprep.subr.mxu1 %v6573_v32  ;;  %6274 = vmatprep.mubr.msk.f32.mxu0 %vm6574_vm5, %v6573_v32 }
 0xc17   :  { %6280 = vmatpush3.msra.mxu1 %v7322_v59  ;;  %6281 = vmatprep.mubr.msk.f32.mxu1 %vm6574_vm5, %v6573_v32 }
 0xc18   :  { %6284 = vmatprep.subr.mxu0 %v6573_v32  ;;  %6291 = vmatprep.subr.mxu1 %v6573_v32 }
 0xcd0   :  { %v4186_v61 = vpop.f32.mrf.mxu1  ;;  %v4256_v46 = vpop.f32.mrf.mxu0 }
 0xcd1   :  { %v4187_v47 = vadd.f32 %v7360_v8, %v4186_v61  ;;  %v4257_v56 = vadd.f32 %v7367_v21, %v4256_v46 }
 0xcd2   :  { %v6255_v50 = vpop.f32.mrf.mxu1  ;;  %v6262_v51 = vpop.f32.mrf.mxu0 }
 0xcd3   :  { %v4332_v53 = vadd.f32 %v4331_v43, %v4187_v47  ;;  %v4341_v1 = vadd.f32 %v4340_v0, %v4257_v56  ;;  %v4848_v50 = vld [vmem:[%s7760_s11 + $0x18] sm:$0xff]  ;;  %v4946_v56 = vld [vmem:[%s7762_s13] sm:$0xff]  ;;  %v7598_v0 = vld [vmem:[#allocation4 + $0x8] sm:$0xff] }
 0xcd4   :  { %v4326_v49 = vpop.f32.mrf.mxu1 }
 0xcd5   :  { %v5584_v62 = vmul.f32 -1.442695, %v4332_v53  ;;  %v5585_v2 = vmul.f32 -1.442695, %v4341_v1  ;;  %v4327_v11 = vadd.f32 %v7374_v44, %v4326_v49  ;;  %v4847_v49 = vld [vmem:[%s7760_s11 + $0x10] sm:$0xff]  ;;  %v7606_v1 = vld [vmem:[#allocation4 + $0x18] sm:$0xff] }
 0xcd6   :  { %v6269_v63 = vpop.f32.mrf.mxu1 }
 0xcd7   :  { %6510 = vpow2.f32 %v5584_v62  ;;  %v4844_v62 = vld [vmem:[%s7767_s9] sm:$0xff] }
 0xcd8   :  { %6512 = vpow2.f32 %v5585_v2  ;;  %v7594_v63 = vld [vmem:[#allocation4] sm:$0xff] }
 0xcd9   :  { %v7610_v2 = vld [vmem:[#allocation4 + $0x20] sm:$0xff] }
 0xce4   :  { %v6511_v3 = vpop.eup %6510 }
 0xce5   :  { %v4336_v6 = vadd.f32 1.0, %v6511_v3  ;;  %v6513_v9 = vpop.eup %6512  ;;  %v7614_v3 = vld [vmem:[#allocation4 + $0x28] sm:$0xff] }
 0xce6   :  { %v4345_v10 = vadd.f32 1.0, %v6513_v9  ;;  %v7622_v9 = vld [vmem:[#allocation4 + $0x38] sm:$0xff] }
 0xce7   :  { %6514 = vrcp.f32 %v4336_v6  ;;  %v7618_v6 = vld [vmem:[#allocation4 + $0x30] sm:$0xff] }
 0xce8   :  { %6516 = vrcp.f32 %v4345_v10  ;;  %v4949_v10 = vld [vmem:[%s7763_s14 + $0x8] sm:$0xff] }
 0xcf4   :  { %v6515_v13 = vpop.eup %6514 }
 0xcf5   :  { %v4350_v34 = vmul.f32 %v6515_v13, %v4327_v11  ;;  %v6517_v16 = vpop.eup %6516  ;;  %v4948_v11 = vld [vmem:[%s7763_s14] sm:$0xff] }
 0xcf6   :  { %v4353_v12 = vsub.f32 1.0, %v6517_v16  ;;  %v4355_v20 = vmul.f32 %v6517_v16, %v4116_v45 }
 0xcf7   :  { %v4351_v15 = vadd.f32 %v4350_v34, %v4349_v14 }
 0xcf9   :  { %6518 = vtanh.f32 %v4351_v15  ;;  %v4818_v15 = vld [vmem:[#allocation3] sm:$0xff] }
 0xd06   :  { %v6519_v54 = vpop.eup %6518 }
 0xd07   :  { %v4354_v18 = vmul.f32 %v6519_v54, %v4353_v12 }
 0xd09   :  { %v4356_v22 = vadd.f32 %v4355_v20, %v4354_v18 }
 0xd0b   :  { %v4357_v24 = vsel %vm1629_vm13, %v4356_v22, 0.0  ;;  %v4360_v25 = vsel %vm1629_vm13, %v4356_v22, %v4116_v45  ;;  %vm5409_vm13 = vcmask 392192  }
 0xd0c   :  { %4359 = vst.msk [vmem:[#allocation5 + $0x10] sm:$0xff] %vm204_vm6, %v4357_v24  ;;  %6275 = vmatmul.mubr.msk.f32.vlgmr.msra.gmra.mxu0 %vm204_vm6, %v4360_v25  ;;  %6282 = vmatmul.mubr.msk.f32.vlgmr.msra.gmra.mxu1 %vm204_vm6, %v4360_v25 }
 0xd0d   :  { %6285 = vmatpush3.msra.mxu0 %v7316_v58  ;;  %6288 = vmatprep.mubr.msk.f32.mxu0 %vm6574_vm5, %v6573_v32 }
 0xd0e   :  { %6286 = vmatprep.subr.mxu0 %v6573_v32  ;;  %6292 = vmatpush3.msra.mxu1 %v7277_v52 }
 0xd0f   :  { %6287 = vmatpush3.msra.mxu0 %v7331_v60  ;;  %6293 = vmatprep.subr.mxu1 %v6573_v32 }
 0xd10   :  { %6289 = vmatmul.mubr.msk.f32.vlgmr.msra.gmra.mxu0 %vm204_vm6, %v4360_v25  ;;  %6298 = vmatprep.subr.mxu0 %v6573_v32 }
 0xd11   :  { %6299 = vmatpush3.msra.mxu0 %v7308_v57  ;;  %6294 = vmatpush3.msra.mxu1 %v7296_v55 }
 0xd12   :  { %6300 = vmatprep.subr.mxu0 %v6573_v32  ;;  %6295 = vmatprep.mubr.msk.f32.mxu1 %vm6574_vm5, %v6573_v32 }
 0xd13   :  { %6301 = vmatpush3.msra.mxu0 %v7322_v59  ;;  %6302 = vmatprep.mubr.msk.f32.mxu0 %vm6574_vm5, %v6573_v32 }
 0xd14   :  { %6312 = vmatprep.subr.mxu0 %v6573_v32  ;;  %6305 = vmatprep.subr.mxu1 %v6573_v32 }
 0xdcc   :  { %v4430_v19 = vpop.f32.mrf.mxu0  ;;  %v4500_v52 = vpop.f32.mrf.mxu1 }
 0xdcd   :  { %v4431_v57 = vadd.f32 %v7360_v8, %v4430_v19  ;;  %v4501_v28 = vadd.f32 %v7367_v21, %v4500_v52 }
 0xdce   :  { %v6276_v55 = vpop.f32.mrf.mxu0  ;;  %v6283_v26 = vpop.f32.mrf.mxu1 }
 0xdcf   :  { %v4576_v17 = vadd.f32 %v4575_v23, %v4431_v57  ;;  %v4585_v30 = vadd.f32 %v4584_v29, %v4501_v28 }
 0xdd0   :  { %v4570_v27 = vpop.f32.mrf.mxu0 }
 0xdd1   :  { %v5589_v5 = vmul.f32 -1.442695, %v4576_v17  ;;  %v5590_v7 = vmul.f32 -1.442695, %v4585_v30  ;;  %v4571_v39 = vadd.f32 %v7374_v44, %v4570_v27 }
 0xdd2   :  { %v6290_v59 = vpop.f32.mrf.mxu0 }
 0xdd3   :  { %6520 = vpow2.f32 %v5589_v5 }
 0xdd4   :  { %6522 = vpow2.f32 %v5590_v7 }
 0xde0   :  { %v6521_v31 = vpop.eup %6520 }
 0xde1   :  { %v4580_v33 = vadd.f32 1.0, %v6521_v31  ;;  %v6523_v35 = vpop.eup %6522 }
 0xde2   :  { %v4589_v38 = vadd.f32 1.0, %v6523_v35 }
 0xde3   :  { %6524 = vrcp.f32 %v4580_v33 }
 0xde4   :  { %6526 = vrcp.f32 %v4589_v38 }
 0xdf0   :  { %v6525_v36 = vpop.eup %6524 }
 0xdf1   :  { %v4594_v41 = vmul.f32 %v6525_v36, %v4571_v39  ;;  %v6527_v40 = vpop.eup %6526  ;;  %v7647_v36 = vld [vmem:[#allocation5 + $0x10] sm:$0xff] }
 0xdf2   :  { %v4597_v45 = vsub.f32 1.0, %v6527_v40  ;;  %v4599_v47 = vmul.f32 %v6527_v40, %v4360_v25  ;;  %v7667_v40 = vld [vmem:[#allocation5 + $0x38] sm:$0xff] }
 0xdf3   :  { %v4595_v37 = vadd.f32 %v4594_v41, %v4593_v42  ;;  %v7651_v41 = vld [vmem:[#allocation5 + $0x18] sm:$0xff]  ;;  %v7659_v42 = vld [vmem:[#allocation5 + $0x28] sm:$0xff] }
 0xdf5   :  { %6528 = vtanh.f32 %v4595_v37  ;;  %v7663_v37 = vld [vmem:[#allocation5 + $0x30] sm:$0xff] }
 0xe02   :  { %v6529_v61 = vpop.eup %6528 }
 0xe03   :  { %v4598_v46 = vmul.f32 %v6529_v61, %v4597_v45 }
 0xe05   :  { %v4600_v43 = vadd.f32 %v4599_v47, %v4598_v46  ;;  %v5596_v47 = vld [vmem:[%s7761_s12] ss:$0 sm:$0xff]  ;;  %s6576_s12 = smov 48  }
 0xe07   :  { %v4601_v51 = vsel %vm1379_vm12, %v4600_v43, 0.0  ;;  %v7556_v53 = vsel %vm1379_vm12, %v4600_v43, %v4360_v25  ;;  %v4826_v25 = vld [vmem:[#allocation3 + $0x40] sm:$0xff]  ;;  %vm5285_vm12 = vcmask 64512  }
 0xe08   :  { %4603 = vst.msk [vmem:[#allocation5 + $0x8] sm:$0xff] %vm204_vm6, %v4601_v51  ;;  %6296 = vmatmul.mubr.msk.f32.vlgmr.msra.gmra.mxu1 %vm204_vm6, %v7556_v53  ;;  %6303 = vmatmul.mubr.msk.f32.vlgmr.msra.gmra.mxu0 %vm204_vm6, %v7556_v53  ;;  %v5614_v51 = vld [vmem:[%s7764_s15] ss:$0 sm:$0xff]  ;;  %s6583_s15 = smov 32  }
 0xe09   :  { %6313 = vmatpush3.msra.mxu0 %v4848_v50  ;;  %6306 = vmatpush3.msra.mxu1 %v7316_v58  ;;  %v4845_v58 = vld [vmem:[%s7760_s11] sm:$0xff] }
 0xe0a   :  { %6314 = vmatprep.subr.mxu0 %v6573_v32  ;;  %6307 = vmatprep.subr.mxu1 %v6573_v32 }
 0xe0b   :  { %6315 = vmatpush3.msra.mxu0 %v4847_v49  ;;  %6308 = vmatpush3.msra.mxu1 %v7331_v60  ;;  %v4947_v60 = vld [vmem:[%s7762_s13 + $0x8] sm:$0xff] }
 0xe0c   :  { %6309 = vmatprep.mubr.msk.f32.mxu1 %vm6574_vm5, %v6573_v32  ;;  %6316 = vmatprep.subr.mxu0 %v6573_v32 }
 0xe0d   :  { %6310 = vmatmul.mubr.msk.f32.vlgmr.msra.gmra.mxu1 %vm204_vm6, %v7556_v53  ;;  %6317 = vmatpush3.msra.mxu0 %v4846_v48 }
 0xe0e   :  { %6318 = vmatprep.subr.mxu0 %v6573_v32  ;;  %6320 = vmatprep.mubr.msk.f32.mxu0 %vm6574_vm5, %v6573_v32  ;;  %v7602_v32 = vld [vmem:[#allocation4 + $0x10] sm:$0xff]  ;;  %vm5273_vm5 = vcmask 15360  }
 0xe0f   :  { %6319 = vmatpush3.msra.mxu0 %v4845_v58  ;;  %6323 = vmatprep.subr.mxu1 %v4949_v10 }
 0xe10   :  { %6321 = vmatmul.mubr.msk.f32.vlgmr.msra.gmra.mxu0 %vm74_vm0, %v4844_v62  ;;  %6339 = vmatprep.subr.mxu0 %v4947_v60 }
 0xe11   :  { %6340 = vmatpush3.msra.mxu0 %v4947_v60  ;;  %6343 = vmatprep.mubr.msk.f32.mxu0 %vm204_vm6, %v7594_v63 }
 0xe12   :  { %6341 = vmatprep.subr.mxu0 %v4946_v56  ;;  %6324 = vmatpush3.msra.mxu1 %v4949_v10 }
 0xe13   :  { %6342 = vmatpush3.msra.mxu0 %v4946_v56  ;;  %6325 = vmatprep.subr.mxu1 %v4948_v11 }
 0xe14   :  { %6344 = vmatmul.mubr.msk.f32.vlgmr.msra.gmra.mxu0 %vm204_vm6, %v7598_v0  ;;  %6326 = vmatpush3.msra.mxu1 %v4948_v11 }
 0xe15   :  { %6346 = vmatprep.mubr.msk.f32.mxu0 %vm204_vm6, %v7602_v32 }
 0xe18   :  { %6347 = vmatmul.mubr.msk.f32.gmra.mxu0 %vm204_vm6, %v7606_v1 }
 0xe19   :  { %6349 = vmatprep.mubr.msk.f32.mxu0 %vm204_vm6, %v7610_v2 }
 0xe1c   :  { %6350 = vmatmul.mubr.msk.f32.gmra.mxu0 %vm204_vm6, %v7614_v3 }
 0xe1d   :  { %6352 = vmatprep.mubr.msk.f32.mxu0 %vm204_vm6, %v7618_v6 }
 0xe20   :  { %6353 = vmatmul.mubr.msk.f32.gmra.mxu0 %vm204_vm6, %v7622_v9 }
 0xec8   :  { %v4674_v13 = vpop.f32.mrf.mxu1  ;;  %v4744_v34 = vpop.f32.mrf.mxu0 }
 0xec9   :  { %v4675_v14 = vadd.f32 %v7360_v8, %v4674_v13  ;;  %v4745_v20 = vadd.f32 %v7367_v21, %v4744_v34  ;;  %v4834_v21 = vld [vmem:[#allocation3 + $0x80] sm:$0xff] }
 0xeca   :  { %v6297_v16 = vpop.f32.mrf.mxu1  ;;  %v6304_v12 = vpop.f32.mrf.mxu0 }
 0xecb   :  { %v4819_v54 = vadd.f32 %v4818_v15, %v4675_v14  ;;  %v4827_v52 = vadd.f32 %v4826_v25, %v4745_v20 }
 0xecd   :  { %v5594_v18 = vmul.f32 -1.442695, %v4819_v54  ;;  %v4814_v22 = vpop.f32.mrf.mxu1  ;;  %v5595_v23 = vmul.f32 -1.442695, %v4827_v52 }
 0xece   :  { %v4815_v27 = vadd.f32 %v7374_v44, %v4814_v22  ;;  %v7643_v44 = vld [vmem:[#allocation5 + $0x8] sm:$0xff] }
 0xecf   :  { %6530 = vpow2.f32 %v5594_v18  ;;  %v6311_v24 = vpop.f32.mrf.mxu1 }
 0xed0   :  { %v4925_v19 = vpop.f32.mrf.mxu0  ;;  %6532 = vpow2.f32 %v5595_v23 }
 0xed2   :  { %v6322_v57 = vpop.f32.mrf.mxu0 }
 0xed4   :  { %v6345_v45 = vpop.f32.mrf.mxu0 }
 0xed6   :  { %v5169_v61 = vpop.f32.mrf.mxu0 }
 0xed8   :  { %v6348_v46 = vpop.f32.mrf.mxu0 }
 0xeda   :  { %v5179_v43 = vpop.f32.mrf.mxu0 }
 0xedc   :  { %v6531_v55 = vpop.eup %6530  ;;  %v6351_v48 = vpop.f32.mrf.mxu0 }
 0xedd   :  { %v4823_v26 = vadd.f32 1.0, %v6531_v55  ;;  %v6533_v8 = vpop.eup %6532 }
 0xede   :  { %v4831_v17 = vadd.f32 1.0, %v6533_v8  ;;  %v5189_v14 = vpop.f32.mrf.mxu0 }
 0xedf   :  { %6534 = vrcp.f32 %v4823_v26 }
 0xee0   :  { %6536 = vrcp.f32 %v4831_v17  ;;  %v6354_v52 = vpop.f32.mrf.mxu0 }
 0xeec   :  { %v6535_v5 = vpop.eup %6534 }
 0xeed   :  { %v4835_v28 = vmul.f32 %v6535_v5, %v4815_v27  ;;  %v6537_v29 = vpop.eup %6536 }
 0xeee   :  { %v4838_v30 = vsub.f32 1.0, %v6537_v29  ;;  %v4840_v31 = vmul.f32 %v6537_v29, %v7556_v53  ;;  %v4926_v53 = vadd.f32 %v5596_v47, %v4925_v19 }
 0xeef   :  { %v4836_v59 = vadd.f32 %v4835_v28, %v4834_v21 }
 0xef0   :  { %v4929_v10 = vmax.f32 %v4926_v53, 0.0 }
 0xef1   :  { %6538 = vtanh.f32 %v4836_v59  ;;  %v5199_v59 = vpop.f32.mrf.mxu0 }
 0xefe   :  { %v6539_v7 = vpop.eup %6538 }
 0xeff   :  { %v4839_v33 = vmul.f32 %v6539_v7, %v4838_v30 }
 0xf01   :  { %v4841_v35 = vadd.f32 %v4840_v31, %v4839_v33 }
 0xf03   :  { %v4842_v38 = vsel %vm1131_vm7, %v4841_v35, 0.0  ;;  %vm5275_vm7 = vcmask 23552  }
 0xf04   :  { %4843 = vst.msk [vmem:[#allocation5] sm:$0xff] %vm204_vm6, %v4842_v38 }
 0xf0b   :  { %v7639_v39 = vld [vmem:[#allocation5] sm:$0xff] }
 0xf0c   :  { %6327 = vmatprep.mubr.msk.f32.mxu1 %vm204_vm6, %v7639_v39 }
 0xf0d   :  { %6328 = vmatmul.mubr.msk.f32.vlgmr.msra.gmra.mxu1 %vm204_vm6, %v7643_v44 }
 0xf0e   :  { %6330 = vmatprep.mubr.msk.f32.mxu1 %vm204_vm6, %v7647_v36 }
 0xf11   :  { %6331 = vmatmul.mubr.msk.f32.gmra.mxu1 %vm204_vm6, %v7651_v41 }
 0xf12   :  { %6333 = vmatprep.mubr.msk.f32.mxu1 %vm204_vm6, %v7655_v4 }
 0xf15   :  { %6334 = vmatmul.mubr.msk.f32.gmra.mxu1 %vm204_vm6, %v7659_v42 }
 0xf16   :  { %6336 = vmatprep.mubr.msk.f32.mxu1 %vm204_vm6, %v7663_v37 }
 0xf19   :  { %6337 = vmatmul.mubr.msk.f32.gmra.mxu1 %vm204_vm6, %v7667_v40 }
 0xfcd   :  { %v6329_v50 = vpop.f32.mrf.mxu1 }
 0xfce   :  { %v5175_v49 = vadd.f32 %v6345_v45, %v6329_v50 }
 0xfcf   :  { %v5040_v58 = vpop.f32.mrf.mxu1 }
 0xfd0   :  { %v5216_v62 = vadd.f32 %v5614_v51, %v5175_v49  ;;  %v5170_v60 = vadd.f32 %v5169_v61, %v5040_v58 }
 0xfd1   :  { %v6332_v56 = vpop.f32.mrf.mxu1 }
 0xfd2   :  { %v5224_v11 = vmax.f32 %v5216_v62, 0.0  ;;  %v5215_v13 = vadd.f32 %v5614_v51, %v5170_v60  ;;  %v5185_v34 = vadd.f32 %v6348_v46, %v6332_v56 }
 0xfd3   :  { %v5050_v15 = vpop.f32.mrf.mxu1 }
 0xfd4   :  { %v5223_v16 = vmax.f32 %v5215_v13, 0.0  ;;  %v5218_v12 = vadd.f32 %v5614_v51, %v5185_v34  ;;  %v5180_v54 = vadd.f32 %v5179_v43, %v5050_v15  ;;  %v5236_v18 = vmul.f32 %v5224_v11, %v4929_v10 }
 0xfd5   :  { %v6335_v20 = vpop.f32.mrf.mxu1 }
 0xfd6   :  { %v5226_v22 = vmax.f32 %v5218_v12, 0.0  ;;  %v5217_v24 = vadd.f32 %v5614_v51, %v5180_v54  ;;  %v5195_v25 = vadd.f32 %v6351_v48, %v6335_v20  ;;  %v5237_v19 = vsel %vm74_vm0, %v5236_v18, 0.0 }
 0xfd7   :  { %5238 = vadd.xlane.f32.xlu1 %v5237_v19  ;;  %v5060_v57 = vpop.f32.mrf.mxu1  ;;  %v5231_v23 = vmul.f32 %v5223_v16, %v4929_v10 }
 0xfd8   :  { %v5190_v55 = vadd.f32 %v5189_v14, %v5060_v57  ;;  %v5225_v26 = vmax.f32 %v5217_v24, 0.0  ;;  %v5220_v8 = vadd.f32 %v5614_v51, %v5195_v25  ;;  %v5246_v5 = vmul.f32 %v5226_v22, %v4929_v10 }
 0xfd9   :  { %v5232_v17 = vsel %vm74_vm0, %v5231_v23, 0.0  ;;  %v6338_v27 = vpop.f32.mrf.mxu1 }
 0xfda   :  { %v5219_v28 = vadd.f32 %v5614_v51, %v5190_v55  ;;  %5233 = vadd.xlane.f32.xlu0 %v5232_v17  ;;  %v5205_v21 = vadd.f32 %v6354_v52, %v6338_v27  ;;  %v5228_v31 = vmax.f32 %v5220_v8, 0.0  ;;  %v5247_v35 = vsel %vm74_vm0, %v5246_v5, 0.0 }
 0xfdb   :  { %v5070_v29 = vpop.f32.mrf.mxu1  ;;  %v5241_v38 = vmul.f32 %v5225_v26, %v4929_v10 }
 0xfdc   :  { %v5227_v30 = vmax.f32 %v5219_v28, 0.0  ;;  %v5200_v7 = vadd.f32 %v5199_v59, %v5070_v29  ;;  %v5222_v33 = vadd.f32 %v5614_v51, %v5205_v21  ;;  %v5256_v53 = vmul.f32 %v5228_v31, %v4929_v10 }
 0xfdd   :  { %v5242_v50 = vsel %vm74_vm0, %v5241_v38, 0.0  ;;  %v6575_v29 = vmov 1   ;;  %v5314_v31 = vsel %vm204_vm6, %v7647_v36, -inf }
 0xfde   :  { %v5221_v45 = vadd.f32 %v5614_v51, %v5200_v7  ;;  %5248 = vadd.xlane.f32.xlu0 %v5247_v35  ;;  %v5251_v61 = vmul.f32 %v5227_v30, %v4929_v10  ;;  %v5230_v43 = vmax.f32 %v5222_v33, 0.0  ;;  %v5257_v58 = vsel %vm74_vm0, %v5256_v53, 0.0 }
 0xfdf   :  { %6372 = vset.pattern.permute.xlu0 %v6575_v29  ;;  %v5312_v7 = vsel %vm204_vm6, %v7639_v39, -inf  ;;  %v5316_v33 = vsel %vm204_vm6, %v7655_v4, -inf  ;;  %v5313_v35 = vsel %vm204_vm6, %v7643_v44, -inf  ;;  %v5322_v53 = vsel %vm204_vm6, %v7667_v40, -inf }
 0xfe0   :  { %v5229_v46 = vmax.f32 %v5221_v45, 0.0  ;;  %v5252_v47 = vsel %vm74_vm0, %v5251_v61, 0.0  ;;  %v5266_v62 = vmul.f32 %v5230_v43, %v4929_v10  ;;  %v5317_v38 = vmax.f32 %v5312_v7, %v5316_v33 }
 0xfe1   :  { %5253 = vadd.xlane.f32.xlu1 %v5252_v47  ;;  %v5315_v45 = vsel %vm204_vm6, %v7651_v41, -inf  ;;  %v5318_v61 = vsel %vm204_vm6, %v7659_v42, -inf }
 0xfe2   :  { %5243 = vadd.xlane.f32.xlu0 %v5242_v50  ;;  %v5261_v49 = vmul.f32 %v5229_v46, %v4929_v10  ;;  %v5267_v51 = vsel %vm74_vm0, %v5266_v62, 0.0  ;;  %v5320_v46 = vsel %vm204_vm6, %v7663_v37, -inf  ;;  %v5319_v47 = vmax.f32 %v5313_v35, %v5318_v61 }
 0xfe3   :  { %v5321_v43 = vmax.f32 %v5314_v31, %v5320_v46 }
 0xfe4   :  { %v5262_v48 = vsel %vm74_vm0, %v5261_v49, 0.0  ;;  %v5323_v49 = vmax.f32 %v5315_v45, %v5322_v53 }
 0xfe5   :  { %5263 = vadd.xlane.f32.xlu1 %v5262_v48 }
 0xfe6   :  { %5258 = vadd.xlane.f32.xlu0 %v5257_v58  ;;  %v5324_v58 = vmax.f32 %v5317_v38, %v5319_v47  ;;  %v5325_v62 = vmax.f32 %v5321_v43, %v5323_v49 }
 0xfea   :  { %5268 = vadd.xlane.f32.xlu0 %v5267_v51  ;;  %v5326_v51 = vmax.f32 %v5324_v58, %v5325_v62 }
0x1060   :  { %v5239_v56 = vpop.xlane.xlu1 %5238 }
0x1061   :  { %v5240_v14 = vmul.f32 0.17677669, %v5239_v56  ;;  %v6578_v56 = vmov 7  }
0x1063   :  { %v5234_v60 = vpop.xlane.xlu0 %5233 }
0x1064   :  { %v5235_v13 = vmul.f32 0.17677669, %v5234_v60  ;;  %v6577_v60 = vmov 2  }
0x1066   :  { %v5272_v12 = vsel %vm5271_vm4, %v5235_v13, %v5240_v14  ;;  %v6580_v13 = vmov 4   ;;  %v5307_v14 = vsel %vm204_vm6, %v7622_v9, -inf }
0x1067   :  { %v5249_v11 = vpop.xlane.xlu0 %5248 }
0x1068   :  { %v5250_v54 = vmul.f32 0.17677669, %v5249_v11  ;;  %v6579_v11 = vmov 3  }
0x106a   :  { %v5254_v34 = vpop.xlane.xlu1 %5253 }
0x106b   :  { %v5244_v15 = vpop.xlane.xlu0 %5243  ;;  %v5255_v10 = vmul.f32 0.17677669, %v5254_v34  ;;  %v6581_v34 = vmov 5  }
0x106c   :  { %v5245_v16 = vmul.f32 0.17677669, %v5244_v15  ;;  %v5300_v15 = vsel %vm204_vm6, %v7606_v1, -inf }
0x106e   :  { %v5274_v18 = vsel %vm5273_vm5, %v5272_v12, %v5245_v16  ;;  %v5264_v20 = vpop.xlane.xlu1 %5263  ;;  %v5303_v16 = vsel %vm204_vm6, %v7614_v3, -inf  ;;  %v5305_v12 = vsel %vm204_vm6, %v7618_v6, -inf }
0x106f   :  { %v5276_v22 = vsel %vm5275_vm7, %v5274_v18, %v5250_v54  ;;  %v5259_v24 = vpop.xlane.xlu0 %5258  ;;  %v5265_v52 = vmul.f32 0.17677669, %v5264_v20  ;;  %v5308_v54 = vmax.f32 %v5300_v15, %v5307_v14  ;;  %v6582_v18 = vmov 6  }
0x1070   :  { %v5278_v25 = vsel %vm5277_vm8, %v5276_v22, %v5255_v10  ;;  %v5260_v19 = vmul.f32 0.17677669, %v5259_v24  ;;  %v5299_v10 = vsel %vm204_vm6, %v7602_v32, -inf  ;;  %v5301_v20 = vsel %vm204_vm6, %v7610_v2, -inf }
0x1071   :  { %v5298_v22 = vsel %vm204_vm6, %v7598_v0, -inf }
0x1072   :  { %v5280_v57 = vsel %vm5279_vm9, %v5278_v25, %v5260_v19  ;;  %v5304_v24 = vmax.f32 %v5298_v22, %v5303_v16  ;;  %v5306_v25 = vmax.f32 %v5299_v10, %v5305_v12  ;;  %v5297_v19 = vsel %vm204_vm6, %v7594_v63, -inf }
0x1073   :  { %v5269_v23 = vpop.xlane.xlu0 %5268  ;;  %v5282_v26 = vsel %vm5281_vm10, %v5280_v57, %v5265_v52  ;;  %v5302_v52 = vmax.f32 %v5297_v19, %v5301_v20 }
0x1074   :  { %v5270_v55 = vmul.f32 0.17677669, %v5269_v23  ;;  %v5310_v57 = vmax.f32 %v5306_v25, %v5308_v54 }
0x1075   :  { %v5309_v23 = vmax.f32 %v5302_v52, %v5304_v24 }
0x1076   :  { %v5284_v8 = vsel %vm5283_vm11, %v5282_v26, %v5270_v55 }
0x1077   :  { %v5286_v17 = vsel %vm5285_vm12, %v5284_v8, -inf  ;;  %v5311_v55 = vmax.f32 %v5309_v23, %v5310_v57 }
0x1078   :  { %5287 = vmax.xlane.f32.xlu1 %v5286_v17 }
0x1101   :  { %v5288_v27 = vpop.xlane.xlu1 %5287 }
0x1102   :  { %v5289_v5 = vsub.f32 %v5284_v8, %v5288_v27 }
0x1104   :  { %v5290_v28 = vmul.f32 1.442695, %v5289_v5 }
0x1106   :  { %6540 = vpow2.f32 %v5290_v28 }
0x1113   :  { %v6541_v21 = vpop.eup %6540 }
0x1114   :  { %v5292_v59 = vsel %vm5285_vm12, %v6541_v21, 0.0 }
0x1115   :  { %5293 = vadd.xlane.f32.xlu0 %v5292_v59 }
0x119e   :  { %v5294_v30 = vpop.xlane.xlu0 %5293 }
0x119f   :  { %6542 = vrcp.f32 %v5294_v30 }
0x11ac   :  { %v6543_v50 = vpop.eup %6542 }
0x11ad   :  { %v7701_v48 = vmul.f32 %v6543_v50, %v6541_v21 }
0x11af   :  { %5337 = vperm.xlu0 %6372, %v7701_v48   ;;  %5329 = vperm.xlu1 %6371, %v7701_v48  }
0x11b3   :  { %5401 = vrot.lane.b32.xlu0 %v5326_v51, %s6576_s12  ;;  %6373 = vset.pattern.permute.xlu1 %v6577_v60 }
0x11b4   :  { %5345 = vperm.xlu1 %6373, %v7701_v48   ;;  %6379 = vset.pattern.permute.xlu0 %v6578_v56 }
0x11b8   :  { %6374 = vset.pattern.permute.xlu1 %v6579_v11 }
0x11b9   :  { %5353 = vperm.xlu1 %6374, %v7701_v48  }
0x11bd   :  { %6375 = vset.pattern.permute.xlu1 %v6580_v13 }
0x11be   :  { %5361 = vperm.xlu1 %6375, %v7701_v48  }
0x11c2   :  { %6376 = vset.pattern.permute.xlu1 %v6581_v34 }
0x11c3   :  { %5369 = vperm.xlu1 %6376, %v7701_v48  }
0x11c7   :  { %6377 = vset.pattern.permute.xlu1 %v6582_v18 }
0x11c8   :  { %5377 = vperm.xlu1 %6377, %v7701_v48  }
0x11cc   :  { %6378 = vset.pattern.permute.xlu1 %v6578_v56 }
0x11cd   :  { %5385 = vperm.xlu1 %6378, %v7701_v48  }
0x11d1   :  { %5397 = vrot.lane.b32.xlu1 %v5311_v55, %s6583_s15 }
0x122a   :  { %v5338_v26 = vpop.permute.xlu0 %5337  ;;  %v5330_v8 = vpop.permute.xlu1 %5329 }
0x122b   :  { %v5340_v17 = vmul.f32 %v5338_v26, %v7598_v0  ;;  %v5332_v27 = vmul.f32 %v5330_v8, %v7594_v63  ;;  %v5342_v35 = vmul.f32 %v5338_v26, %v7643_v44  ;;  %v5334_v38 = vmul.f32 %v5330_v8, %v7639_v39 }
0x122d   :  { %v5341_v5 = vadd.f32 %v5340_v17, %v5332_v27  ;;  %v5343_v61 = vadd.f32 %v5342_v35, %v5334_v38 }
0x122e   :  { %v5402_v56 = vpop.permute.xlu0 %5401 }
0x122f   :  { %v5346_v28 = vpop.permute.xlu1 %5345 }
0x1230   :  { %v5348_v21 = vmul.f32 %v5346_v28, %v7602_v32  ;;  %v5350_v0 = vmul.f32 %v5346_v28, %v7647_v36 }
0x1232   :  { %v5349_v59 = vadd.f32 %v5348_v21, %v5341_v5  ;;  %v5351_v47 = vadd.f32 %v5350_v0, %v5343_v61 }
0x1234   :  { %v5354_v29 = vpop.permute.xlu1 %5353 }
0x1235   :  { %v5356_v30 = vmul.f32 %v5354_v29, %v7606_v1  ;;  %v5358_v46 = vmul.f32 %v5354_v29, %v7651_v41 }
0x1237   :  { %v5357_v7 = vadd.f32 %v5356_v30, %v5349_v59  ;;  %v5359_v50 = vadd.f32 %v5358_v46, %v5351_v47 }
0x1239   :  { %v5362_v31 = vpop.permute.xlu1 %5361 }
0x123a   :  { %v5364_v33 = vmul.f32 %v5362_v31, %v7610_v2  ;;  %v5366_v1 = vmul.f32 %v5362_v31, %v7655_v4 }
0x123c   :  { %v5365_v45 = vadd.f32 %v5364_v33, %v5357_v7  ;;  %v5367_v39 = vadd.f32 %v5366_v1, %v5359_v50 }
0x123e   :  { %v5370_v63 = vpop.permute.xlu1 %5369 }
0x123f   :  { %v5372_v32 = vmul.f32 %v5370_v63, %v7614_v3  ;;  %v5374_v2 = vmul.f32 %v5370_v63, %v7659_v42 }
0x1241   :  { %v5373_v43 = vadd.f32 %v5372_v32, %v5365_v45  ;;  %v5375_v58 = vadd.f32 %v5374_v2, %v5367_v39 }
0x1243   :  { %v5378_v53 = vpop.permute.xlu1 %5377 }
0x1244   :  { %v5380_v44 = vmul.f32 %v5378_v53, %v7618_v6  ;;  %v5382_v49 = vmul.f32 %v5378_v53, %v7663_v37 }
0x1246   :  { %v5381_v36 = vadd.f32 %v5380_v44, %v5373_v43  ;;  %v5383_v51 = vadd.f32 %v5382_v49, %v5375_v58 }
0x1248   :  { %v5386_v62 = vpop.permute.xlu1 %5385 }
0x1249   :  { %v5388_v41 = vmul.f32 %v5386_v62, %v7622_v9  ;;  %v5390_v3 = vmul.f32 %v5386_v62, %v7667_v40 }
0x124b   :  { %v5389_v60 = vadd.f32 %v5388_v41, %v5381_v36  ;;  %v5391_v4 = vadd.f32 %v5390_v3, %v5383_v51 }
0x124c   :  { %v5398_v42 = vpop.permute.xlu1 %5397 }
0x124d   :  { %5393 = vrot.lane.b32.xlu1 %v5391_v4, %s6584_s7 }
0x1251   :  { %5404 = vrot.lane.b32.xlu1 %v7701_v48, %s6585_s29 }
0x12bf   :  { %v5394_v6 = vpop.permute.xlu1 %5393 }
0x12c0   :  { %v5407_v37 = vsel %vm204_vm6, %v5389_v60, %v5394_v6 }
0x12c1   :  { %v5408_v11 = vsel %vm74_vm0, %v5407_v37, %v5398_v42 }
0x12c2   :  { %v5410_v9 = vsel %vm5409_vm13, %v5408_v11, %v5402_v56 }
0x12c3   :  { %v5405_v40 = vpop.permute.xlu1 %5404 }
0x12c4   :  { %v5412_v13 = vsel %vm5411_vm14, %v5410_v9, %v5405_v40 }
0x12c5   :  { %v5414_v34 = vsel %vm5413_vm15, %v5412_v13, 0.0 }
0x12c6   :  { %5415 = vst [vmem:[#allocation6] sm:$0xff] %v5414_v34 }
0x12c7   :  { %6561 = shalt.err (!%p6558_p4)
}
0x12c8   :  { %5425 = dma.vmem_to_hbm [thread:$0]  %s5423_s0, 128, %s7765_s16, [#allocation7]  }
0x12c9   :  { %6570 = dma.done.wait [#allocation7], 128  }
0x12ca   :  { %6571 = vsyncadd [#allocation7], 4294967168 }
0x12cb   :  { %5429 = vsyncpa [#allocation7], 1 }

</bundles_post_ra>
